<compile_context>
chip_gen: v5e
topology: v5e:2x2
jax: 0.10.0
libtpu: 0.0.40
codegen_flags: <defaults>
</compile_context>

<pallas_src>
import functools

import jax
import jax.numpy as jnp
from jax.experimental import pallas as pl
from jax.experimental.pallas import tpu as pltpu

BLOCK_SIZE = 24
COLUMNS = 20
IN_DIM = BLOCK_SIZE * COLUMNS          # 480
H3_PAD = 128                           # layer-3 width padded 64 -> 128
BM_CAP = 1024                          # max batch-tile rows (VMEM-safe incl. v7x)
DIMS = [IN_DIM, 256, 128, 64, 1]


def _cdiv(a, b):
    return -(-a // b)


def _round_up(a, b):
    return _cdiv(a, b) * b


def _pick_bm(batch):
    """Batch-tile rows: big tiles to amortize per-grid-step overhead, an even
    >=2-step grid so v7x's two TensorCores both get work, rows multiple of 32
    (keeps f32/bf16 sublane tiling aligned)."""
    if batch <= 32:
        return 32
    n_steps = max(2, 2 * _cdiv(batch, 2 * BM_CAP))   # even, >= 2
    return min(_round_up(_cdiv(batch, n_steps), 32), BM_CAP)


def _mlp_kernel(x_ref,
                w1_ref, b1_ref,
                w2_ref, b2_ref,
                w3_ref, b3_ref,
                w4_ref, b4_ref,
                o_ref):
    # In-kernel cast of the streamed f32 x tile (no wrapper pre-pass).
    x = x_ref[...].astype(jnp.bfloat16)                     # (bm, 480)
    # Layer 1: (bm, 480) @ (480, 256), bf16 in, f32 accumulation.
    h = jnp.dot(x, w1_ref[...], preferred_element_type=jnp.float32)
    h = jnp.maximum(h + b1_ref[...], 0.0)
    # Layer 2: (bm, 256) @ (256, 128)
    h = jnp.dot(h.astype(jnp.bfloat16), w2_ref[...],
                preferred_element_type=jnp.float32)
    h = jnp.maximum(h + b2_ref[...], 0.0)
    # Layer 3: (bm, 128) @ (128, 128)  (output width zero-padded 64 -> 128)
    h = jnp.dot(h.astype(jnp.bfloat16), w3_ref[...],
                preferred_element_type=jnp.float32)
    h = jnp.maximum(h + b3_ref[...], 0.0)                   # (bm, 128) f32
    # Layer 4 (128 -> 1): VPU/XLU reduction instead of an N=1 MXU matmul.
    # Transpose in bf16 (half the XLU bytes), accumulate in f32; result lands
    # lane-dense as (1, bm).
    h_t = jnp.transpose(h.astype(jnp.bfloat16))             # (128, bm) bf16
    logit = jnp.sum(h_t * w4_ref[...], axis=0, keepdims=True) + b4_ref[...]
    out = jax.nn.sigmoid(logit)                              # (1, bm) f32
    o_ref[...] = out.reshape(o_ref.shape).astype(o_ref.dtype)


def _full_spec(arr):
    ndim = arr.ndim
    return pl.BlockSpec(arr.shape, lambda i, _n=ndim: (0,) * _n)


def prepare_params(params):
    """Pad / cast / lay out weights once, outside the kernel.

    params: list of (W_t (in, out) f32, b (1, out) f32), PyTorch semantics.
    """
    (w1, b1), (w2, b2), (w3, b3), (w4, b4) = params
    w1p = w1.astype(jnp.bfloat16)                                          # (480, 256)
    w2p = w2.astype(jnp.bfloat16)                                          # (256, 128)
    w3p = jnp.pad(w3, ((0, 0), (0, H3_PAD - 64))).astype(jnp.bfloat16)     # (128, 128)
    b3p = jnp.pad(b3, ((0, 0), (0, H3_PAD - 64))).astype(jnp.float32)      # (1, 128)
    w4p = jnp.pad(w4, ((0, H3_PAD - 64), (0, 0))).astype(jnp.float32)      # (128, 1)
    return (w1p, b1.astype(jnp.float32),
            w2p, b2.astype(jnp.float32),
            w3p, b3p,
            w4p, b4.astype(jnp.float32))


@functools.partial(jax.jit, static_argnames=("bm",))
def mlp_forward(x, prepared, *, bm=None):
    """x: (B, 480) float32; prepared: output of prepare_params. Returns (B, 1) f32."""
    B, F = x.shape
    assert F == IN_DIM
    if bm is None:
        bm = _pick_bm(B)
    n_tiles = _cdiv(B, bm)
    b_pad = n_tiles * bm

    # x goes in untouched (f32, K=480) in the common B % bm == 0 case.
    xp = x if b_pad == B else jnp.pad(x, ((0, b_pad - B), (0, 0)))

    w1, b1, w2, b2, w3, b3, w4, b4 = prepared
    flat = [w1, b1, w2, b2, w3, b3, w4, b4]

    flops = 2 * b_pad * (IN_DIM * 256 + 256 * 128 + 128 * H3_PAD + H3_PAD)
    bytes_accessed = (b_pad * IN_DIM * 4
                      + sum(int(a.size) * a.dtype.itemsize for a in flat)
                      + b_pad * 4)

    out = pl.pallas_call(
        _mlp_kernel,
        out_shape=jax.ShapeDtypeStruct((n_tiles, 1, bm), jnp.float32),
        grid_spec=pltpu.PrefetchScalarGridSpec(
            num_scalar_prefetch=0,
            grid=(n_tiles,),
            in_specs=[pl.BlockSpec((bm, IN_DIM), lambda i: (i, 0))]
                     + [_full_spec(a) for a in flat],
            out_specs=pl.BlockSpec((1, 1, bm), lambda i: (i, 0, 0)),
        ),
        compiler_params=pltpu.CompilerParams(
            dimension_semantics=("parallel",),
            vmem_limit_bytes=32 * 1024 * 1024),
        cost_estimate=pl.CostEstimate(
            flops=flops, transcendentals=b_pad, bytes_accessed=bytes_accessed),
    )(xp, *flat)

    # (n_tiles, 1, bm) lane-dense kernel output -> (B, 1); slice only if padded.
    if b_pad == B:
        return out.reshape(B, 1)
    return out.reshape(-1)[:B].reshape(B, 1)


def init_params(key):
    """Deterministic init mimicking nn.Linear's uniform(-1/sqrt(in), 1/sqrt(in))."""
    params = []
    for i in range(len(DIMS) - 1):
        fan_in, fan_out = DIMS[i], DIMS[i + 1]
        key, kw, kb = jax.random.split(key, 3)
        bound = 1.0 / jnp.sqrt(jnp.float32(fan_in))
        w_t = jax.random.uniform(kw, (fan_in, fan_out), jnp.float32,
                                 minval=-bound, maxval=bound)   # stored (in, out)
        b = jax.random.uniform(kb, (1, fan_out), jnp.float32,
                               minval=-bound, maxval=bound)
        params.append((w_t, b))
    return params


def reference_forward(x, params):
    h = x
    for idx, (w, b) in enumerate(params):
        h = h @ w + b
        h = jnp.maximum(h, 0.0) if idx < len(params) - 1 else jax.nn.sigmoid(h)
    return h


if __name__ == "__main__":
    key = jax.random.PRNGKey(0)
    kx, kp = jax.random.split(key)

    batch = 512  # picker gives bm=256 -> 2 parallel grid steps (both v7x TCs busy)
    x = jax.random.normal(kx, (batch, IN_DIM), jnp.float32)
    params = init_params(kp)
    prepared = prepare_params(params)

    out = jax.block_until_ready(mlp_forward(x, prepared))
    ref = reference_forward(x, params)

    assert out.shape == (batch, 1), out.shape
    max_err = float(jnp.max(jnp.abs(out - ref)))
    # bf16 weights/activations on the MXU vs a pure-f32 reference.
    assert max_err < 2e-2, f"mismatch vs pure-JAX reference (max err {max_err})"

    print("KERNEL_OK")
</pallas_src>

<mosaic_0001>
module attributes {stable_mosaic.version = 11 : i64} {
  func.func @_mlp_kernel(%arg0: i32, %arg1: memref<256x480xf32, #tpu.memory_space<vmem>>, %arg2: memref<480x256xbf16, #tpu.memory_space<vmem>>, %arg3: memref<1x256xf32, #tpu.memory_space<vmem>>, %arg4: memref<256x128xbf16, #tpu.memory_space<vmem>>, %arg5: memref<1x128xf32, #tpu.memory_space<vmem>>, %arg6: memref<128x128xbf16, #tpu.memory_space<vmem>>, %arg7: memref<1x128xf32, #tpu.memory_space<vmem>>, %arg8: memref<128x1xf32, #tpu.memory_space<vmem>>, %arg9: memref<1x1xf32, #tpu.memory_space<vmem>>, %arg10: memref<1x1x256xf32, #tpu.memory_space<vmem>>) attributes {dimension_semantics = [#tpu.dimension_semantics<parallel>], iteration_bounds = array<i64: 2>, scalar_prefetch = 0 : i64, scratch_operands = 0 : i64, tpu.core_type = #tpu.core_type<tc>, window_params = [{transform_indices = @transform_0, window_bounds = array<i64: 256, 480>}, {pipeline_mode = #tpu.pipeline_mode<synchronous>, transform_indices = @transform_1, window_bounds = array<i64: 480, 256>}, {pipeline_mode = #tpu.pipeline_mode<synchronous>, transform_indices = @transform_2, window_bounds = array<i64: 1, 256>}, {pipeline_mode = #tpu.pipeline_mode<synchronous>, transform_indices = @transform_3, window_bounds = array<i64: 256, 128>}, {pipeline_mode = #tpu.pipeline_mode<synchronous>, transform_indices = @transform_4, window_bounds = array<i64: 1, 128>}, {pipeline_mode = #tpu.pipeline_mode<synchronous>, transform_indices = @transform_5, window_bounds = array<i64: 128, 128>}, {pipeline_mode = #tpu.pipeline_mode<synchronous>, transform_indices = @transform_6, window_bounds = array<i64: 1, 128>}, {pipeline_mode = #tpu.pipeline_mode<synchronous>, transform_indices = @transform_7, window_bounds = array<i64: 128, 1>}, {pipeline_mode = #tpu.pipeline_mode<synchronous>, transform_indices = @transform_8, window_bounds = array<i64: 1, 1>}, {transform_indices = @transform_9, window_bounds = array<i64: 1, 1, 256>}]} {
    %c0 = arith.constant 0 : index
    %c0_0 = arith.constant 0 : index
    %0 = vector.load %arg1[%c0, %c0_0] : memref<256x480xf32, #tpu.memory_space<vmem>>, vector<256x480xf32>
    %1 = arith.truncf %0 : vector<256x480xf32> to vector<256x480xbf16>
    %c0_1 = arith.constant 0 : index
    %c0_2 = arith.constant 0 : index
    %2 = vector.load %arg2[%c0_1, %c0_2] : memref<480x256xbf16, #tpu.memory_space<vmem>>, vector<480x256xbf16>
    %cst = arith.constant dense<0.000000e+00> : vector<256x256xf32>
    %3 = tpu.matmul %1, %2, %cst {dimension_numbers = #tpu.dot_dimension_numbers<[1], [0], [0], [1], [0, 0, 1, 1], [], []>} : vector<256x480xbf16>, vector<480x256xbf16>, vector<256x256xf32> -> vector<256x256xf32>
    %c0_3 = arith.constant 0 : index
    %c0_4 = arith.constant 0 : index
    %4 = vector.load %arg3[%c0_3, %c0_4] : memref<1x256xf32, #tpu.memory_space<vmem>>, vector<1x256xf32>
    %5 = vector.broadcast %4 : vector<1x256xf32> to vector<256x256xf32>
    %6 = arith.addf %3, %5 : vector<256x256xf32>
    %cst_5 = arith.constant 0.000000e+00 : f32
    %7 = vector.broadcast %cst_5 : f32 to vector<256x256xf32>
    %8 = arith.maximumf %6, %7 : vector<256x256xf32>
    %9 = arith.truncf %8 : vector<256x256xf32> to vector<256x256xbf16>
    %c0_6 = arith.constant 0 : index
    %c0_7 = arith.constant 0 : index
    %10 = vector.load %arg4[%c0_6, %c0_7] : memref<256x128xbf16, #tpu.memory_space<vmem>>, vector<256x128xbf16>
    %cst_8 = arith.constant dense<0.000000e+00> : vector<256x128xf32>
    %11 = tpu.matmul %9, %10, %cst_8 {dimension_numbers = #tpu.dot_dimension_numbers<[1], [0], [0], [1], [0, 0, 1, 1], [], []>} : vector<256x256xbf16>, vector<256x128xbf16>, vector<256x128xf32> -> vector<256x128xf32>
    %c0_9 = arith.constant 0 : index
    %c0_10 = arith.constant 0 : index
    %12 = vector.load %arg5[%c0_9, %c0_10] : memref<1x128xf32, #tpu.memory_space<vmem>>, vector<1x128xf32>
    %13 = vector.broadcast %12 : vector<1x128xf32> to vector<256x128xf32>
    %14 = arith.addf %11, %13 : vector<256x128xf32>
    %cst_11 = arith.constant 0.000000e+00 : f32
    %15 = vector.broadcast %cst_11 : f32 to vector<256x128xf32>
    %16 = arith.maximumf %14, %15 : vector<256x128xf32>
    %17 = arith.truncf %16 : vector<256x128xf32> to vector<256x128xbf16>
    %c0_12 = arith.constant 0 : index
    %c0_13 = arith.constant 0 : index
    %18 = vector.load %arg6[%c0_12, %c0_13] : memref<128x128xbf16, #tpu.memory_space<vmem>>, vector<128x128xbf16>
    %cst_14 = arith.constant dense<0.000000e+00> : vector<256x128xf32>
    %19 = tpu.matmul %17, %18, %cst_14 {dimension_numbers = #tpu.dot_dimension_numbers<[1], [0], [0], [1], [0, 0, 1, 1], [], []>} : vector<256x128xbf16>, vector<128x128xbf16>, vector<256x128xf32> -> vector<256x128xf32>
    %c0_15 = arith.constant 0 : index
    %c0_16 = arith.constant 0 : index
    %20 = vector.load %arg7[%c0_15, %c0_16] : memref<1x128xf32, #tpu.memory_space<vmem>>, vector<1x128xf32>
    %21 = vector.broadcast %20 : vector<1x128xf32> to vector<256x128xf32>
    %22 = arith.addf %19, %21 : vector<256x128xf32>
    %cst_17 = arith.constant 0.000000e+00 : f32
    %23 = vector.broadcast %cst_17 : f32 to vector<256x128xf32>
    %24 = arith.maximumf %22, %23 : vector<256x128xf32>
    %25 = arith.truncf %24 : vector<256x128xf32> to vector<256x128xbf16>
    %26 = tpu.transpose %25, [1, 0] : vector<256x128xbf16> -> vector<128x256xbf16>
    %c0_18 = arith.constant 0 : index
    %c0_19 = arith.constant 0 : index
    %27 = vector.load %arg8[%c0_18, %c0_19] : memref<128x1xf32, #tpu.memory_space<vmem>>, vector<128x1xf32>
    %28 = arith.extf %26 : vector<128x256xbf16> to vector<128x256xf32>
    %29 = vector.broadcast %27 : vector<128x1xf32> to vector<128x256xf32>
    %30 = arith.mulf %28, %29 : vector<128x256xf32>
    %cst_20 = arith.constant dense<0.000000e+00> : vector<256xf32>
    %31 = vector.multi_reduction <add>, %30, %cst_20 [0] : vector<128x256xf32> to vector<256xf32>
    %32 = vector.shape_cast %31 : vector<256xf32> to vector<1x256xf32>
    %c0_21 = arith.constant 0 : index
    %c0_22 = arith.constant 0 : index
    %33 = vector.load %arg9[%c0_21, %c0_22] : memref<1x1xf32, #tpu.memory_space<vmem>>, vector<1x1xf32>
    %34 = vector.broadcast %33 : vector<1x1xf32> to vector<1x256xf32>
    %35 = arith.addf %32, %34 : vector<1x256xf32>
    %36 = arith.negf %35 : vector<1x256xf32>
    %37 = math.exp %36 : vector<1x256xf32>
    %cst_23 = arith.constant 1.000000e+00 : f32
    %38 = vector.broadcast %cst_23 : f32 to vector<1x256xf32>
    %39 = arith.addf %38, %37 : vector<1x256xf32>
    %40 = arith.divf %38, %39 : vector<1x256xf32>
    %41 = vector.shape_cast %40 : vector<1x256xf32> to vector<1x1x256xf32>
    %c0_24 = arith.constant 0 : index
    %c0_25 = arith.constant 0 : index
    %c0_26 = arith.constant 0 : index
    %42 = vector.load %arg10[%c0_24, %c0_25, %c0_26] : memref<1x1x256xf32, #tpu.memory_space<vmem>>, vector<1x1x256xf32>
    tpu.vector_store %arg10[%c0_24, %c0_25, %c0_26], %41 {strides = array<i32>} : memref<1x1x256xf32, #tpu.memory_space<vmem>>, vector<1x1x256xf32>,
    return
  }
  func.func @transform_0(%arg0: i32) -> (i32, i32) {
    %c0_i32 = arith.constant 0 : i32
    %c0_i32_0 = arith.constant 0 : i32
    return %arg0, %c0_i32 : i32, i32
  }
  func.func @transform_1(%arg0: i32) -> (i32, i32) {
    %c0_i32 = arith.constant 0 : i32
    %c0_i32_0 = arith.constant 0 : i32
    %c0_i32_1 = arith.constant 0 : i32
    return %c0_i32, %c0_i32_0 : i32, i32
  }
  func.func @transform_2(%arg0: i32) -> (i32, i32) {
    %c0_i32 = arith.constant 0 : i32
    %c0_i32_0 = arith.constant 0 : i32
    %c0_i32_1 = arith.constant 0 : i32
    return %c0_i32, %c0_i32_0 : i32, i32
  }
  func.func @transform_3(%arg0: i32) -> (i32, i32) {
    %c0_i32 = arith.constant 0 : i32
    %c0_i32_0 = arith.constant 0 : i32
    %c0_i32_1 = arith.constant 0 : i32
    return %c0_i32, %c0_i32_0 : i32, i32
  }
  func.func @transform_4(%arg0: i32) -> (i32, i32) {
    %c0_i32 = arith.constant 0 : i32
    %c0_i32_0 = arith.constant 0 : i32
    %c0_i32_1 = arith.constant 0 : i32
    return %c0_i32, %c0_i32_0 : i32, i32
  }
  func.func @transform_5(%arg0: i32) -> (i32, i32) {
    %c0_i32 = arith.constant 0 : i32
    %c0_i32_0 = arith.constant 0 : i32
    %c0_i32_1 = arith.constant 0 : i32
    return %c0_i32, %c0_i32_0 : i32, i32
  }
  func.func @transform_6(%arg0: i32) -> (i32, i32) {
    %c0_i32 = arith.constant 0 : i32
    %c0_i32_0 = arith.constant 0 : i32
    %c0_i32_1 = arith.constant 0 : i32
    return %c0_i32, %c0_i32_0 : i32, i32
  }
  func.func @transform_7(%arg0: i32) -> (i32, i32) {
    %c0_i32 = arith.constant 0 : i32
    %c0_i32_0 = arith.constant 0 : i32
    %c0_i32_1 = arith.constant 0 : i32
    return %c0_i32, %c0_i32_0 : i32, i32
  }
  func.func @transform_8(%arg0: i32) -> (i32, i32) {
    %c0_i32 = arith.constant 0 : i32
    %c0_i32_0 = arith.constant 0 : i32
    %c0_i32_1 = arith.constant 0 : i32
    return %c0_i32, %c0_i32_0 : i32, i32
  }
  func.func @transform_9(%arg0: i32) -> (i32, i32, i32) {
    %c0_i32 = arith.constant 0 : i32
    %c0_i32_0 = arith.constant 0 : i32
    %c0_i32_1 = arith.constant 0 : i32
    return %arg0, %c0_i32, %c0_i32_0 : i32, i32, i32
  }
}

</mosaic_0001>

<bundles_post_ra>
// kernel: mlp_forward.1
= control target key start
LH: loop header
LB: loop body
LE: loop exit
PB: predicated region body
PF: predicated region fallthrough
CT: control target
= control target key end

     0   :  { %s4998_s0 = inlined_call_operand.vmem [shape: f32[512,480], index: 0, kind: input, shape index: {}]   ;;  %s4999_s1 = inlined_call_operand.vmem [shape: bf16[480,256], index: 1, kind: input, shape index: {}]   ;;  %s5000_s2 = inlined_call_operand.vmem [shape: f32[1,256], index: 2, kind: input, shape index: {}]   ;;  %s5001_s3 = inlined_call_operand.vmem [shape: bf16[256,128], index: 3, kind: input, shape index: {}]   ;;  %s5002_s4 = inlined_call_operand.vmem [shape: f32[1,128], index: 4, kind: input, shape index: {}]   ;;  %s5003_s5 = inlined_call_operand.vmem [shape: bf16[128,128], index: 5, kind: input, shape index: {}]   ;;  %s5004_s6 = inlined_call_operand.vmem [shape: f32[1,128], index: 6, kind: input, shape index: {}]   ;;  %s5005_s7 = inlined_call_operand.vmem [shape: f32[128,1], index: 7, kind: input, shape index: {}]   ;;  %s5006_s8 = inlined_call_operand.<no memory space> [shape: f32[1,1], index: 8, kind: input, shape index: {}]   ;;  %s5007_s9 = inlined_call_operand.hbm [shape: f32[2,1,256], index: 9, kind: output, shape index: {}]  }
   0x1   :  { %v14_v0 = vstv %s5006_s8 }
   0x2   :  { %15 = vst [vmem:[#allocation2] sm:$0x1] %v14_v0 }
   0x3   :  { %16 = vsyncpa [#allocation4], 0 }
   0x4   :  { %18 = vsyncpa [#allocation4 + $0x1], 0  ;;  %s3368_s11 = smov 0   ;;  %s3370_s12 = smov 0  }
   0x5   :  { %s3372_s13 = smov 0   ;;  %s3374_s14 = smov 0  }
   0x6 LB: > { %s3389_s8 = sadd.s32 4294967295, %s3312_s14   ;;  %s2684_s15 = sadd.s32 4294967294, %s3312_s14   ;;  %s3312_s14 = sphi %s3374_s14, %s5117_s14   ;;  %s3308_s13 = sphi %s3372_s13, %s5116_s13   ;;  %s3304_s12 = sphi %s3370_s12, %s5115_s12   ;;  %s3300_s11 = sphi %s3368_s11, %s5114_s11  }
   0x7   : > { %s3393_s16 = sadd.s32 1, %s3312_s14   ;;  %s225_s17 = sadd.s32 1, %s3308_s13 }
   0x8   : > { %s222_s18 = ssub.s32 %s3312_s14, %s3393_s16  ;;  %p235_p0 = scmp.ne.s32.totalorder %s3308_s13, %s3304_s12 }
   0x9   : > { %p223_p1 = scmp.eq.s32.totalorder %s222_s18, 0  ;;  %p236_p2 = scmp.eq.s32.totalorder %s3389_s8, 1 }
   0xa   : > { %p241_p3 = scmp.ne.s32.totalorder %s3304_s12, %s3300_s11  ;;  %p242_p4 = scmp.eq.s32.totalorder %s2684_s15, 1 }
   0xb   : > { %s3404_s19 = scalar_select %p223_p1, %s3308_s13, %s225_s17  }
   0xc   : > { %p3406_p5 = por %p236_p2, %p235_p0  ;;  %p3410_p6 = por %p242_p4, %p241_p3 }
   0xd   : > { %p2687_p7 = scmp.ge.s32.totalorder %s3312_s14, 1  ;;  %p294_p8 = scmp.lt.s32.totalorder %s3312_s14, 3 }
   0xf   : > { %p295_p9 = pnand %p2687_p7, %p294_p8 }
  0x11   : > { %298 = sbr.rel (%p295_p9) target bundleno = 1391 (0x56f), region = 56 }
  0x16   : > { %v2750_v1 = vld [vmem:[%s4999_s1 + $0x70] sm:$0xf]  ;;  %v3082_v2 = vld [vmem:[%s4999_s1 + $0x74] sm:$0xf0]  ;;  %v2742_v3 = vld [vmem:[%s4999_s1 + $0x60] sm:$0xf] }
  0x17   : > { %v2751_v4 = vor.u32 %v3082_v2, %v2750_v1  ;;  %v3080_v5 = vld [vmem:[%s4999_s1 + $0x64] sm:$0xf0]  ;;  %v2734_v7 = vld [vmem:[%s4999_s1 + $0x50] sm:$0xf]  ;;  %v3078_v8 = vld [vmem:[%s4999_s1 + $0x54] sm:$0xf0] }
  0x18   : > { %v2743_v6 = vor.u32 %v3080_v5, %v2742_v3  ;;  %v2814_v9 = vld [vmem:[%s4999_s1 + $0xf0] sm:$0xf]  ;;  %v3098_v10 = vld [vmem:[%s4999_s1 + $0xf4] sm:$0xf0]  ;;  %v2735_v11 = vor.u32 %v3078_v8, %v2734_v7  ;;  %v2726_v12 = vld [vmem:[%s4999_s1 + $0x40] sm:$0xf] }
  0x19   : > { %3151 = vmatpush.bf16.msra.mxu2 %v2751_v4  ;;  %946 = vmatpush.bf16.msra.mxu0 %v2751_v4  ;;  %v2815_v13 = vor.u32 %v3098_v10, %v2814_v9  ;;  %v3076_v14 = vld [vmem:[%s4999_s1 + $0x44] sm:$0xf0]  ;;  %v2806_v15 = vld [vmem:[%s4999_s1 + $0xe0] sm:$0xf]  ;;  %s2689_s17 = sshll.u32 %s3389_s8, 5  ;;  %vm897_vm0 = vcmask 785408  }
  0x1a   : > { %v3096_v16 = vld [vmem:[%s4999_s1 + $0xe4] sm:$0xf0]  ;;  %v2727_v17 = vor.u32 %v3076_v14, %v2726_v12  ;;  %v2718_v19 = vld [vmem:[%s4999_s1 + $0x30] sm:$0xf]  ;;  %v3074_v20 = vld [vmem:[%s4999_s1 + $0x34] sm:$0xf0] }
  0x1b   : > { %1035 = vmatpush.bf16.msra.mxu1 %v2815_v13  ;;  %v2807_v18 = vor.u32 %v3096_v16, %v2806_v15  ;;  %p332_p10 = scmp.lt.s32.totalorder %s2689_s17, 63  ;;  %v2719_v21 = vor.u32 %v3074_v20, %v2718_v19  ;;  %v2710_v22 = vld [vmem:[%s4999_s1 + $0x20] sm:$0xf]  ;;  %v3072_v23 = vld [vmem:[%s4999_s1 + $0x24] sm:$0xf0]  ;;  %s328_s15 = sand.u32 1, %s3304_s12  }
  0x1c   : > { %v2798_v24 = vld [vmem:[%s4999_s1 + $0xd0] sm:$0xf]  ;;  %v3094_v25 = vld [vmem:[%s4999_s1 + $0xd4] sm:$0xf0]  ;;  %v2711_v26 = vor.u32 %v3072_v23, %v2710_v22  ;;  %v2790_v30 = vld [vmem:[%s4999_s1 + $0xc0] sm:$0xf] }
  0x1d   : > { %3152 = vmatpush.bf16.msra.mxu2 %v2743_v6  ;;  %947 = vmatpush.bf16.msra.mxu0 %v2743_v6  ;;  %s5119_s17 = smov (!%p332_p10, %s2689_s17), 63  ;;  %v2702_v27 = vld [vmem:[%s4999_s1 + $0x10] sm:$0xf]  ;;  %v2799_v28 = vor.u32 %v3094_v25, %v2798_v24  ;;  %v3070_v29 = vld [vmem:[%s4999_s1 + $0x14] sm:$0xf0]  ;;  %s4956_s18 = sshll.u32 %s328_s15, 1 }
  0x1e   : > { %v3092_v31 = vld [vmem:[%s4999_s1 + $0xc4] sm:$0xf0]  ;;  %s3066_s29 = sshll.u32 %s5119_s17, 5  ;;  %v2703_v32 = vor.u32 %v3070_v29, %v2702_v27  ;;  %v2694_v34 = vld [vmem:[%s4999_s1] sm:$0xf]  ;;  %s3063_s22 = sshll.u32 %s3389_s8, 1 }
  0x1f   : > { %1036 = vmatpush.bf16.msra.mxu1 %v2807_v18  ;;  %v2791_v33 = vor.u32 %v3092_v31, %v2790_v30  ;;  %v3068_v35 = vld [vmem:[%s4999_s1 + $0x4] sm:$0xf0]  ;;  %s3492_s24 = scalar_lea.vmem %s4998_s0, %s3066_s29  ;;  %v2782_v40 = vld [vmem:[%s4999_s1 + $0xb0] sm:$0xf]  ;;  %v3090_v41 = vld [vmem:[%s4999_s1 + $0xb4] sm:$0xf0]  ;;  %s2620_s25 = scalar_lea.hbm %s5007_s9, %s3063_s22 }
  0x20   : > { %v2695_v36 = vor.u32 %v3068_v35, %v2694_v34  ;;  %v435_v37 = vld [vmem:[%s3492_s24 + $0x300] sm:$0xff]  ;;  %v2783_v42 = vor.u32 %v3090_v41, %v2782_v40  ;;  %v2926_v44 = vld [vmem:[%s4999_s1 + $0x1d0] sm:$0xf]  ;;  %v3126_v45 = vld [vmem:[%s4999_s1 + $0x1d4] sm:$0xf0]  ;;  %s330_s8 = scalar_lea.vmem [#allocation3], %s4956_s18 }
  0x21   : > { %3153 = vmatpush.bf16.msra.mxu2 %v2735_v11  ;;  %948 = vmatpush.bf16.msra.mxu0 %v2735_v11  ;;  %v439_v38 = vld [vmem:[%s3492_s24 + $0x320] sm:$0xff]  ;;  %v3088_v46 = vld [vmem:[%s4999_s1 + $0xa4] sm:$0xf0]  ;;  %v3517_v47 = vor.u32 %v3126_v45, %v2926_v44  ;;  %v2766_v55 = vld [vmem:[%s4999_s1 + $0x90] sm:$0xf]  ;;  %s2622_s26 = sshll.u32 %s330_s8, 4  ;;  %s2623_s26 = int_to_ptr.vmem [resolvable:$true] %s2622_s26 }
  0x22   : > { %v3496_v39 = vpack.c.bf16 %v439_v38, %v435_v37  ;;  %v2774_v43 = vld [vmem:[%s4999_s1 + $0xa0] sm:$0xf]  ;;  %v3124_v49 = vld [vmem:[%s4999_s1 + $0x1c4] sm:$0xf0]  ;;  %v3086_v56 = vld [vmem:[%s4999_s1 + $0x94] sm:$0xf0] }
  0x23   : > { %1037 = vmatpush.bf16.msra.mxu1 %v2799_v28  ;;  %v2918_v48 = vld [vmem:[%s4999_s1 + $0x1c0] sm:$0xf]  ;;  %3167 = vmatpush.bf16.msra.mxu3 %v3517_v47  ;;  %v2775_v51 = vor.u32 %v3088_v46, %v2774_v43  ;;  %v2910_v57 = vld [vmem:[%s4999_s1 + $0x1b0] sm:$0xf]  ;;  %v2767_v58 = vor.u32 %v3086_v56, %v2766_v55  ;;  %v3122_v59 = vld [vmem:[%s4999_s1 + $0x1b4] sm:$0xf0] }
  0x24   : > { %5034 = vst [vmem:[#allocation6_spill] sm:$0xff] %v3496_v39  ;;  %v3526_v50 = vor.u32 %v3124_v49, %v2918_v48  ;;  %v443_v52 = vld [vmem:[%s3492_s24 + $0x340] sm:$0xff]  ;;  %v3120_v61 = vld [vmem:[%s4999_s1 + $0x1a4] sm:$0xf0]  ;;  %v3552_v62 = vor.u32 %v3122_v59, %v2910_v57  ;;  %v2894_v3 = vld [vmem:[%s4999_s1 + $0x190] sm:$0xf] }
  0x25   : > { %3154 = vmatpush.bf16.msra.mxu2 %v2727_v17  ;;  %949 = vmatpush.bf16.msra.mxu0 %v2727_v17  ;;  %v447_v53 = vld [vmem:[%s3492_s24 + $0x360] sm:$0xff]  ;;  %v3084_v0 = vld [vmem:[%s4999_s1 + $0x84] sm:$0xf0]  ;;  %v3118_v4 = vld [vmem:[%s4999_s1 + $0x194] sm:$0xf0]  ;;  %s2624_s27 = sshll.u32 %s2620_s25, 4  ;;  %s2625_s27 = int_to_ptr.hbm [resolvable:$true] %s2624_s27 }
  0x26   : > { %v3531_v54 = vpack.c.bf16 %v447_v53, %v443_v52  ;;  %v2902_v60 = vld [vmem:[%s4999_s1 + $0x1a0] sm:$0xf]  ;;  %v3571_v6 = vor.u32 %v3118_v4, %v2894_v3  ;;  %v3116_v9 = vld [vmem:[%s4999_s1 + $0x184] sm:$0xf0]  ;;  %v366_v12 = vld [vmem:[%s3492_s24 + $0xd8] sm:$0xff]  ;;  %vm2601_vm8 = vcmask 1040384  }
  0x27   : > { %1038 = vmatpush.bf16.msra.mxu1 %v2791_v33  ;;  %3168 = vmatpush.bf16.msra.mxu3 %v3526_v50  ;;  %v2758_v63 = vld [vmem:[%s4999_s1 + $0x80] sm:$0xf]  ;;  %v3561_v1 = vor.u32 %v3120_v61, %v2902_v60  ;;  %v2878_v14 = vld [vmem:[%s4999_s1 + $0x170] sm:$0xf]  ;;  %v3114_v15 = vld [vmem:[%s4999_s1 + $0x174] sm:$0xf0] }
  0x28   : > { %5035 = vst [vmem:[#allocation7_spill] sm:$0xff] %v3531_v54  ;;  %v2759_v2 = vor.u32 %v3084_v0, %v2758_v63  ;;  %v451_v5 = vld [vmem:[%s3492_s24 + $0x380] sm:$0xff]  ;;  %v2879_v17 = vor.u32 %v3114_v15, %v2878_v14  ;;  %v3112_v19 = vld [vmem:[%s4999_s1 + $0x164] sm:$0xf0]  ;;  %v374_v24 = vld [vmem:[%s3492_s24 + $0x118] sm:$0xff]  ;;  %s2610_s28 = scalar_lea.sflag [#allocation4], %s328_s15 }
  0x29   : > { %3155 = vmatpush.bf16.msra.mxu2 %v2719_v21  ;;  %950 = vmatpush.bf16.msra.mxu0 %v2719_v21  ;;  %v455_v7 = vld [vmem:[%s3492_s24 + $0x3a0] sm:$0xff]  ;;  %v378_v25 = vld [vmem:[%s3492_s24 + $0x138] sm:$0xff]  ;;  %v3108_v31 = vld [vmem:[%s4999_s1 + $0x144] sm:$0xf0]  ;;  %s3264_s29 = sshra.s32 %s2625_s27, 4  ;;  %s3270_s18 = scalar_lea.hbm %s5007_s9, 4  ;;  %s3265_s29 = int_to_ptr.hbm [resolvable:$true] %s3264_s29 }
  0x2a   : > { %v2886_v8 = vld [vmem:[%s4999_s1 + $0x180] sm:$0xf]  ;;  %v3580_v10 = vpack.c.bf16 %v455_v7, %v451_v5  ;;  %v3110_v27 = vld [vmem:[%s4999_s1 + $0x154] sm:$0xf0]  ;;  %v440_v34 = vld [vmem:[%s3492_s24 + $0x328] sm:$0xff]  ;;  %s3266_s30 = scalar_lea.hbm %s3265_s29, 2  ;;  %p3271_p0 = scmp.lt.s32.totalorder %s3265_s29, %s5007_s9 }
  0x2b   : > { %1039 = vmatpush.bf16.msra.mxu1 %v2783_v42  ;;  %3169 = vmatpush.bf16.msra.mxu3 %v3552_v62  ;;  %v3583_v11 = vor.u32 %v3116_v9, %v2886_v8  ;;  %v459_v21 = vld [vmem:[%s3492_s24 + $0x3c0] sm:$0xff]  ;;  %v386_v37 = vld [vmem:[%s3492_s24 + $0x178] sm:$0xff]  ;;  %v2846_v38 = vld [vmem:[%s4999_s1 + $0x130] sm:$0xf]  ;;  %p3267_p11 = scmp.ne.s32.totalorder %s3265_s29, %s3266_s30  ;;  %p3272_p1 = scmp.lt.s32.totalorder %s3270_s18, %s3266_s30 }
  0x2c   : > { %5036 = vst [vmem:[#allocation8_spill] sm:$0xff] %v3580_v10  ;;  %v463_v22 = vld [vmem:[%s3492_s24 + $0x3e0] sm:$0xff]  ;;  %v3106_v40 = vld [vmem:[%s4999_s1 + $0x134] sm:$0xf0]  ;;  %v3104_v44 = vld [vmem:[%s4999_s1 + $0x124] sm:$0xf0] }
  0x2d   : > { %3156 = vmatpush.bf16.msra.mxu2 %v2711_v26  ;;  %951 = vmatpush.bf16.msra.mxu0 %v2711_v26  ;;  %v3607_v23 = vpack.c.bf16 %v463_v22, %v459_v21  ;;  %v2862_v26 = vld [vmem:[%s4999_s1 + $0x150] sm:$0xf]  ;;  %v2854_v29 = vld [vmem:[%s4999_s1 + $0x140] sm:$0xf]  ;;  %v2847_v43 = vor.u32 %v3106_v40, %v2846_v38  ;;  %v3081_v45 = vld [vmem:[%s4999_s1 + $0x74] sm:$0xf]  ;;  %p3268_p12 = pnand %p3267_p11, %p3406_p5  ;;  %p3273_p2 = por %p3272_p1, %p3271_p0 }
  0x2e   : > { %v2863_v30 = vor.u32 %v3110_v27, %v2862_v26  ;;  %v2752_v46 = vld [vmem:[%s4999_s1 + $0x78] sm:$0xf0]  ;;  %v448_v52 = vld [vmem:[%s3492_s24 + $0x368] sm:$0xff]  ;;  %v2830_v57 = vld [vmem:[%s4999_s1 + $0x110] sm:$0xf] }
  0x2f   : > { %1040 = vmatpush.bf16.msra.mxu1 %v2775_v51  ;;  %3170 = vmatpush.bf16.msra.mxu3 %v3561_v1  ;;  %5038 = vst [vmem:[#allocation10_spill] sm:$0xff] %v3607_v23  ;;  %v2755_v48 = vor.u32 %v3081_v45, %v2752_v46  ;;  %v390_v55 = vld [vmem:[%s3492_s24 + $0x198] sm:$0xff]  ;;  %v2822_v60 = vld [vmem:[%s4999_s1 + $0x100] sm:$0xf]  ;;  %v3100_v63 = vld [vmem:[%s4999_s1 + $0x104] sm:$0xf0]  ;;  %p3269_p13 = pneg %p3268_p12 }
  0x30   : > { %v394_v56 = vld [vmem:[%s3492_s24 + $0x1b8] sm:$0xff]  ;;  %v339_v0 = vld [vmem:[%s3492_s24] sm:$0xff]  ;;  %v340_v4 = vld [vmem:[%s3492_s24 + $0x8] sm:$0xff]  ;;  %v2823_v7 = vor.u32 %v3100_v63, %v2822_v60 }
  0x31   : > { %3157 = vmatpush.bf16.msra.mxu2 %v2703_v32  ;;  %952 = vmatpush.bf16.msra.mxu0 %v2703_v32  ;;  %v2855_v32 = vor.u32 %v3108_v31, %v2854_v29  ;;  %v3670_v59 = vpack.c.bf16 %v394_v56, %v390_v55  ;;  %v344_v5 = vld [vmem:[%s3492_s24 + $0x28] sm:$0xff]  ;;  %v398_v14 = vld [vmem:[%s3492_s24 + $0x1d8] sm:$0xff]  ;;  %v347_v21 = vld [vmem:[%s3492_s24 + $0x40] sm:$0xff]  ;;  %p3274_p3 = pnand %p3273_p2, %p3269_p13 }
  0x32   : > { %v3686_v8 = vpack.c.bf16 %v344_v5, %v340_v4  ;;  %v452_v9 = vld [vmem:[%s3492_s24 + $0x388] sm:$0xff]  ;;  %v402_v15 = vld [vmem:[%s3492_s24 + $0x1f8] sm:$0xff]  ;;  %v341_v40 = vld [vmem:[%s3492_s24 + $0x10] sm:$0xff] }
  0x33   : > { %1041 = vmatpush.bf16.msra.mxu1 %v2767_v58  ;;  %3171 = vmatpush.bf16.msra.mxu3 %v3571_v6  ;;  %5043 = vst [vmem:[#allocation15_spill] sm:$0xff] %v3670_v59  ;;  %v464_v26 = vld [vmem:[%s3492_s24 + $0x3e8] sm:$0xff]  ;;  %v418_v55 = vld [vmem:[%s3492_s24 + $0x278] sm:$0xff]  ;;  %v367_v60 = vld [vmem:[%s3492_s24 + $0xe0] sm:$0xff] }
  0x34   : > { %v348_v27 = vld [vmem:[%s3492_s24 + $0x48] sm:$0xff]  ;;  %v349_v63 = vld [vmem:[%s3492_s24 + $0x50] sm:$0xff] }
  0x35   : > { %3158 = vmatpush.bf16.msra.mxu2 %v2695_v36  ;;  %953 = vmatpush.bf16.msra.mxu0 %v2695_v36  ;;  %v382_v36 = vld [vmem:[%s3492_s24 + $0x158] sm:$0xff]  ;;  %v352_v29 = vld [vmem:[%s3492_s24 + $0x68] sm:$0xff] }
  0x36   : > { %v3641_v41 = vpack.c.bf16 %v386_v37, %v382_v36  ;;  %v3095_v36 = vld [vmem:[%s4999_s1 + $0xe4] sm:$0xf]  ;;  %v368_v4 = vld [vmem:[%s3492_s24 + $0xe8] sm:$0xff] }
  0x37   : > { %1042 = vmatpush.bf16.msra.mxu1 %v2759_v2  ;;  %3172 = vmatpush.bf16.msra.mxu3 %v3583_v11 }
  0x38   : > { %1014 = vmatmul.bf16.vlgmr.msra.gmra.mxu2 %v3496_v39  ;;  %5041 = vst [vmem:[#allocation13_spill] sm:$0xff] %v3641_v41 }
  0x39   : > { %3159 = vmatpush.bf16.msrb.mxu2 %v2815_v13  ;;  %v370_v13 = vld [vmem:[%s3492_s24 + $0xf8] sm:$0xff] }
  0x3a   : > { %v3595_v16 = vpack.c.bf16 %v370_v13, %v366_v12  ;;  %1043 = vmatmul.bf16.vlgmr.msra.gmra.mxu1 %v3686_v8  ;;  %v456_v12 = vld [vmem:[%s3492_s24 + $0x3a8] sm:$0xff] }
  0x3b   : > { %1302 = vmatpush.bf16.msrb.mxu3 %v2755_v48  ;;  %v3693_v13 = vpack.c.bf16 %v456_v12, %v452_v9  ;;  %v3077_v48 = vld [vmem:[%s4999_s1 + $0x54] sm:$0xf]  ;;  %v422_v12 = vld [vmem:[%s3492_s24 + $0x298] sm:$0xff] }
  0x3c   : > { %5037 = vst [vmem:[#allocation9_spill] sm:$0xff] %v3595_v16  ;;  %2935 = vmatmul.msk.bf16.vlgmr.msra.gmra.mxu3 %vm897_vm0, %v3595_v16 }
  0x3d   : > { %3160 = vmatpush.bf16.msrb.mxu2 %v2807_v18  ;;  %v2870_v18 = vld [vmem:[%s4999_s1 + $0x160] sm:$0xf]  ;;  %5044 = vst [vmem:[#allocation16_spill] sm:$0xff] %v3693_v13 }
  0x3e   : > { %v2871_v20 = vor.u32 %v3112_v19, %v2870_v18  ;;  %v3097_v18 = vld [vmem:[%s4999_s1 + $0xf4] sm:$0xf] }
  0x41   : > { %3161 = vmatpush.bf16.msrb.mxu2 %v2799_v28  ;;  %v3618_v28 = vpack.c.bf16 %v378_v25, %v374_v24  ;;  %v351_v24 = vld [vmem:[%s3492_s24 + $0x60] sm:$0xff]  ;;  %v460_v25 = vld [vmem:[%s3492_s24 + $0x3c8] sm:$0xff] }
  0x42   : > { %v3729_v31 = vpack.c.bf16 %v464_v26, %v460_v25  ;;  %v375_v25 = vld [vmem:[%s3492_s24 + $0x120] sm:$0xff] }
  0x43   : > { %5039 = vst [vmem:[#allocation11_spill] sm:$0xff] %v3618_v28 }
  0x44   : > { %5046 = vst [vmem:[#allocation18_spill] sm:$0xff] %v3729_v31 }
  0x45   : > { %3162 = vmatpush.bf16.msrb.mxu2 %v2791_v33  ;;  %v436_v33 = vld [vmem:[%s3492_s24 + $0x308] sm:$0xff] }
  0x46   : > { %v3630_v35 = vpack.c.bf16 %v440_v34, %v436_v33  ;;  %v359_v34 = vld [vmem:[%s3492_s24 + $0xa0] sm:$0xff] }
  0x48   : > { %1019 = vmatmul.bf16.gmra.mxu2 %v3531_v54  ;;  %5040 = vst [vmem:[#allocation12_spill] sm:$0xff] %v3630_v35  ;;  %v432_v54 = vld [vmem:[%s3492_s24 + $0x2e8] sm:$0xff] }
  0x49   : > { %3163 = vmatpush.bf16.msrb.mxu2 %v2783_v42  ;;  %v2838_v42 = vld [vmem:[%s4999_s1 + $0x120] sm:$0xf] }
  0x4a   : > { %v2839_v49 = vor.u32 %v3104_v44, %v2838_v42  ;;  %v345_v42 = vld [vmem:[%s3492_s24 + $0x30] sm:$0xff]  ;;  %v360_v44 = vld [vmem:[%s3492_s24 + $0xa8] sm:$0xff] }
  0x4b   : > { %v3757_v46 = vpack.c.bf16 %v345_v42, %v341_v40 }
  0x4c   : > { %2936 = vmatmul.msk.bf16.gmra.mxu3 %vm897_vm0, %v3618_v28 }
  0x4d   : > { %3164 = vmatpush.bf16.msrb.mxu2 %v2775_v51  ;;  %v444_v51 = vld [vmem:[%s3492_s24 + $0x348] sm:$0xff] }
  0x4e   : > { %v3659_v53 = vpack.c.bf16 %v448_v52, %v444_v51  ;;  %v414_v52 = vld [vmem:[%s3492_s24 + $0x258] sm:$0xff] }
  0x4f   : > { %v3769_v56 = vpack.c.bf16 %v418_v55, %v414_v52 }
  0x50   : > { %5042 = vst [vmem:[#allocation14_spill] sm:$0xff] %v3659_v53 }
  0x51   : > { %3165 = vmatpush.bf16.msrb.mxu2 %v2767_v58  ;;  %v3102_v58 = vld [vmem:[%s4999_s1 + $0x114] sm:$0xf0]  ;;  %5048 = vst [vmem:[#allocation20_spill] sm:$0xff] %v3769_v56 }
  0x52   : > { %v2831_v61 = vor.u32 %v3102_v58, %v2830_v57  ;;  %v363_v58 = vld [vmem:[%s3492_s24 + $0xc0] sm:$0xff] }
  0x55   : > { %3166 = vmatpush.bf16.msrb.mxu2 %v2759_v2  ;;  %v343_v2 = vld [vmem:[%s3492_s24 + $0x20] sm:$0xff] }
  0x56   : > { %v3680_v3 = vpack.c.bf16 %v343_v2, %v339_v0  ;;  %v353_v0 = vld [vmem:[%s3492_s24 + $0x70] sm:$0xff]  ;;  %v364_v2 = vld [vmem:[%s3492_s24 + $0xc8] sm:$0xff] }
  0x57   : > { %v3784_v5 = vpack.c.bf16 %v368_v4, %v364_v2  ;;  %v3788_v9 = vpack.c.bf16 %v353_v0, %v349_v63  ;;  %v380_v63 = vld [vmem:[%s3492_s24 + $0x148] sm:$0xff] }
  0x58   : > { %1024 = vmatmul.bf16.gmra.mxu2 %v3580_v10  ;;  %954 = vmatmul.bf16.vlgmr.msra.gmra.mxu0 %v3680_v3  ;;  %v384_v0 = vld [vmem:[%s3492_s24 + $0x168] sm:$0xff] }
  0x59   : > { %1124 = vmatpush.bf16.msra.mxu2 %v2879_v17  ;;  %v3699_v17 = vpack.c.bf16 %v402_v15, %v398_v14  ;;  %v426_v14 = vld [vmem:[%s3492_s24 + $0x2b8] sm:$0xff]  ;;  %v3854_v2 = vpack.c.bf16 %v384_v0, %v380_v63  ;;  %v424_v10 = vld [vmem:[%s3492_s24 + $0x2a8] sm:$0xff] }
  0x5a   : > { %v3794_v15 = vpack.c.bf16 %v426_v14, %v422_v12  ;;  %v446_v63 = vld [vmem:[%s3492_s24 + $0x358] sm:$0xff] }
  0x5b   : > { %5045 = vst [vmem:[#allocation17_spill] sm:$0xff] %v3699_v17  ;;  %v450_v0 = vld [vmem:[%s3492_s24 + $0x378] sm:$0xff] }
  0x5c   : > { %2937 = vmatmul.msk.bf16.gmra.mxu3 %vm897_vm0, %v3641_v41  ;;  %5049 = vst [vmem:[#allocation21_spill] sm:$0xff] %v3794_v15 }
  0x5d   : > { %1125 = vmatpush.bf16.msra.mxu2 %v2871_v20  ;;  %v2744_v20 = vld [vmem:[%s4999_s1 + $0x68] sm:$0xf0] }
  0x61   : > { %1126 = vmatpush.bf16.msra.mxu2 %v2863_v30  ;;  %v3727_v30 = vpack.c.bf16 %v352_v29, %v348_v27  ;;  %v357_v27 = vld [vmem:[%s3492_s24 + $0x90] sm:$0xff] }
  0x62   : > { %v361_v29 = vld [vmem:[%s3492_s24 + $0xb0] sm:$0xff] }
  0x63   : > { %1048 = vmatmul.bf16.gmra.mxu1 %v3727_v30 }
  0x65   : > { %1127 = vmatpush.bf16.msra.mxu2 %v2855_v32  ;;  %v410_v32 = vld [vmem:[%s3492_s24 + $0x238] sm:$0xff] }
  0x68   : > { %1029 = vmatmul.bf16.gmra.mxu2 %v3607_v23 }
  0x69   : > { %1128 = vmatpush.bf16.msra.mxu2 %v2847_v43  ;;  %v356_v43 = vld [vmem:[%s3492_s24 + $0x88] sm:$0xff] }
  0x6a   : > { %v3755_v45 = vpack.c.bf16 %v360_v44, %v356_v43  ;;  %v379_v43 = vld [vmem:[%s3492_s24 + $0x140] sm:$0xff] }
  0x6b   : > { %v383_v44 = vld [vmem:[%s3492_s24 + $0x160] sm:$0xff] }
  0x6c   : > { %2938 = vmatmul.msk.bf16.gmra.mxu3 %vm897_vm0, %v3670_v59  ;;  %v408_v59 = vld [vmem:[%s3492_s24 + $0x228] sm:$0xff] }
  0x6d   : > { %1129 = vmatpush.bf16.msra.mxu2 %v2839_v49  ;;  %v2736_v49 = vld [vmem:[%s4999_s1 + $0x58] sm:$0xf0] }
  0x6e   : > { %v2739_v51 = vor.u32 %v3077_v48, %v2736_v49  ;;  %v3091_v48 = vld [vmem:[%s4999_s1 + $0xc4] sm:$0xf]  ;;  %v3842_v49 = vpack.c.bf16 %v383_v44, %v379_v43  ;;  %v392_v43 = vld [vmem:[%s3492_s24 + $0x1a8] sm:$0xff] }
  0x71   : > { %1130 = vmatpush.bf16.msra.mxu2 %v2831_v61  ;;  %v3777_v61 = vpack.c.bf16 %v367_v60, %v363_v58  ;;  %v365_v58 = vld [vmem:[%s3492_s24 + $0xd0] sm:$0xff] }
  0x72   : > { %v369_v60 = vld [vmem:[%s3492_s24 + $0xf0] sm:$0xff] }
  0x73   : > { %1053 = vmatmul.bf16.gmra.mxu1 %v3755_v45  ;;  %v3858_v12 = vpack.c.bf16 %v369_v60, %v365_v58 }
  0x75   : > { %1131 = vmatpush.bf16.msra.mxu2 %v2823_v7 }
  0x78   : > { %1103 = vmatmul.bf16.vlgmr.msrb.gmra.mxu2 %v3630_v35 }
  0x79   : > { %1215 = vmatpush.bf16.msrb.mxu2 %v3517_v47  ;;  %v2816_v47 = vld [vmem:[%s4999_s1 + $0xf8] sm:$0xf0] }
  0x7a   : > { %v2819_v19 = vor.u32 %v3097_v18, %v2816_v47  ;;  %v3093_v18 = vld [vmem:[%s4999_s1 + $0xd4] sm:$0xf]  ;;  %v2800_v47 = vld [vmem:[%s4999_s1 + $0xd8] sm:$0xf0] }
  0x7c   : > { %2939 = vmatmul.msk.bf16.gmra.mxu3 %vm897_vm0, %v3699_v17  ;;  %1391 = vmatpush.bf16.msrb.mxu0 %v2819_v19  ;;  %v2803_v19 = vor.u32 %v3093_v18, %v2800_v47  ;;  %v438_v18 = vld [vmem:[%s3492_s24 + $0x318] sm:$0xff]  ;;  %v404_v17 = vld [vmem:[%s3492_s24 + $0x208] sm:$0xff] }
  0x7d   : > { %1216 = vmatpush.bf16.msrb.mxu2 %v3526_v50  ;;  %v3079_v50 = vld [vmem:[%s4999_s1 + $0x64] sm:$0xf]  ;;  %v442_v47 = vld [vmem:[%s3492_s24 + $0x338] sm:$0xff]  ;;  %v3990_v41 = vpack.c.bf16 %v408_v59, %v404_v17 }
  0x7e   : > { %v2747_v22 = vor.u32 %v3079_v50, %v2744_v20  ;;  %v3075_v20 = vld [vmem:[%s4999_s1 + $0x44] sm:$0xf] }
  0x80   : > { %1303 = vmatpush.bf16.msrb.mxu3 %v2747_v22  ;;  %v371_v22 = vld [vmem:[%s3492_s24 + $0x100] sm:$0xff] }
  0x81   : > { %1217 = vmatpush.bf16.msrb.mxu2 %v3552_v62  ;;  %v3719_v62 = vpack.c.bf16 %v351_v24, %v347_v21  ;;  %v2728_v21 = vld [vmem:[%s4999_s1 + $0x48] sm:$0xf0]  ;;  %v3814_v26 = vpack.c.bf16 %v375_v25, %v371_v22  ;;  %v387_v25 = vld [vmem:[%s3492_s24 + $0x180] sm:$0xff] }
  0x82   : > { %v2731_v24 = vor.u32 %v3075_v20, %v2728_v21  ;;  %v3073_v20 = vld [vmem:[%s4999_s1 + $0x34] sm:$0xf]  ;;  %v2720_v21 = vld [vmem:[%s4999_s1 + $0x38] sm:$0xf0] }
  0x83   : > { %959 = vmatmul.bf16.gmra.mxu0 %v3719_v62  ;;  %1058 = vmatmul.bf16.gmra.mxu1 %v3784_v5  ;;  %v2723_v22 = vor.u32 %v3073_v20, %v2720_v21  ;;  %v2784_v20 = vld [vmem:[%s4999_s1 + $0xb8] sm:$0xf0] }
  0x84   : > { %1304 = vmatpush.bf16.msrb.mxu3 %v2739_v51  ;;  %v2792_v51 = vld [vmem:[%s4999_s1 + $0xc8] sm:$0xf0] }
  0x85   : > { %1218 = vmatpush.bf16.msrb.mxu2 %v3561_v1  ;;  %v406_v1 = vld [vmem:[%s3492_s24 + $0x218] sm:$0xff]  ;;  %v2795_v55 = vor.u32 %v3091_v48, %v2792_v51  ;;  %v3894_v48 = vld [vmem:[%s5000_s2] sm:$0x3] }
  0x86   : > { %v3736_v33 = vpack.c.bf16 %v410_v32, %v406_v1  ;;  %v372_v1 = vld [vmem:[%s3492_s24 + $0x108] sm:$0xff]  ;;  %v3902_v58 = vperm.slane %v3894_v48, 0 }
  0x87   : > { %v376_v32 = vld [vmem:[%s3492_s24 + $0x128] sm:$0xff] }
  0x88   : > { %1108 = vmatmul.bf16.gmra.mxu2 %v3659_v53  ;;  %5047 = vst [vmem:[#allocation19_spill] sm:$0xff] %v3736_v33  ;;  %1305 = vmatpush.bf16.msrb.mxu3 %v2731_v24  ;;  %v412_v53 = vld [vmem:[%s3492_s24 + $0x248] sm:$0xff] }
  0x89   : > { %1219 = vmatpush.bf16.msrb.mxu2 %v3571_v6  ;;  %v355_v6 = vld [vmem:[%s3492_s24 + $0x80] sm:$0xff] }
  0x8a   : > { %v3745_v37 = vpack.c.bf16 %v359_v34, %v355_v6  ;;  %v3821_v6 = vpack.c.bf16 %v376_v32, %v372_v1  ;;  %v373_v32 = vld [vmem:[%s3492_s24 + $0x110] sm:$0xff] }
  0x8c   : > { %2940 = vmatmul.msk.bf16.gmra.mxu3 %vm897_vm0, %v3736_v33 }
  0x8d   : > { %1220 = vmatpush.bf16.msrb.mxu2 %v3583_v11  ;;  %v2808_v11 = vld [vmem:[%s4999_s1 + $0xe8] sm:$0xf0]  ;;  %1306 = vmatpush.bf16.msrb.mxu3 %v2723_v22 }
  0x8e   : > { %v2811_v38 = vor.u32 %v3095_v36, %v2808_v11  ;;  %v3825_v36 = vpack.c.bf16 %v361_v29, %v357_v27  ;;  %v430_v11 = vld [vmem:[%s3492_s24 + $0x2d8] sm:$0xff]  ;;  %v391_v27 = vld [vmem:[%s3492_s24 + $0x1a0] sm:$0xff] }
  0x8f   : > { %v3880_v29 = vpack.c.bf16 %v391_v27, %v387_v25 }
  0x90   : > { %1392 = vmatpush.bf16.msrb.mxu0 %v2811_v38  ;;  %v434_v38 = vld [vmem:[%s3492_s24 + $0x2f8] sm:$0xff] }
  0x91   : > { %v3831_v40 = vpack.c.bf16 %v434_v38, %v430_v11  ;;  %v377_v11 = vld [vmem:[%s3492_s24 + $0x130] sm:$0xff]  ;;  %v388_v38 = vld [vmem:[%s3492_s24 + $0x188] sm:$0xff] }
  0x92   : > { %v3889_v44 = vpack.c.bf16 %v392_v43, %v388_v38 }
  0x93   : > { %964 = vmatmul.bf16.gmra.mxu0 %v3745_v37  ;;  %1063 = vmatmul.bf16.gmra.mxu1 %v3821_v6  ;;  %5050 = vst [vmem:[#allocation22_spill] sm:$0xff] %v3831_v40 }
  0x94   : > { %1393 = vmatpush.bf16.msrb.mxu0 %v2803_v19  ;;  %v3866_v19 = vpack.c.bf16 %v442_v47, %v438_v18  ;;  %v3909_v18 = vpack.c.bf16 %v450_v0, %v446_v63  ;;  %v3089_v47 = vld [vmem:[%s4999_s1 + $0xb4] sm:$0xf] }
  0x95   : > { %v2787_v21 = vor.u32 %v3089_v47, %v2784_v20  ;;  %v381_v63 = vld [vmem:[%s3492_s24 + $0x150] sm:$0xff]  ;;  %v400_v47 = vld [vmem:[%s3492_s24 + $0x1e8] sm:$0xff] }
  0x96   : > { %5051 = vst [vmem:[#allocation23_spill] sm:$0xff] %v3866_v19  ;;  %v385_v0 = vld [vmem:[%s3492_s24 + $0x170] sm:$0xff] }
  0x97   : > { %5052 = vst [vmem:[#allocation24_spill] sm:$0xff] %v3909_v18 }
  0x98   : > { %1113 = vmatmul.bf16.gmra.mxu2 %v3693_v13  ;;  %1394 = vmatpush.bf16.msrb.mxu0 %v2795_v55  ;;  %v3898_v55 = vpack.c.bf16 %v377_v11, %v373_v32  ;;  %v395_v32 = vld [vmem:[%s3492_s24 + $0x1c0] sm:$0xff] }
  0x99   : > { %v399_v11 = vld [vmem:[%s3492_s24 + $0x1e0] sm:$0xff] }
  0x9a   : > { %v3925_v38 = vpack.c.bf16 %v399_v11, %v395_v32  ;;  %v3940_v32 = vpack.c.bf16 %v385_v0, %v381_v63  ;;  %v3071_v11 = vld [vmem:[%s4999_s1 + $0x24] sm:$0xf] }
  0x9c   : > { %2941 = vmatmul.msk.bf16.gmra.mxu3 %vm897_vm0, %v3769_v56  ;;  %1395 = vmatpush.bf16.msrb.mxu0 %v2787_v21 }
  0xa3   : > { %969 = vmatmul.bf16.gmra.mxu0 %v3777_v61  ;;  %1068 = vmatmul.bf16.gmra.mxu1 %v3854_v2 }
  0xa8   : > { %1118 = vmatmul.bf16.gmra.mxu2 %v3729_v31 }
  0xac   : > { %2942 = vmatmul.msk.bf16.gmra.mxu3 %vm897_vm0, %v3794_v15 }
  0xb3   : > { %974 = vmatmul.bf16.gmra.mxu0 %v3814_v26  ;;  %1073 = vmatmul.bf16.gmra.mxu1 %v3889_v44 }
  0xb7   : > { %v1044_v15 = vpop.f32.mrf.mxu1 }
  0xb8   : > { %1132 = vmatmul.bf16.vlgmr.msra.gmra.mxu2 %v3757_v46 }
  0xbb   : > { %v3771_v57 = vpop.f32.mrf.mxu2 }
  0xbc   : > { %2943 = vmatmul.msk.bf16.gmra.mxu3 %vm897_vm0, %v3831_v40  ;;  %v1016_v22 = vadd.f32 %v3771_v57, %v3902_v58  ;;  %v396_v57 = vld [vmem:[%s3492_s24 + $0x1c8] sm:$0xff] }
  0xbd   : > { %v3936_v21 = vpack.c.bf16 %v400_v47, %v396_v57  ;;  %v454_v57 = vld [vmem:[%s3492_s24 + $0x398] sm:$0xff] }
  0xbe   : > { %v458_v47 = vld [vmem:[%s3492_s24 + $0x3b8] sm:$0xff] }
  0xbf   : > { %v3847_v52 = vpop.f32.mrf.mxu3  ;;  %v3954_v63 = vpack.c.bf16 %v458_v47, %v454_v57  ;;  %v403_v57 = vld [vmem:[%s3492_s24 + $0x200] sm:$0xff]  ;;  %v1046_v59 = vpop.f32.mrf.mxu1 }
  0xc1   : > { %5055 = vst [vmem:[#allocation27_spill] sm:$0xff] %v3954_v63 }
  0xc3   : > { %v3786_v7 = vpop.f32.mrf.mxu2  ;;  %979 = vmatmul.bf16.gmra.mxu0 %v3842_v49  ;;  %1078 = vmatmul.bf16.gmra.mxu1 %v3936_v21 }
  0xc4   : > { %v1018_v20 = vadd.f32 %v3786_v7, %v3902_v58 }
  0xc7   : > { %v3861_v14 = vpop.f32.mrf.mxu3 }
  0xc8   : > { %1137 = vmatmul.bf16.gmra.mxu2 %v3788_v9 }
  0xcb   : > { %v3802_v50 = vpop.f32.mrf.mxu2 }
  0xcc   : > { %2944 = vmatmul.msk.bf16.gmra.mxu3 %vm897_vm0, %v3866_v19  ;;  %v1021_v0 = vadd.f32 %v3802_v50, %v3902_v58 }
  0xcf   : > { %v3882_v1 = vpop.f32.mrf.mxu3 }
  0xd3   : > { %v3823_v34 = vpop.f32.mrf.mxu2  ;;  %984 = vmatmul.bf16.gmra.mxu0 %v3880_v29  ;;  %1083 = vmatmul.bf16.gmra.mxu1 %v3990_v41 }
  0xd4   : > { %v1023_v31 = vadd.f32 %v3823_v34, %v3902_v58 }
  0xd7   : > { %v3904_v60 = vpop.f32.mrf.mxu3 }
  0xd8   : > { %1142 = vmatmul.bf16.gmra.mxu2 %v3825_v36 }
  0xdb   : > { %v3833_v42 = vpop.f32.mrf.mxu2 }
  0xdc   : > { %2945 = vmatmul.msk.bf16.gmra.mxu3 %vm897_vm0, %v3909_v18  ;;  %v2712_v18 = vld [vmem:[%s4999_s1 + $0x28] sm:$0xf0]  ;;  %v1026_v34 = vadd.f32 %v3833_v42, %v3902_v58 }
  0xdd   : > { %v2715_v19 = vor.u32 %v3071_v11, %v2712_v18  ;;  %v2880_v18 = vld [vmem:[%s4999_s1 + $0x178] sm:$0xf0]  ;;  %v955_v11 = vpop.f32.mrf.mxu0 }
  0xde   : > { %v956_v47 = vadd.f32 %v955_v11, %v3902_v58  ;;  %v393_v11 = vld [vmem:[%s3492_s24 + $0x1b0] sm:$0xff] }
  0xdf   : > { %v3927_v43 = vpop.f32.mrf.mxu3  ;;  %1307 = vmatpush.bf16.msrb.mxu3 %v2715_v19  ;;  %v3113_v19 = vld [vmem:[%s4999_s1 + $0x174] sm:$0xf] }
  0xe0   : > { %v2883_v50 = vor.u32 %v3113_v19, %v2880_v18  ;;  %v3981_v19 = vadd.f32 %v1044_v15, %v956_v47  ;;  %v389_v18 = vld [vmem:[%s3492_s24 + $0x190] sm:$0xff]  ;;  %v1049_v28 = vpop.f32.mrf.mxu1 }
  0xe2   : > { %1480 = vmatpush.bf16.msrb.mxu1 %v2883_v50  ;;  %v3994_v50 = vpack.c.bf16 %v393_v11, %v389_v18 }
  0xe3   : > { %v3856_v4 = vpop.f32.mrf.mxu2  ;;  %989 = vmatmul.bf16.gmra.mxu0 %v3925_v38 }
  0xe4   : > { %v1028_v23 = vadd.f32 %v3856_v4, %v3902_v58 }
  0xe5   : > { %v957_v15 = vpop.f32.mrf.mxu0 }
  0xe6   : > { %v958_v47 = vadd.f32 %v957_v15, %v3902_v58  ;;  %v2704_v15 = vld [vmem:[%s4999_s1 + $0x18] sm:$0xf0] }
  0xe7   : > { %v3949_v7 = vpop.f32.mrf.mxu3 }
  0xe8   : > { %1147 = vmatmul.bf16.gmra.mxu2 %v3858_v12 }
  0xeb   : > { %v3874_v24 = vpop.f32.mrf.mxu2 }
  0xec   : > { %2946 = vmatmul.msk.bf16.gmra.mxu3 %vm897_vm0, %v3954_v63  ;;  %v407_v63 = vld [vmem:[%s3492_s24 + $0x220] sm:$0xff] }
  0xed   : > { %v3979_v56 = vpack.c.bf16 %v407_v63, %v403_v57 }
  0xef   : > { %v3977_v40 = vpop.f32.mrf.mxu3 }
  0xf3   : > { %v3896_v51 = vpop.f32.mrf.mxu2  ;;  %994 = vmatmul.bf16.gmra.mxu0 %v3979_v56 }
  0xf8   : > { %1152 = vmatmul.bf16.gmra.mxu2 %v3898_v55 }
  0xfb   : > { %v1104_v25 = vpop.f32.mrf.mxu2 }
  0xfc   : > { %v3921_v27 = vadd.f32 %v1104_v25, %v1016_v22 }
  0xfe   : > { %5053 = vst [vmem:[#allocation25_spill] sm:$0xff] %v3921_v27  ;;  %v428_v27 = vld [vmem:[%s3492_s24 + $0x2c8] sm:$0xff] }
  0xff   : > { %v4136_v39 = vpack.c.bf16 %v432_v54, %v428_v27 }
 0x100   : > { %v960_v42 = vpop.f32.mrf.mxu0 }
 0x101   : > { %5065 = vst [vmem:[#allocation37_spill] sm:$0xff] %v4136_v39 }
 0x103   : > { %v1106_v22 = vpop.f32.mrf.mxu2 }
 0x104   : > { %v3938_v25 = vadd.f32 %v1106_v22, %v1018_v20 }
 0x106   : > { %5054 = vst [vmem:[#allocation26_spill] sm:$0xff] %v3938_v25 }
 0x108   : > { %1157 = vmatmul.bf16.gmra.mxu2 %v3940_v32  ;;  %v962_v4 = vpop.f32.mrf.mxu0 }
 0x10b   : > { %v1109_v20 = vpop.f32.mrf.mxu2 }
 0x10c   : > { %v3960_v22 = vadd.f32 %v1109_v20, %v1021_v0  ;;  %v3087_v0 = vld [vmem:[%s4999_s1 + $0xa4] sm:$0xf]  ;;  %v2776_v20 = vld [vmem:[%s4999_s1 + $0xa8] sm:$0xf0] }
 0x10d   : > { %v2779_v33 = vor.u32 %v3087_v0, %v2776_v20  ;;  %v3998_v0 = vpop.f32.mrf.mxu3  ;;  %v466_v20 = vld [vmem:[%s3492_s24 + $0x3f8] sm:$0xff] }
 0x10e   : > { %5056 = vst [vmem:[#allocation28_spill] sm:$0xff] %v3960_v22 }
 0x10f   : > { %1396 = vmatpush.bf16.msrb.mxu0 %v2779_v33  ;;  %v462_v33 = vld [vmem:[%s3492_s24 + $0x3d8] sm:$0xff] }
 0x110   : > { %v4003_v17 = vpack.c.bf16 %v466_v20, %v462_v33  ;;  %v415_v20 = vld [vmem:[%s3492_s24 + $0x260] sm:$0xff] }
 0x112   : > { %5058 = vst [vmem:[#allocation30_spill] sm:$0xff] %v4003_v17  ;;  %2947 = vmatmul.msk.bf16.gmra.mxu3 %vm897_vm0, %v4003_v17  ;;  %v961_v17 = vadd.f32 %v960_v42, %v3902_v58  ;;  %v2872_v42 = vld [vmem:[%s4999_s1 + $0x168] sm:$0xf0] }
 0x113   : > { %v1111_v63 = vpop.f32.mrf.mxu2 }
 0x114   : > { %v3992_v57 = vadd.f32 %v1111_v63, %v1023_v31  ;;  %v4005_v31 = vadd.f32 %v1046_v59, %v958_v47  ;;  %v3069_v63 = vld [vmem:[%s4999_s1 + $0x14] sm:$0xf]  ;;  %v411_v47 = vld [vmem:[%s3492_s24 + $0x240] sm:$0xff] }
 0x115   : > { %v2707_v33 = vor.u32 %v3069_v63, %v2704_v15  ;;  %v4021_v59 = vpop.f32.mrf.mxu3  ;;  %v4024_v13 = vpack.c.bf16 %v415_v20, %v411_v47  ;;  %v4033_v63 = vadd.f32 %v1049_v28, %v961_v17  ;;  %v3067_v28 = vld [vmem:[%s4999_s1 + $0x4] sm:$0xf]  ;;  %v963_v17 = vadd.f32 %v962_v4, %v3902_v58  ;;  %v3085_v20 = vld [vmem:[%s4999_s1 + $0x94] sm:$0xf] }
 0x116   : > { %5057 = vst [vmem:[#allocation29_spill] sm:$0xff] %v3992_v57 }
 0x117   : > { %1308 = vmatpush.bf16.msrb.mxu3 %v2707_v33  ;;  %999 = vmatmul.bf16.gmra.mxu0 %v4024_v13  ;;  %v3111_v33 = vld [vmem:[%s4999_s1 + $0x164] sm:$0xf] }
 0x118   : > { %1162 = vmatmul.bf16.gmra.mxu2 %v3994_v50 }
 0x11b   : > { %v1114_v18 = vpop.f32.mrf.mxu2 }
 0x11c   : > { %v4011_v11 = vadd.f32 %v1114_v18, %v1026_v34  ;;  %v397_v34 = vld [vmem:[%s3492_s24 + $0x1d0] sm:$0xff] }
 0x11d   : > { %v401_v18 = vld [vmem:[%s3492_s24 + $0x1f0] sm:$0xff] }
 0x11e   : > { %5059 = vst [vmem:[#allocation31_spill] sm:$0xff] %v4011_v11  ;;  %v416_v11 = vld [vmem:[%s3492_s24 + $0x268] sm:$0xff]  ;;  %v4039_v47 = vpack.c.bf16 %v401_v18, %v397_v34  ;;  %v2768_v34 = vld [vmem:[%s4999_s1 + $0x98] sm:$0xf0]  ;;  %v1051_v18 = vpop.f32.mrf.mxu1 }
 0x11f   : > { %v4035_v15 = vpack.c.bf16 %v416_v11, %v412_v53  ;;  %v2875_v53 = vor.u32 %v3111_v33, %v2872_v42  ;;  %v2771_v33 = vor.u32 %v3085_v20, %v2768_v34  ;;  %v1031_v42 = vadd.f32 %v3874_v24, %v3902_v58  ;;  %v405_v24 = vld [vmem:[%s3492_s24 + $0x210] sm:$0xff] }
 0x121   : > { %1088 = vmatmul.bf16.gmra.mxu1 %v4035_v15  ;;  %1397 = vmatpush.bf16.msrb.mxu0 %v2771_v33 }
 0x122   : > { %1481 = vmatpush.bf16.msrb.mxu1 %v2875_v53 }
 0x123   : > { %v1116_v16 = vpop.f32.mrf.mxu2 }
 0x124   : > { %v4037_v57 = vadd.f32 %v1116_v16, %v1028_v23  ;;  %v2696_v16 = vld [vmem:[%s4999_s1 + $0x8] sm:$0xf0]  ;;  %v4054_v23 = vpop.f32.mrf.mxu3 }
 0x125   : > { %v2699_v11 = vor.u32 %v3067_v28, %v2696_v16  ;;  %v4066_v28 = vadd.f32 %v1051_v18, %v963_v17  ;;  %v419_v16 = vld [vmem:[%s3492_s24 + $0x280] sm:$0xff]  ;;  %v409_v17 = vld [vmem:[%s3492_s24 + $0x230] sm:$0xff]  ;;  %v420_v18 = vld [vmem:[%s3492_s24 + $0x288] sm:$0xff] }
 0x126   : > { %5060 = vst [vmem:[#allocation32_spill] sm:$0xff] %v4037_v57  ;;  %v965_v57 = vpop.f32.mrf.mxu0  ;;  %v1054_v34 = vpop.f32.mrf.mxu1 }
 0x127   : > { %1309 = vmatpush.bf16.msrb.mxu3 %v2699_v11  ;;  %v423_v11 = vld [vmem:[%s3492_s24 + $0x2a0] sm:$0xff]  ;;  %v966_v20 = vadd.f32 %v965_v57, %v3902_v58 }
 0x128   : > { %1167 = vmatmul.bf16.gmra.mxu2 %v4039_v47  ;;  %v4073_v35 = vpack.c.bf16 %v423_v11, %v419_v16  ;;  %v4091_v11 = vpack.c.bf16 %v409_v17, %v405_v24  ;;  %v2864_v24 = vld [vmem:[%s4999_s1 + $0x158] sm:$0xf0] }
 0x129   : > { %v4085_v33 = vadd.f32 %v1054_v34, %v966_v20 }
 0x12a   : > { %1310 = vmatmul.bf16.vlgmr.msrb.gmra.mxu3 %v3680_v3  ;;  %1004 = vmatmul.bf16.gmra.mxu0 %v4073_v35  ;;  %v1033_v3 = vadd.f32 %v3896_v51, %v3902_v58 }
 0x12b   : > { %v1119_v53 = vpop.f32.mrf.mxu2 }
 0x12c   : > { %v4069_v4 = vadd.f32 %v1119_v53, %v1031_v42  ;;  %v4075_v22 = vpop.f32.mrf.mxu3  ;;  %v4087_v42 = vpack.c.bf16 %v424_v10, %v420_v18  ;;  %v3109_v10 = vld [vmem:[%s4999_s1 + $0x154] sm:$0xf] }
 0x12d   : > { %v2867_v34 = vor.u32 %v3109_v10, %v2864_v24  ;;  %v2760_v10 = vld [vmem:[%s4999_s1 + $0x88] sm:$0xf0] }
 0x12e   : > { %5061 = vst [vmem:[#allocation33_spill] sm:$0xff] %v4069_v4  ;;  %v967_v57 = vpop.f32.mrf.mxu0  ;;  %v1056_v51 = vpop.f32.mrf.mxu1 }
 0x12f   : > { %5062 = vst [vmem:[#allocation34_spill] sm:$0xff] %v4087_v42  ;;  %v968_v25 = vadd.f32 %v967_v57, %v3902_v58  ;;  %1482 = vmatpush.bf16.msrb.mxu1 %v2867_v34 }
 0x131   : > { %1093 = vmatmul.bf16.gmra.mxu1 %v4087_v42  ;;  %v4098_v20 = vadd.f32 %v1056_v51, %v968_v25  ;;  %v3107_v25 = vld [vmem:[%s4999_s1 + $0x144] sm:$0xf] }
 0x132   : > { %v431_v51 = vld [vmem:[%s3492_s24 + $0x2e0] sm:$0xff] }
 0x133   : > { %v1121_v53 = vpop.f32.mrf.mxu2 }
 0x134   : > { %v4089_v16 = vadd.f32 %v1121_v53, %v1033_v3  ;;  %v4094_v4 = vpop.f32.mrf.mxu3  ;;  %v2856_v3 = vld [vmem:[%s4999_s1 + $0x148] sm:$0xf0]  ;;  %v427_v53 = vld [vmem:[%s3492_s24 + $0x2c0] sm:$0xff] }
 0x136   : > { %5063 = vst [vmem:[#allocation35_spill] sm:$0xff] %v4089_v16  ;;  %v970_v57 = vpop.f32.mrf.mxu0  ;;  %v413_v16 = vld [vmem:[%s3492_s24 + $0x250] sm:$0xff] }
 0x138   : > { %1172 = vmatmul.bf16.gmra.mxu2 %v4091_v11 }
 0x13a   : > { %1315 = vmatmul.bf16.gmra.mxu3 %v3719_v62  ;;  %v2859_v62 = vor.u32 %v3107_v25, %v2856_v3  ;;  %v417_v25 = vld [vmem:[%s3492_s24 + $0x270] sm:$0xff]  ;;  %v1059_v3 = vpop.f32.mrf.mxu1 }
 0x13b   : > { %v1133_v17 = vpop.f32.mrf.mxu2 }
 0x13c   : > { %v4108_v18 = vadd.f32 %v1133_v17, %v3981_v19  ;;  %v3083_v19 = vld [vmem:[%s4999_s1 + $0x84] sm:$0xf]  ;;  %v4124_v24 = vpop.f32.mrf.mxu3  ;;  %v971_v17 = vadd.f32 %v970_v57, %v3902_v58  ;;  %1483 = vmatpush.bf16.msrb.mxu1 %v2859_v62  ;;  %v3105_v57 = vld [vmem:[%s4999_s1 + $0x134] sm:$0xf]  ;;  %v4147_v62 = vpack.c.bf16 %v417_v25, %v413_v16 }
 0x13d   : > { %v2763_v34 = vor.u32 %v3083_v19, %v2760_v10 }
 0x13e   : > { %5064 = vst [vmem:[#allocation36_spill] sm:$0xff] %v4108_v18  ;;  %v4127_v18 = vpack.c.bf16 %v431_v51, %v427_v53  ;;  %v4134_v42 = vadd.f32 %v1059_v3, %v971_v17  ;;  %v2848_v53 = vld [vmem:[%s4999_s1 + $0x138] sm:$0xf0]  ;;  %v972_v54 = vpop.f32.mrf.mxu0  ;;  %v2840_v3 = vld [vmem:[%s4999_s1 + $0x128] sm:$0xf0] }
 0x13f   : > { %1398 = vmatpush.bf16.msrb.mxu0 %v2763_v34  ;;  %v2851_v19 = vor.u32 %v3105_v57, %v2848_v53  ;;  %v973_v17 = vadd.f32 %v972_v54, %v3902_v58  ;;  %v3103_v34 = vld [vmem:[%s4999_s1 + $0x124] sm:$0xf]  ;;  %v3101_v57 = vld [vmem:[%s4999_s1 + $0x114] sm:$0xf]  ;;  %v2832_v53 = vld [vmem:[%s4999_s1 + $0x118] sm:$0xf0] }
 0x140   : > { %1009 = vmatmul.bf16.gmra.mxu0 %v4127_v18 }
 0x141   : > { %1098 = vmatmul.bf16.gmra.mxu1 %v4136_v39 }
 0x142   : > { %1484 = vmatpush.bf16.msrb.mxu1 %v2851_v19  ;;  %v1061_v16 = vpop.f32.mrf.mxu1  ;;  %v2835_v19 = vor.u32 %v3101_v57, %v2832_v53  ;;  %v425_v57 = vld [vmem:[%s3492_s24 + $0x2b0] sm:$0xff] }
 0x143   : > { %v1135_v51 = vpop.f32.mrf.mxu2  ;;  %v4160_v25 = vadd.f32 %v1061_v16, %v973_v17 }
 0x144   : > { %v4145_v10 = vadd.f32 %v1135_v51, %v4005_v31  ;;  %v4150_v27 = vpop.f32.mrf.mxu3  ;;  %v2843_v31 = vor.u32 %v3103_v34, %v2840_v3  ;;  %v3099_v34 = vld [vmem:[%s4999_s1 + $0x104] sm:$0xf]  ;;  %v2824_v3 = vld [vmem:[%s4999_s1 + $0x108] sm:$0xf0] }
 0x145   : > { %v2827_v16 = vor.u32 %v3099_v34, %v2824_v3 }
 0x146   : > { %5066 = vst [vmem:[#allocation38_spill] sm:$0xff] %v4145_v10  ;;  %1485 = vmatpush.bf16.msrb.mxu1 %v2843_v31  ;;  %v975_v31 = vpop.f32.mrf.mxu0 }
 0x147   : > { %v976_v10 = vadd.f32 %v975_v31, %v3902_v58 }
 0x148   : > { %1177 = vmatmul.bf16.gmra.mxu2 %v4147_v62 }
 0x14a   : > { %1320 = vmatmul.bf16.gmra.mxu3 %v3745_v37  ;;  %1486 = vmatpush.bf16.msrb.mxu1 %v2835_v19  ;;  %v3134_v37 = vld [vmem:[%s5001_s3 + $0x38] sm:$0xff]  ;;  %v1064_v53 = vpop.f32.mrf.mxu1 }
 0x14b   : > { %v1138_v51 = vpop.f32.mrf.mxu2  ;;  %1886 = vmatpush.bf16.msra.mxu3 %v3134_v37 }
 0x14c   : > { %v4170_v54 = vadd.f32 %v1138_v51, %v4033_v63  ;;  %v4172_v17 = vpop.f32.mrf.mxu3  ;;  %v421_v63 = vld [vmem:[%s3492_s24 + $0x290] sm:$0xff]  ;;  %v4187_v51 = vadd.f32 %v1064_v53, %v976_v10  ;;  %v3142_v10 = vld [vmem:[%s5001_s3 + $0x78] sm:$0xff] }
 0x14d   : > { %v4192_v34 = vpack.c.bf16 %v425_v57, %v421_v63  ;;  %1975 = vmatpush.bf16.msra.mxu0 %v3142_v10 }
 0x14e   : > { %5067 = vst [vmem:[#allocation39_spill] sm:$0xff] %v4170_v54  ;;  %1487 = vmatpush.bf16.msrb.mxu1 %v2827_v16  ;;  %v977_v3 = vpop.f32.mrf.mxu0 }
 0x14f   : > { %v978_v31 = vadd.f32 %v977_v3, %v3902_v58  ;;  %v433_v3 = vld [vmem:[%s3492_s24 + $0x2f0] sm:$0xff] }
 0x150   : > { %1399 = vmatmul.bf16.vlgmr.msrb.gmra.mxu0 %v3686_v8 }
 0x151   : > { %1488 = vmatmul.bf16.vlgmr.msrb.gmra.mxu1 %v3757_v46 }
 0x152   : > { %v1066_v16 = vpop.f32.mrf.mxu1 }
 0x153   : > { %v1140_v19 = vpop.f32.mrf.mxu2 }
 0x154   : > { %v4190_v54 = vadd.f32 %v1140_v19, %v4066_v28  ;;  %v4195_v8 = vpop.f32.mrf.mxu3  ;;  %v4202_v28 = vadd.f32 %v1066_v16, %v978_v31  ;;  %v429_v19 = vld [vmem:[%s3492_s24 + $0x2d0] sm:$0xff] }
 0x156   : > { %5068 = vst [vmem:[#allocation40_spill] sm:$0xff] %v4190_v54  ;;  %v980_v57 = vpop.f32.mrf.mxu0 }
 0x157   : > { %v981_v53 = vadd.f32 %v980_v57, %v3902_v58 }
 0x158   : > { %1182 = vmatmul.bf16.gmra.mxu2 %v4192_v34 }
 0x15a   : > { %1325 = vmatmul.bf16.gmra.mxu3 %v3777_v61  ;;  %v1069_v54 = vpop.f32.mrf.mxu1  ;;  %v4219_v61 = vpack.c.bf16 %v433_v3, %v429_v19  ;;  %v3133_v3 = vld [vmem:[%s5001_s3 + $0x30] sm:$0xff] }
 0x15b   : > { %v1143_v37 = vpop.f32.mrf.mxu2  ;;  %v4214_v39 = vadd.f32 %v1069_v54, %v981_v53  ;;  %1887 = vmatpush.bf16.msra.mxu3 %v3133_v3 }
 0x15c   : > { %v4206_v46 = vadd.f32 %v1143_v37, %v4085_v33  ;;  %v4208_v63 = vpop.f32.mrf.mxu3  ;;  %5071 = vst [vmem:[#allocation43_spill] sm:$0xff] %v4219_v61 }
 0x15e   : > { %5069 = vst [vmem:[#allocation41_spill] sm:$0xff] %v4206_v46  ;;  %v982_v16 = vpop.f32.mrf.mxu0 }
 0x160   : > { %1404 = vmatmul.bf16.gmra.mxu0 %v3727_v30  ;;  %v983_v30 = vadd.f32 %v982_v16, %v3902_v58  ;;  %v441_v16 = vld [vmem:[%s3492_s24 + $0x330] sm:$0xff] }
 0x161   : > { %1493 = vmatmul.bf16.gmra.mxu1 %v3788_v9 }
 0x162   : > { %v1071_v37 = vpop.f32.mrf.mxu1 }
 0x163   : > { %v1145_v31 = vpop.f32.mrf.mxu2  ;;  %v4226_v54 = vadd.f32 %v1071_v37, %v983_v30 }
 0x164   : > { %v4217_v10 = vadd.f32 %v1145_v31, %v4098_v20  ;;  %v4222_v33 = vpop.f32.mrf.mxu3  ;;  %v437_v31 = vld [vmem:[%s3492_s24 + $0x310] sm:$0xff] }
 0x166   : > { %5070 = vst [vmem:[#allocation42_spill] sm:$0xff] %v4217_v10  ;;  %v985_v19 = vpop.f32.mrf.mxu0  ;;  %v4243_v10 = vpack.c.bf16 %v441_v16, %v437_v31 }
 0x167   : > { %v986_v9 = vadd.f32 %v985_v19, %v3902_v58 }
 0x168   : > { %1187 = vmatmul.bf16.gmra.mxu2 %v4219_v61 }
 0x16a   : > { %1330 = vmatmul.bf16.gmra.mxu3 %v3814_v26  ;;  %v1074_v30 = vpop.f32.mrf.mxu1 }
 0x16b   : > { %v1148_v57 = vpop.f32.mrf.mxu2  ;;  %v4239_v37 = vadd.f32 %v1074_v30, %v986_v9  ;;  %v445_v30 = vld [vmem:[%s3492_s24 + $0x350] sm:$0xff] }
 0x16c   : > { %v1149_v20 = vadd.f32 %v1148_v57, %v4134_v42  ;;  %v4230_v53 = vpop.f32.mrf.mxu3 }
 0x16d   : > { %5072 = vst [vmem:[#allocation44_spill] sm:$0xff] %v4230_v53 }
 0x16e   : > { %v1238_v42 = vadd.f32 %v3847_v52, %v1149_v20  ;;  %v987_v46 = vpop.f32.mrf.mxu0  ;;  %v3141_v52 = vld [vmem:[%s5001_s3 + $0x70] sm:$0xff] }
 0x16f   : > { %v988_v9 = vadd.f32 %v987_v46, %v3902_v58  ;;  %1976 = vmatpush.bf16.msra.mxu0 %v3141_v52 }
 0x170   : > { %1409 = vmatmul.bf16.gmra.mxu0 %v3755_v45  ;;  %v1670_v61 = vmax.f32 %v1238_v42, 0.0 }
 0x171   : > { %1498 = vmatmul.bf16.gmra.mxu1 %v3825_v36 }
 0x173   : > { %v1150_v26 = vpop.f32.mrf.mxu2 }
 0x174   : > { %v1151_v57 = vadd.f32 %v1150_v26, %v4160_v25  ;;  %v4247_v19 = vpop.f32.mrf.mxu3  ;;  %v1076_v25 = vpop.f32.mrf.mxu1  ;;  %v449_v26 = vld [vmem:[%s3492_s24 + $0x370] sm:$0xff] }
 0x175   : > { %v4254_v20 = vadd.f32 %v1076_v25, %v988_v9 }
 0x176   : > { %v1240_v45 = vadd.f32 %v3861_v14, %v1151_v57  ;;  %v990_v16 = vpop.f32.mrf.mxu0 }
 0x177   : > { %v991_v46 = vadd.f32 %v990_v16, %v3902_v58 }
 0x178   : > { %v1672_v53 = vmax.f32 %v1240_v45, 0.0  ;;  %1192 = vmatmul.bf16.gmra.mxu2 %v4243_v10 }
 0x17a   : > { %v4256_v36 = vpack.c.bf16 %v1672_v53, %v1670_v61  ;;  %1335 = vmatmul.bf16.gmra.mxu3 %v3842_v49  ;;  %v4270_v49 = vpack.c.bf16 %v449_v26, %v445_v30  ;;  %v3132_v26 = vld [vmem:[%s5001_s3 + $0x28] sm:$0xff] }
 0x17b   : > { %v1153_v14 = vpop.f32.mrf.mxu2  ;;  %1888 = vmatpush.bf16.msra.mxu3 %v3132_v26 }
 0x17c   : > { %v1154_v3 = vadd.f32 %v1153_v14, %v4187_v51  ;;  %v4260_v31 = vpop.f32.mrf.mxu3  ;;  %v1079_v42 = vpop.f32.mrf.mxu1 }
 0x17d   : > { %v4266_v57 = vadd.f32 %v1079_v42, %v991_v46  ;;  %v453_v42 = vld [vmem:[%s3492_s24 + $0x390] sm:$0xff] }
 0x17e   : > { %v1243_v61 = vadd.f32 %v3882_v1, %v1154_v3  ;;  %v992_v52 = vpop.f32.mrf.mxu0 }
 0x17f   : > { %v993_v14 = vadd.f32 %v992_v52, %v3902_v58 }
 0x180   : > { %1414 = vmatmul.bf16.gmra.mxu0 %v3784_v5  ;;  %v1674_v5 = vmax.f32 %v1243_v61, 0.0 }
 0x181   : > { %1503 = vmatmul.bf16.gmra.mxu1 %v3858_v12 }
 0x183   : > { %v1155_v45 = vpop.f32.mrf.mxu2 }
 0x184   : > { %v1156_v53 = vadd.f32 %v1155_v45, %v4202_v28  ;;  %v4274_v9 = vpop.f32.mrf.mxu3  ;;  %v1081_v1 = vpop.f32.mrf.mxu1  ;;  %v457_v45 = vld [vmem:[%s3492_s24 + $0x3b0] sm:$0xff] }
 0x185   : > { %v4278_v3 = vadd.f32 %v1081_v1, %v993_v14  ;;  %v4297_v52 = vpack.c.bf16 %v457_v45, %v453_v42 }
 0x186   : > { %v1245_v51 = vadd.f32 %v3904_v60, %v1156_v53  ;;  %v995_v46 = vpop.f32.mrf.mxu0 }
 0x187   : > { %v996_v30 = vadd.f32 %v995_v46, %v3902_v58 }
 0x188   : > { %v1676_v25 = vmax.f32 %v1245_v51, 0.0  ;;  %1197 = vmatmul.bf16.gmra.mxu2 %v4270_v49 }
 0x18a   : > { %v4280_v28 = vpack.c.bf16 %v1676_v25, %v1674_v5  ;;  %1340 = vmatmul.bf16.gmra.mxu3 %v3880_v29 }
 0x18b   : > { %v1158_v16 = vpop.f32.mrf.mxu2 }
 0x18c   : > { %v1159_v12 = vadd.f32 %v1158_v16, %v4214_v39  ;;  %v4284_v60 = vpop.f32.mrf.mxu3  ;;  %v1084_v61 = vpop.f32.mrf.mxu1 }
 0x18d   : > { %v4293_v53 = vadd.f32 %v1084_v61, %v996_v30 }
 0x18e   : > { %v1248_v29 = vadd.f32 %v3927_v43, %v1159_v12  ;;  %v997_v14 = vpop.f32.mrf.mxu0  ;;  %v3125_v43 = vld [vmem:[%s4999_s1 + $0x1d4] sm:$0xf] }
 0x18f   : > { %v998_v16 = vadd.f32 %v997_v14, %v3902_v58 }
 0x190   : > { %1419 = vmatmul.bf16.gmra.mxu0 %v3821_v6  ;;  %v1678_v25 = vmax.f32 %v1248_v29, 0.0 }
 0x191   : > { %1508 = vmatmul.bf16.gmra.mxu1 %v3898_v55  ;;  %v3140_v55 = vld [vmem:[%s5001_s3 + $0x68] sm:$0xff] }
 0x192   : > { %1977 = vmatpush.bf16.msra.mxu0 %v3140_v55 }
 0x193   : > { %v1160_v39 = vpop.f32.mrf.mxu2 }
 0x194   : > { %v1161_v51 = vadd.f32 %v1160_v39, %v4226_v54  ;;  %v4301_v5 = vpop.f32.mrf.mxu3  ;;  %v2928_v54 = vld [vmem:[%s4999_s1 + $0x1d8] sm:$0xf0]  ;;  %v1086_v12 = vpop.f32.mrf.mxu1  ;;  %v3123_v39 = vld [vmem:[%s4999_s1 + $0x1c4] sm:$0xf] }
 0x195   : > { %v4314_v46 = vadd.f32 %v1086_v12, %v998_v16 }
 0x196   : > { %v1250_v6 = vadd.f32 %v3949_v7, %v1161_v51  ;;  %v2931_v7 = vor.u32 %v3125_v43, %v2928_v54  ;;  %v1000_v61 = vpop.f32.mrf.mxu0  ;;  %v2920_v51 = vld [vmem:[%s4999_s1 + $0x1c8] sm:$0xf0] }
 0x197   : > { %v1001_v29 = vadd.f32 %v1000_v61, %v3902_v58 }
 0x198   : > { %v1680_v1 = vmax.f32 %v1250_v6, 0.0  ;;  %1202 = vmatmul.bf16.gmra.mxu2 %v4297_v52  ;;  %v461_v6 = vld [vmem:[%s3492_s24 + $0x3d0] sm:$0xff] }
 0x199   : > { %1571 = vmatpush.bf16.msra.mxu2 %v2931_v7 }
 0x19a   : > { %v4316_v30 = vpack.c.bf16 %v1680_v1, %v1678_v25  ;;  %1345 = vmatmul.bf16.gmra.mxu3 %v3925_v38  ;;  %v465_v25 = vld [vmem:[%s3492_s24 + $0x3f0] sm:$0xff]  ;;  %v2923_v38 = vor.u32 %v3123_v39, %v2920_v51 }
 0x19b   : > { %v1163_v26 = vpop.f32.mrf.mxu2  ;;  %v4336_v54 = vpack.c.bf16 %v465_v25, %v461_v6 }
 0x19c   : > { %v1164_v42 = vadd.f32 %v1163_v26, %v4239_v37  ;;  %v4320_v45 = vpop.f32.mrf.mxu3 }
 0x19d   : > { %1572 = vmatpush.bf16.msra.mxu2 %v2923_v38 }
 0x19e   : > { %v1089_v14 = vpop.f32.mrf.mxu1  ;;  %v1253_v16 = vadd.f32 %v3977_v40, %v1164_v42  ;;  %v3121_v40 = vld [vmem:[%s4999_s1 + $0x1b4] sm:$0xf] }
 0x19f   : > { %v4332_v37 = vadd.f32 %v1089_v14, %v1001_v29  ;;  %v3119_v14 = vld [vmem:[%s4999_s1 + $0x1a4] sm:$0xf] }
 0x1a0   : > { %1424 = vmatmul.bf16.gmra.mxu0 %v3854_v2  ;;  %v1002_v2 = vpop.f32.mrf.mxu0  ;;  %v1682_v12 = vmax.f32 %v1253_v16, 0.0  ;;  %v342_v16 = vld [vmem:[%s3492_s24 + $0x18] sm:$0xff] }
 0x1a1   : > { %1513 = vmatmul.bf16.gmra.mxu1 %v3940_v32  ;;  %v1003_v61 = vadd.f32 %v1002_v2, %v3902_v58  ;;  %v2912_v32 = vld [vmem:[%s4999_s1 + $0x1b8] sm:$0xf0] }
 0x1a3   : > { %v1165_v1 = vpop.f32.mrf.mxu2 }
 0x1a4   : > { %v1166_v43 = vadd.f32 %v1165_v1, %v4254_v20  ;;  %v4340_v7 = vpop.f32.mrf.mxu3  ;;  %v2904_v1 = vld [vmem:[%s4999_s1 + $0x1a8] sm:$0xf0] }
 0x1a6   : > { %v1255_v55 = vadd.f32 %v3998_v0, %v1166_v43  ;;  %v2915_v0 = vor.u32 %v3121_v40, %v2912_v32  ;;  %v1091_v20 = vpop.f32.mrf.mxu1  ;;  %v346_v43 = vld [vmem:[%s3492_s24 + $0x38] sm:$0xff] }
 0x1a7   : > { %v4350_v42 = vadd.f32 %v1091_v20, %v1003_v61  ;;  %v4375_v40 = vpack.c.bf16 %v346_v43, %v342_v16 }
 0x1a8   : > { %v1684_v26 = vmax.f32 %v1255_v55, 0.0  ;;  %1207 = vmatmul.bf16.gmra.mxu2 %v4336_v54  ;;  %v1005_v25 = vpop.f32.mrf.mxu0 }
 0x1a9   : > { %1573 = vmatpush.bf16.msra.mxu2 %v2915_v0  ;;  %v1006_v38 = vadd.f32 %v1005_v25, %v3902_v58 }
 0x1aa   : > { %v4352_v29 = vpack.c.bf16 %v1684_v26, %v1682_v12  ;;  %1350 = vmatmul.bf16.gmra.mxu3 %v3979_v56  ;;  %v2907_v56 = vor.u32 %v3119_v14, %v2904_v1 }
 0x1ab   : > { %v1168_v39 = vpop.f32.mrf.mxu2 }
 0x1ac   : > { %v1169_v51 = vadd.f32 %v1168_v39, %v4266_v57  ;;  %v3131_v57 = vld [vmem:[%s5001_s3 + $0x20] sm:$0xff] }
 0x1ad   : > { %v4356_v6 = vpop.f32.mrf.mxu3  ;;  %1574 = vmatpush.bf16.msra.mxu2 %v2907_v56  ;;  %1889 = vmatpush.bf16.msra.mxu3 %v3131_v57  ;;  %v3115_v57 = vld [vmem:[%s4999_s1 + $0x184] sm:$0xf] }
 0x1ae   : > { %v1094_v55 = vpop.f32.mrf.mxu1  ;;  %v1258_v12 = vadd.f32 %v4021_v59, %v1169_v51 }
 0x1af   : > { %v4371_v2 = vadd.f32 %v1094_v55, %v1006_v38 }
 0x1b0   : > { %1429 = vmatmul.bf16.gmra.mxu0 %v3889_v44  ;;  %v1686_v0 = vmax.f32 %v1258_v12, 0.0  ;;  %v1007_v20 = vpop.f32.mrf.mxu0  ;;  %v2888_v12 = vld [vmem:[%s4999_s1 + $0x188] sm:$0xf0] }
 0x1b1   : > { %1518 = vmatmul.bf16.gmra.mxu1 %v3994_v50  ;;  %v1008_v59 = vadd.f32 %v1007_v20, %v3902_v58  ;;  %v2896_v50 = vld [vmem:[%s4999_s1 + $0x198] sm:$0xf0] }
 0x1b3   : > { %v1170_v26 = vpop.f32.mrf.mxu2 }
 0x1b4   : > { %v1171_v61 = vadd.f32 %v1170_v26, %v4278_v3  ;;  %v3117_v3 = vld [vmem:[%s4999_s1 + $0x194] sm:$0xf]  ;;  %v350_v26 = vld [vmem:[%s3492_s24 + $0x58] sm:$0xff] }
 0x1b5   : > { %v4379_v32 = vpop.f32.mrf.mxu3  ;;  %v2899_v51 = vor.u32 %v3117_v3, %v2896_v50 }
 0x1b6   : > { %v1260_v44 = vadd.f32 %v4054_v23, %v1171_v61  ;;  %v3139_v23 = vld [vmem:[%s5001_s3 + $0x60] sm:$0xff]  ;;  %v1096_v25 = vpop.f32.mrf.mxu1  ;;  %v354_v61 = vld [vmem:[%s3492_s24 + $0x78] sm:$0xff] }
 0x1b7   : > { %v4393_v38 = vadd.f32 %v1096_v25, %v1008_v59  ;;  %1978 = vmatpush.bf16.msra.mxu0 %v3139_v23  ;;  %1575 = vmatpush.bf16.msra.mxu2 %v2899_v51  ;;  %v4415_v59 = vpack.c.bf16 %v354_v61, %v350_v26  ;;  %v4422_v25 = vperm.slane %v3894_v48, 1  ;;  %v3130_v48 = vld [vmem:[%s5001_s3 + $0x18] sm:$0xff] }
 0x1b8   : > { %v1688_v39 = vmax.f32 %v1260_v44, 0.0  ;;  %2932 = vmatmul.msk.bf16.vlgmr.msrb.gmra.mxu2 %vm897_vm0, %v4375_v40  ;;  %v362_v26 = vld [vmem:[%s3492_s24 + $0xb8] sm:$0xff]  ;;  %1890 = vmatpush.bf16.msra.mxu3 %v3130_v48 }
 0x1ba   : > { %v4395_v14 = vpack.c.bf16 %v1688_v39, %v1686_v0  ;;  %1355 = vmatmul.bf16.gmra.mxu3 %v4024_v13  ;;  %v2891_v13 = vor.u32 %v3115_v57, %v2888_v12 }
 0x1bb   : > { %v1173_v1 = vpop.f32.mrf.mxu2 }
 0x1bc   : > { %v1174_v16 = vadd.f32 %v1173_v1, %v4293_v53  ;;  %1576 = vmatpush.bf16.msra.mxu2 %v2891_v13 }
 0x1bd   : > { %v4399_v43 = vpop.f32.mrf.mxu3  ;;  %v1010_v56 = vpop.f32.mrf.mxu0 }
 0x1be   : > { %v1011_v55 = vadd.f32 %v1010_v56, %v3902_v58  ;;  %v1099_v44 = vpop.f32.mrf.mxu1  ;;  %v1263_v20 = vadd.f32 %v4075_v22, %v1174_v16  ;;  %v1312_v56 = vadd.f32 %v4356_v6, %v4422_v25 }
 0x1c0   : > { %1434 = vmatmul.bf16.gmra.mxu0 %v3936_v21  ;;  %v4411_v53 = vadd.f32 %v1099_v44, %v1011_v55  ;;  %v1690_v23 = vmax.f32 %v1263_v20, 0.0  ;;  %v1314_v44 = vadd.f32 %v4379_v32, %v4422_v25 }
 0x1c1   : > { %1523 = vmatmul.bf16.gmra.mxu1 %v4039_v47 }
 0x1c3   : > { %v1175_v0 = vpop.f32.mrf.mxu2 }
 0x1c4   : > { %v1176_v39 = vadd.f32 %v1175_v0, %v4314_v46 }
 0x1c5   : > { %v1318_v50 = vpop.f32.mrf.mxu3  ;;  %v1012_v21 = vpop.f32.mrf.mxu0 }
 0x1c6   : > { %v1265_v3 = vadd.f32 %v4094_v4, %v1176_v39  ;;  %v1013_v22 = vadd.f32 %v1012_v21, %v3902_v58  ;;  %v1101_v46 = vpop.f32.mrf.mxu1  ;;  %v358_v58 = vld [vmem:[%s3492_s24 + $0x98] sm:$0xff] }
 0x1c7   : > { %v4445_v0 = vpack.c.bf16 %v362_v26, %v358_v58 }
 0x1c8   : > { %v1692_v51 = vmax.f32 %v1265_v3, 0.0  ;;  %2933 = vmatmul.msk.bf16.gmra.mxu2 %vm897_vm0, %v4415_v59  ;;  %v4425_v1 = vadd.f32 %v1101_v46, %v1013_v22  ;;  %v1317_v22 = vadd.f32 %v4399_v43, %v4422_v25 }
 0x1ca   : > { %v4427_v47 = vpack.c.bf16 %v1692_v51, %v1690_v23  ;;  %1360 = vmatmul.bf16.gmra.mxu3 %v4073_v35 }
 0x1cb   : > { %v1178_v4 = vpop.f32.mrf.mxu2 }
 0x1cc   : > { %v1179_v16 = vadd.f32 %v1178_v4, %v4332_v37 }
 0x1cd   : > { %v1321_v55 = vpop.f32.mrf.mxu3  ;;  %v1400_v57 = vpop.f32.mrf.mxu0 }
 0x1ce   : > { %v1401_v12 = vadd.f32 %v1400_v57, %v1312_v56  ;;  %v1489_v61 = vpop.f32.mrf.mxu1  ;;  %v1268_v37 = vadd.f32 %v4124_v24, %v1179_v16  ;;  %v3138_v24 = vld [vmem:[%s5001_s3 + $0x58] sm:$0xff] }
 0x1cf   : > { %1979 = vmatpush.bf16.msra.mxu0 %v3138_v24 }
 0x1d0   : > { %1439 = vmatmul.bf16.gmra.mxu0 %v3990_v41  ;;  %v4439_v13 = vadd.f32 %v1489_v61, %v1401_v12  ;;  %v1694_v3 = vmax.f32 %v1268_v37, 0.0 }
 0x1d1   : > { %1528 = vmatmul.bf16.gmra.mxu1 %v4091_v11 }
 0x1d3   : > { %v1180_v35 = vpop.f32.mrf.mxu2 }
 0x1d4   : > { %v1181_v6 = vadd.f32 %v1180_v35, %v4350_v42 }
 0x1d5   : > { %v1323_v20 = vpop.f32.mrf.mxu3  ;;  %v1402_v39 = vpop.f32.mrf.mxu0 }
 0x1d6   : > { %v1270_v41 = vadd.f32 %v4150_v27, %v1181_v6  ;;  %v1403_v23 = vadd.f32 %v1402_v39, %v1314_v44  ;;  %v1491_v42 = vpop.f32.mrf.mxu1  ;;  %v1322_v44 = vadd.f32 %v1321_v55, %v4422_v25  ;;  %v1324_v55 = vadd.f32 %v1323_v20, %v4422_v25  ;;  %v5075_v20 = vld [vmem:[#allocation7_spill] sm:$0xff] }
 0x1d8   : > { %v1696_v21 = vmax.f32 %v1270_v41, 0.0  ;;  %2934 = vmatmul.msk.bf16.gmra.mxu2 %vm897_vm0, %v4445_v0  ;;  %v4454_v32 = vadd.f32 %v1491_v42, %v1403_v23 }
 0x1da   : > { %v4456_v51 = vpack.c.bf16 %v1696_v21, %v1694_v3  ;;  %1365 = vmatmul.bf16.gmra.mxu3 %v4127_v18  ;;  %v1319_v18 = vadd.f32 %v1318_v50, %v4422_v25  ;;  %v5074_v3 = vld [vmem:[#allocation34_spill] sm:$0xff]  ;;  %v3129_v21 = vld [vmem:[%s5001_s3 + $0x10] sm:$0xff] }
 0x1db   : > { %v1183_v11 = vpop.f32.mrf.mxu2  ;;  %1891 = vmatpush.bf16.msra.mxu3 %v3129_v21 }
 0x1dc   : > { %v1184_v27 = vadd.f32 %v1183_v11, %v4371_v2 }
 0x1dd   : > { %v1326_v46 = vpop.f32.mrf.mxu3  ;;  %v1405_v4 = vpop.f32.mrf.mxu0 }
 0x1de   : > { %v1406_v16 = vadd.f32 %v1405_v4, %v1317_v22  ;;  %v1494_v56 = vpop.f32.mrf.mxu1  ;;  %v1273_v48 = vadd.f32 %v4172_v17, %v1184_v27 }
 0x1e0   : > { %1444 = vmatmul.bf16.gmra.mxu0 %v4035_v15  ;;  %v4463_v57 = vadd.f32 %v1494_v56, %v1406_v16  ;;  %v1698_v61 = vmax.f32 %v1273_v48, 0.0  ;;  %v3150_v15 = vld [vmem:[%s5003_s5 + $0x38] sm:$0xff] }
 0x1e1   : > { %1533 = vmatmul.bf16.gmra.mxu1 %v4147_v62 }
 0x1e2   : > { %2180 = vmatpush.bf16.msra.mxu1 %v3150_v15 }
 0x1e3   : > { %v1185_v12 = vpop.f32.mrf.mxu2 }
 0x1e4   : > { %v1186_v58 = vadd.f32 %v1185_v12, %v4393_v38 }
 0x1e5   : > { %v1328_v43 = vpop.f32.mrf.mxu3  ;;  %v1407_v26 = vpop.f32.mrf.mxu0 }
 0x1e6   : > { %v1275_v2 = vadd.f32 %v4195_v8, %v1186_v58  ;;  %v1408_v17 = vadd.f32 %v1407_v26, %v1319_v18  ;;  %v1496_v37 = vpop.f32.mrf.mxu1  ;;  %v5073_v8 = vld [vmem:[#allocation6_spill] sm:$0xff]  ;;  %v5076_v58 = vld [vmem:[#allocation25_spill] sm:$0xff] }
 0x1e8   : > { %v1700_v35 = vmax.f32 %v1275_v2, 0.0  ;;  %2948 = vmatmul.msk.bf16.vlgmr.msra.gmra.mxu2 %vm897_vm0, %v4375_v40  ;;  %v4475_v38 = vadd.f32 %v1496_v37, %v1408_v17  ;;  %v1327_v2 = vadd.f32 %v1326_v46, %v4422_v25 }
 0x1ea   : > { %v4477_v50 = vpack.c.bf16 %v1700_v35, %v1698_v61  ;;  %1370 = vmatmul.bf16.gmra.mxu3 %v5073_v8  ;;  %v5077_v35 = vld [vmem:[#allocation37_spill] sm:$0xff] }
 0x1eb   : > { %v1188_v62 = vpop.f32.mrf.mxu2 }
 0x1ec   : > { %v1189_v6 = vadd.f32 %v1188_v62, %v4411_v53  ;;  %v5078_v62 = vld [vmem:[#allocation44_spill] sm:$0xff] }
 0x1ed   : > { %v1331_v41 = vpop.f32.mrf.mxu3  ;;  %v1410_v40 = vpop.f32.mrf.mxu0 }
 0x1ee   : > { %v1411_v39 = vadd.f32 %v1410_v40, %v1322_v44  ;;  %v1499_v23 = vpop.f32.mrf.mxu1  ;;  %v1278_v11 = vadd.f32 %v4208_v63, %v1189_v6  ;;  %v3137_v63 = vld [vmem:[%s5001_s3 + $0x50] sm:$0xff]  ;;  %v5079_v6 = vld [vmem:[#allocation26_spill] sm:$0xff]  ;;  %v1329_v40 = vadd.f32 %v1328_v43, %v4422_v25 }
 0x1ef   : > { %1980 = vmatpush.bf16.msra.mxu0 %v3137_v63 }
 0x1f0   : > { %1449 = vmatmul.bf16.gmra.mxu0 %v5074_v3  ;;  %v4486_v24 = vadd.f32 %v1499_v23, %v1411_v39  ;;  %v1702_v16 = vmax.f32 %v1278_v11, 0.0  ;;  %v5080_v39 = vld [vmem:[#allocation43_spill] sm:$0xff] }
 0x1f1   : > { %1538 = vmatmul.bf16.gmra.mxu1 %v4192_v34  ;;  %v3149_v11 = vld [vmem:[%s5003_s5 + $0x30] sm:$0xff] }
 0x1f2   : > { %2181 = vmatpush.bf16.msra.mxu1 %v3149_v11 }
 0x1f3   : > { %v1190_v42 = vpop.f32.mrf.mxu2 }
 0x1f4   : > { %v1191_v53 = vadd.f32 %v1190_v42, %v4425_v1 }
 0x1f5   : > { %v4493_v22 = vpop.f32.mrf.mxu3  ;;  %v1412_v4 = vpop.f32.mrf.mxu0 }
 0x1f6   : > { %v1280_v27 = vadd.f32 %v4222_v33, %v1191_v53  ;;  %v1413_v12 = vadd.f32 %v1412_v4, %v1324_v55  ;;  %v1501_v1 = vpop.f32.mrf.mxu1  ;;  %v5081_v4 = vld [vmem:[#allocation8_spill] sm:$0xff] }
 0x1f8   : > { %v1704_v56 = vmax.f32 %v1280_v27, 0.0  ;;  %2949 = vmatmul.msk.bf16.gmra.mxu2 %vm897_vm0, %v4415_v59  ;;  %v4500_v48 = vadd.f32 %v1501_v1, %v1413_v12  ;;  %v1332_v12 = vadd.f32 %v1331_v41, %v4422_v25 }
 0x1fa   : > { %v4502_v34 = vpack.c.bf16 %v1704_v56, %v1702_v16  ;;  %1375 = vmatmul.bf16.gmra.mxu3 %v5075_v20  ;;  %v5082_v16 = vld [vmem:[#allocation28_spill] sm:$0xff]  ;;  %v3128_v20 = vld [vmem:[%s5001_s3 + $0x8] sm:$0xff] }
 0x1fb   : > { %v1193_v33 = vpop.f32.mrf.mxu2  ;;  %1892 = vmatpush.bf16.msra.mxu3 %v3128_v20  ;;  %v5091_v20 = vld [vmem:[#allocation33_spill] sm:$0xff] }
 0x1fc   : > { %v1194_v18 = vadd.f32 %v1193_v33, %v5076_v58  ;;  %v5083_v33 = vld [vmem:[#allocation12_spill] sm:$0xff] }
 0x1fd   : > { %v1336_v26 = vpop.f32.mrf.mxu3  ;;  %v1415_v59 = vpop.f32.mrf.mxu0 }
 0x1fe   : > { %v1416_v61 = vadd.f32 %v1415_v59, %v1327_v2  ;;  %v1504_v15 = vpop.f32.mrf.mxu1  ;;  %v1283_v8 = vadd.f32 %v5078_v62, %v1194_v18  ;;  %v5084_v2 = vld [vmem:[#allocation29_spill] sm:$0xff] }
 0x1ff   : > { %v5085_v62 = vld [vmem:[#allocation9_spill] sm:$0xff] }
 0x200   : > { %1454 = vmatmul.bf16.gmra.mxu0 %v5077_v35  ;;  %v4508_v17 = vadd.f32 %v1504_v15, %v1416_v61  ;;  %v1706_v23 = vmax.f32 %v1283_v8, 0.0  ;;  %v3136_v8 = vld [vmem:[%s5001_s3 + $0x48] sm:$0xff] }
 0x201   : > { %1543 = vmatmul.bf16.gmra.mxu1 %v5080_v39  ;;  %1981 = vmatpush.bf16.msra.mxu0 %v3136_v8 }
 0x203   : > { %v1195_v37 = vpop.f32.mrf.mxu2 }
 0x204   : > { %v1196_v44 = vadd.f32 %v1195_v37, %v5079_v6 }
 0x205   : > { %v4515_v46 = vpop.f32.mrf.mxu3  ;;  %v1417_v21 = vpop.f32.mrf.mxu0 }
 0x206   : > { %v1285_v3 = vadd.f32 %v4247_v19, %v1196_v44  ;;  %v1418_v53 = vadd.f32 %v1417_v21, %v1329_v40  ;;  %v1506_v55 = vpop.f32.mrf.mxu1  ;;  %v1337_v40 = vadd.f32 %v1336_v26, %v4422_v25 }
 0x208   : > { %v1708_v42 = vmax.f32 %v1285_v3, 0.0  ;;  %2950 = vmatmul.msk.bf16.gmra.mxu2 %vm897_vm0, %v4445_v0  ;;  %v4522_v43 = vadd.f32 %v1506_v55, %v1418_v53  ;;  %v5089_v53 = vld [vmem:[#allocation32_spill] sm:$0xff] }
 0x20a   : > { %v4524_v27 = vpack.c.bf16 %v1708_v42, %v1706_v23  ;;  %1380 = vmatmul.bf16.gmra.mxu3 %v5081_v4  ;;  %v5088_v23 = vld [vmem:[#allocation14_spill] sm:$0xff] }
 0x20b   : > { %v1198_v19 = vpop.f32.mrf.mxu2 }
 0x20c   : > { %v1199_v56 = vadd.f32 %v1198_v19, %v5082_v16  ;;  %v3127_v19 = vld [vmem:[%s5001_s3] sm:$0xff] }
 0x20d   : > { %v1341_v63 = vpop.f32.mrf.mxu3  ;;  %v1420_v0 = vpop.f32.mrf.mxu0  ;;  %1893 = vmatpush.bf16.msra.mxu3 %v3127_v19 }
 0x20e   : > { %v4529_v1 = vadd.f32 %v1420_v0, %v1332_v12  ;;  %v1288_v18 = vadd.f32 %v4260_v31, %v1199_v56  ;;  %v5090_v0 = vld [vmem:[#allocation11_spill] sm:$0xff] }
 0x210   : > { %1459 = vmatmul.bf16.gmra.mxu0 %v5083_v33  ;;  %v1710_v15 = vmax.f32 %v1288_v18, 0.0 }
 0x211   : > { %1548 = vmatmul.bf16.gmra.mxu1 %v4243_v10  ;;  %v5086_v10 = vld [vmem:[#allocation10_spill] sm:$0xff] }
 0x213   : > { %v1200_v58 = vpop.f32.mrf.mxu2 }
 0x214   : > { %v1201_v59 = vadd.f32 %v1200_v58, %v5084_v2  ;;  %v1342_v58 = vadd.f32 %v1341_v63, %v4422_v25 }
 0x215   : > { %v4539_v61 = vpop.f32.mrf.mxu3  ;;  %v4541_v35 = vpop.f32.mrf.mxu0 }
 0x216   : > { %v1290_v41 = vadd.f32 %v4274_v9, %v1201_v59  ;;  %v5087_v9 = vld [vmem:[#allocation31_spill] sm:$0xff] }
 0x218   : > { %v1712_v37 = vmax.f32 %v1290_v41, 0.0  ;;  %2951 = vmatmul.msk.bf16.gmra.mxu2 %vm897_vm0, %v5085_v62  ;;  %v5092_v41 = vld [vmem:[#allocation16_spill] sm:$0xff]  ;;  %v5093_v62 = vld [vmem:[#allocation35_spill] sm:$0xff] }
 0x21a   : > { %v4548_v31 = vpack.c.bf16 %v1712_v37, %v1710_v15  ;;  %1385 = vmatmul.bf16.gmra.mxu3 %v5086_v10 }
 0x21b   : > { %v1203_v6 = vpop.f32.mrf.mxu2 }
 0x21c   : > { %v1204_v44 = vadd.f32 %v1203_v6, %v5087_v9 }
 0x21d   : > { %v1346_v39 = vpop.f32.mrf.mxu3  ;;  %v1425_v3 = vpop.f32.mrf.mxu0 }
 0x21e   : > { %v4553_v21 = vadd.f32 %v1425_v3, %v1337_v40  ;;  %v1293_v11 = vadd.f32 %v4284_v60, %v1204_v44  ;;  %v5094_v40 = vld [vmem:[#allocation13_spill] sm:$0xff] }
 0x21f   : > { %v3135_v3 = vld [vmem:[%s5001_s3 + $0x40] sm:$0xff] }
 0x220   : > { %1464 = vmatmul.bf16.gmra.mxu0 %v5088_v23  ;;  %v1714_v56 = vmax.f32 %v1293_v11, 0.0  ;;  %v5095_v11 = vld [vmem:[#allocation18_spill] sm:$0xff] }
 0x221   : > { %1553 = vmatmul.bf16.gmra.mxu1 %v4270_v49  ;;  %v3148_v49 = vld [vmem:[%s5003_s5 + $0x28] sm:$0xff]  ;;  %1982 = vmatpush.bf16.msra.mxu0 %v3135_v3 }
 0x222   : > { %2182 = vmatpush.bf16.msra.mxu1 %v3148_v49 }
 0x223   : > { %v1205_v42 = vpop.f32.mrf.mxu2 }
 0x224   : > { %v1206_v55 = vadd.f32 %v1205_v42, %v5089_v53 }
 0x225   : > { %v4563_v26 = vpop.f32.mrf.mxu3  ;;  %v4565_v16 = vpop.f32.mrf.mxu0 }
 0x226   : > { %v1295_v4 = vadd.f32 %v4301_v5, %v1206_v55  ;;  %v5096_v55 = vld [vmem:[#allocation36_spill] sm:$0xff] }
 0x228   : > { %v1716_v12 = vmax.f32 %v1295_v4, 0.0  ;;  %2952 = vmatmul.msk.bf16.gmra.mxu2 %vm897_vm0, %v5090_v0 }
 0x22a   : > { %v4572_v60 = vpack.c.bf16 %v1716_v12, %v1714_v56  ;;  %v5097_v56 = vld [vmem:[#allocation38_spill] sm:$0xff] }
 0x22b   : > { %v1208_v33 = vpop.f32.mrf.mxu2 }
 0x22c   : > { %v1209_v5 = vadd.f32 %v1208_v33, %v5091_v20 }
 0x22d   : > { %v1351_v18 = vpop.f32.mrf.mxu3  ;;  %v1430_v2 = vpop.f32.mrf.mxu0 }
 0x22e   : > { %v4576_v59 = vadd.f32 %v1430_v2, %v1342_v58  ;;  %v1298_v37 = vadd.f32 %v4320_v45, %v1209_v5  ;;  %v5098_v5 = vld [vmem:[#allocation15_spill] sm:$0xff] }
 0x230   : > { %1469 = vmatmul.bf16.gmra.mxu0 %v5092_v41  ;;  %v1718_v63 = vmax.f32 %v1298_v37, 0.0  ;;  %v1352_v41 = vadd.f32 %v1351_v18, %v4422_v25  ;;  %v5099_v37 = vld [vmem:[#allocation39_spill] sm:$0xff] }
 0x231   : > { %1558 = vmatmul.bf16.gmra.mxu1 %v4297_v52  ;;  %v1347_v52 = vadd.f32 %v1346_v39, %v4422_v25  ;;  %v3147_v39 = vld [vmem:[%s5003_s5 + $0x20] sm:$0xff] }
 0x232   : > { %2183 = vmatpush.bf16.msra.mxu1 %v3147_v39 }
 0x233   : > { %v1210_v15 = vpop.f32.mrf.mxu2 }
 0x234   : > { %v1211_v8 = vadd.f32 %v1210_v15, %v5093_v62 }
 0x235   : > { %v4583_v10 = vpop.f32.mrf.mxu3  ;;  %v4585_v9 = vpop.f32.mrf.mxu0 }
 0x236   : > { %v1300_v6 = vadd.f32 %v4340_v7, %v1211_v8 }
 0x238   : > { %v1720_v44 = vmax.f32 %v1300_v6, 0.0  ;;  %2953 = vmatmul.msk.bf16.gmra.mxu2 %vm897_vm0, %v5094_v40  ;;  %v5100_v6 = vld [vmem:[#allocation40_spill] sm:$0xff] }
 0x23a   : > { %v4592_v45 = vpack.c.bf16 %v1720_v44, %v1718_v63 }
 0x23b   : > { %v1222_v23 = vpop.f32.mrf.mxu2 }
 0x23c   : > { %v1223_v19 = vadd.f32 %v1222_v23, %v5096_v55 }
 0x23d   : > { %v1435_v7 = vpop.f32.mrf.mxu0  ;;  %v1356_v53 = vpop.f32.mrf.mxu3 }
 0x23e   : > { %v4595_v42 = vadd.f32 %v1435_v7, %v1347_v52  ;;  %v1658_v0 = vmax.f32 %v1223_v19, 0.0  ;;  %v5101_v52 = vld [vmem:[#allocation17_spill] sm:$0xff]  ;;  %v1357_v18 = vadd.f32 %v1356_v53, %v4422_v25 }
 0x240   : > { %1474 = vmatmul.bf16.gmra.mxu0 %v5095_v11 }
 0x241   : > { %1563 = vmatmul.bf16.gmra.mxu1 %v4336_v54 }
 0x243   : > { %v1224_v4 = vpop.f32.mrf.mxu2 }
 0x244   : > { %v1225_v12 = vadd.f32 %v1224_v4, %v5097_v56  ;;  %v5102_v56 = vld [vmem:[#allocation41_spill] sm:$0xff] }
 0x245   : > { %v4604_v33 = vpop.f32.mrf.mxu0  ;;  %v4608_v2 = vpop.f32.mrf.mxu3 }
 0x246   : > { %v1660_v49 = vmax.f32 %v1225_v12, 0.0 }
 0x248   : > { %v1722_v20 = vpack.c.bf16 %v1660_v49, %v1658_v0  ;;  %2954 = vmatmul.msk.bf16.gmra.mxu2 %vm897_vm0, %v5098_v5  ;;  %v5103_v49 = vld [vmem:[#allocation42_spill] sm:$0xff] }
 0x24a   : > { %1894 = vmatmul.bf16.vlgmr.msra.gmra.mxu3 %v1722_v20 }
 0x24b   : > { %v1227_v58 = vpop.f32.mrf.mxu2 }
 0x24c   : > { %v1228_v62 = vadd.f32 %v1227_v58, %v5099_v37  ;;  %v3146_v58 = vld [vmem:[%s5003_s5 + $0x18] sm:$0xff] }
 0x24d   : > { %v1440_v54 = vpop.f32.mrf.mxu0  ;;  %v1361_v44 = vpop.f32.mrf.mxu3  ;;  %2184 = vmatpush.bf16.msra.mxu1 %v3146_v58 }
 0x24e   : > { %v4611_v15 = vadd.f32 %v1440_v54, %v1352_v41  ;;  %v1662_v40 = vmax.f32 %v1228_v62, 0.0  ;;  %v5104_v54 = vld [vmem:[#allocation19_spill] sm:$0xff] }
 0x253   : > { %v1229_v8 = vpop.f32.mrf.mxu2 }
 0x254   : > { %v1230_v63 = vadd.f32 %v1229_v8, %v5100_v6  ;;  %v1362_v8 = vadd.f32 %v1361_v44, %v4422_v25 }
 0x255   : > { %v4615_v23 = vpop.f32.mrf.mxu0  ;;  %v4620_v55 = vpop.f32.mrf.mxu3 }
 0x256   : > { %v1664_v3 = vmax.f32 %v1230_v63, 0.0 }
 0x258   : > { %2955 = vmatmul.msk.bf16.gmra.mxu2 %vm897_vm0, %v5101_v52  ;;  %v1724_v7 = vpack.c.bf16 %v1664_v3, %v1662_v40 }
 0x25a   : > { %1899 = vmatmul.bf16.gmra.mxu3 %v1724_v7 }
 0x25b   : > { %v1232_v11 = vpop.f32.mrf.mxu2 }
 0x25c   : > { %v1233_v12 = vadd.f32 %v1232_v11, %v5102_v56  ;;  %v4642_v56 = vpop.f32.mrf.mxu1 }
 0x25d   : > { %v1445_v19 = vpop.f32.mrf.mxu0  ;;  %v1366_v37 = vpop.f32.mrf.mxu3 }
 0x25e   : > { %v4622_v4 = vadd.f32 %v1445_v19, %v1357_v18  ;;  %v1666_v20 = vmax.f32 %v1233_v12, 0.0 }
 0x263   : > { %v1234_v0 = vpop.f32.mrf.mxu2 }
 0x264   : > { %v1235_v39 = vadd.f32 %v1234_v0, %v5103_v49  ;;  %v5105_v0 = vld [vmem:[#allocation20_spill] sm:$0xff] }
 0x265   : > { %v4629_v41 = vpop.f32.mrf.mxu0  ;;  %v4637_v52 = vpop.f32.mrf.mxu3 }
 0x266   : > { %v1668_v5 = vmax.f32 %v1235_v39, 0.0 }
 0x268   : > { %2956 = vmatmul.msk.bf16.gmra.mxu2 %vm897_vm0, %v5104_v54  ;;  %v1726_v53 = vpack.c.bf16 %v1668_v5, %v1666_v20 }
 0x26a   : > { %1904 = vmatmul.bf16.gmra.mxu3 %v1726_v53 }
 0x26b   : > { %v1578_v62 = vpop.f32.mrf.mxu2 }
 0x26c   : > { %v1579_v40 = vadd.f32 %v1578_v62, %v4439_v13  ;;  %v1367_v13 = vadd.f32 %v1366_v37, %v4422_v25  ;;  %v5106_v37 = vld [vmem:[#allocation21_spill] sm:$0xff] }
 0x26d   : > { %v1450_v6 = vpop.f32.mrf.mxu0  ;;  %v1371_v49 = vpop.f32.mrf.mxu3 }
 0x26e   : > { %v4634_v63 = vadd.f32 %v1450_v6, %v1362_v8  ;;  %v1659_v11 = vmax.f32 %v1579_v40, 0.0 }
 0x273   : > { %v1580_v3 = vpop.f32.mrf.mxu2 }
 0x274   : > { %v1581_v7 = vadd.f32 %v1580_v3, %v4454_v32  ;;  %v1511_v32 = vpop.f32.mrf.mxu1  ;;  %v1372_v3 = vadd.f32 %v1371_v49, %v4422_v25 }
 0x275   : > { %v4640_v19 = vpop.f32.mrf.mxu0  ;;  %v4655_v8 = vpop.f32.mrf.mxu3 }
 0x276   : > { %v1661_v18 = vmax.f32 %v1581_v7, 0.0 }
 0x278   : > { %v1723_v12 = vpack.c.bf16 %v1661_v18, %v1659_v11  ;;  %2957 = vmatmul.msk.bf16.gmra.mxu2 %vm897_vm0, %v5105_v0 }
 0x27a   : > { %1909 = vmatmul.bf16.gmra.mxu3 %v4256_v36  ;;  %1983 = vmatmul.bf16.vlgmr.msra.gmra.mxu0 %v1723_v12  ;;  %v3145_v36 = vld [vmem:[%s5003_s5 + $0x10] sm:$0xff] }
 0x27b   : > { %v1583_v44 = vpop.f32.mrf.mxu2  ;;  %2185 = vmatpush.bf16.msra.mxu1 %v3145_v36 }
 0x27c   : > { %v1584_v5 = vadd.f32 %v1583_v44, %v4463_v57 }
 0x27d   : > { %v1455_v39 = vpop.f32.mrf.mxu0  ;;  %v1376_v18 = vpop.f32.mrf.mxu3 }
 0x27e   : > { %v4648_v20 = vadd.f32 %v1455_v39, %v1367_v13  ;;  %v1663_v53 = vmax.f32 %v1584_v5, 0.0 }
 0x283   : > { %v1585_v58 = vpop.f32.mrf.mxu2 }
 0x284   : > { %v1586_v54 = vadd.f32 %v1585_v58, %v4475_v38  ;;  %v4662_v38 = vpop.f32.mrf.mxu1 }
 0x285   : > { %v4657_v6 = vpop.f32.mrf.mxu0 }
 0x286   : > { %v1665_v62 = vmax.f32 %v1586_v54, 0.0 }
 0x288   : > { %2958 = vmatmul.msk.bf16.gmra.mxu2 %vm897_vm0, %v5106_v37  ;;  %v1725_v40 = vpack.c.bf16 %v1665_v62, %v1663_v53  ;;  %v4674_v53 = vpop.f32.mrf.mxu3 }
 0x28a   : > { %1914 = vmatmul.bf16.gmra.mxu3 %v4280_v28  ;;  %1988 = vmatmul.bf16.gmra.mxu0 %v1725_v40  ;;  %v5107_v28 = vld [vmem:[#allocation22_spill] sm:$0xff] }
 0x28b   : > { %v1588_v57 = vpop.f32.mrf.mxu2 }
 0x28c   : > { %v1589_v12 = vadd.f32 %v1588_v57, %v4486_v24  ;;  %v1516_v13 = vpop.f32.mrf.mxu1  ;;  %v1377_v24 = vadd.f32 %v1376_v18, %v4422_v25  ;;  %v3144_v18 = vld [vmem:[%s5003_s5 + $0x8] sm:$0xff] }
 0x28d   : > { %v1460_v7 = vpop.f32.mrf.mxu0  ;;  %2186 = vmatpush.bf16.msra.mxu1 %v3144_v18  ;;  %v1339_v18 = vadd.f32 %v4515_v46, %v4422_v25 }
 0x28e   : > { %v4665_v11 = vadd.f32 %v1460_v7, %v1372_v3  ;;  %v1667_v39 = vmax.f32 %v1589_v12, 0.0 }
 0x290   : > { %v1381_v3 = vpop.f32.mrf.mxu3 }
 0x293   : > { %v1590_v0 = vpop.f32.mrf.mxu2 }
 0x294   : > { %v1591_v44 = vadd.f32 %v1590_v0, %v4500_v48  ;;  %v4677_v36 = vpop.f32.mrf.mxu1  ;;  %v5108_v0 = vld [vmem:[#allocation23_spill] sm:$0xff] }
 0x295   : > { %v4669_v58 = vpop.f32.mrf.mxu0 }
 0x296   : > { %v1669_v5 = vmax.f32 %v1591_v44, 0.0 }
 0x298   : > { %2959 = vmatmul.msk.bf16.gmra.mxu2 %vm897_vm0, %v5107_v28  ;;  %v1727_v54 = vpack.c.bf16 %v1669_v5, %v1667_v39  ;;  %v1334_v39 = vadd.f32 %v4493_v22, %v4422_v25  ;;  %v1382_v5 = vadd.f32 %v1381_v3, %v4422_v25 }
 0x29a   : > { %1919 = vmatmul.bf16.gmra.mxu3 %v4316_v30  ;;  %1993 = vmatmul.bf16.gmra.mxu0 %v1727_v54  ;;  %v1423_v28 = vadd.f32 %v4541_v35, %v1334_v39  ;;  %v4695_v54 = vpop.f32.mrf.mxu3 }
 0x29b   : > { %v1593_v49 = vpop.f32.mrf.mxu2 }
 0x29c   : > { %v1594_v37 = vadd.f32 %v1593_v49, %v4508_v17  ;;  %v1521_v17 = vpop.f32.mrf.mxu1 }
 0x29d   : > { %v1465_v62 = vpop.f32.mrf.mxu0 }
 0x29e   : > { %v4679_v48 = vadd.f32 %v1465_v62, %v1377_v24  ;;  %v1671_v7 = vmax.f32 %v1594_v37, 0.0  ;;  %v1510_v24 = vadd.f32 %v4642_v56, %v4529_v1  ;;  %v1512_v37 = vadd.f32 %v1511_v32, %v1423_v28 }
 0x29f   : > { %v1428_v32 = vadd.f32 %v4565_v16, %v1339_v18  ;;  %v3143_v16 = vld [vmem:[%s5003_s5] sm:$0xff] }
 0x2a0   : > { %2187 = vmatpush.bf16.msra.mxu1 %v3143_v16 }
 0x2a2   : > { %v1386_v35 = vpop.f32.mrf.mxu3 }
 0x2a3   : > { %v1595_v40 = vpop.f32.mrf.mxu2  ;;  %v1387_v56 = vadd.f32 %v1386_v35, %v4422_v25 }
 0x2a4   : > { %v1596_v57 = vadd.f32 %v1595_v40, %v4522_v43 }
 0x2a5   : > { %v4683_v30 = vpop.f32.mrf.mxu0 }
 0x2a6   : > { %v1673_v12 = vmax.f32 %v1596_v57, 0.0  ;;  %v1524_v57 = vpop.f32.mrf.mxu1 }
 0x2a8   : > { %2960 = vmatmul.msk.bf16.gmra.mxu2 %vm897_vm0, %v5108_v0  ;;  %v1729_v44 = vpack.c.bf16 %v1673_v12, %v1671_v7 }
 0x2aa   : > { %1924 = vmatmul.bf16.gmra.mxu3 %v4352_v29  ;;  %1998 = vmatmul.bf16.gmra.mxu0 %v1729_v44  ;;  %v5109_v44 = vld [vmem:[#allocation24_spill] sm:$0xff] }
 0x2ab   : > { %v1598_v43 = vpop.f32.mrf.mxu2 }
 0x2ac   : > { %v1599_v22 = vadd.f32 %v1598_v43, %v1510_v24 }
 0x2ad   : > { %v1470_v49 = vpop.f32.mrf.mxu0 }
 0x2ae   : > { %v4699_v62 = vadd.f32 %v1470_v49, %v1382_v5  ;;  %v1675_v7 = vmax.f32 %v1599_v22, 0.0  ;;  %v1526_v39 = vpop.f32.mrf.mxu1  ;;  %v1515_v5 = vadd.f32 %v4662_v38, %v4553_v21  ;;  %v1517_v49 = vadd.f32 %v1516_v13, %v1428_v32  ;;  %v4714_v22 = vpop.f32.mrf.mxu3 }
 0x2af   : > { %v1344_v21 = vadd.f32 %v4539_v61, %v4422_v25 }
 0x2b3   : > { %v1600_v40 = vpop.f32.mrf.mxu2 }
 0x2b4   : > { %v1601_v29 = vadd.f32 %v1600_v40, %v1512_v37 }
 0x2b5   : > { %v4701_v0 = vpop.f32.mrf.mxu0 }
 0x2b6   : > { %v1677_v12 = vmax.f32 %v1601_v29, 0.0  ;;  %v1529_v29 = vpop.f32.mrf.mxu1 }
 0x2b8   : > { %v1731_v3 = vpack.c.bf16 %v1677_v12, %v1675_v7  ;;  %2961 = vmatmul.msk.bf16.gmra.mxu2 %vm897_vm0, %v5109_v44  ;;  %v5110_v12 = vld [vmem:[#allocation27_spill] sm:$0xff]  ;;  %v1520_v44 = vadd.f32 %v4677_v36, %v4576_v59 }
 0x2ba   : > { %1929 = vmatmul.bf16.gmra.mxu3 %v4395_v14  ;;  %2003 = vmatmul.bf16.gmra.mxu0 %v1731_v3  ;;  %v1433_v3 = vadd.f32 %v4585_v9, %v1344_v21 }
 0x2bb   : > { %v1603_v1 = vpop.f32.mrf.mxu2 }
 0x2bc   : > { %v1604_v24 = vadd.f32 %v1603_v1, %v1515_v5  ;;  %v1522_v35 = vadd.f32 %v1521_v17, %v1433_v3 }
 0x2bd   : > { %v1475_v43 = vpop.f32.mrf.mxu0 }
 0x2be   : > { %v4712_v28 = vadd.f32 %v1475_v43, %v1387_v56  ;;  %v1679_v14 = vmax.f32 %v1604_v24, 0.0  ;;  %v1531_v18 = vpop.f32.mrf.mxu1  ;;  %v5111_v24 = vld [vmem:[#allocation30_spill] sm:$0xff] }
 0x2c3   : > { %v1605_v37 = vpop.f32.mrf.mxu2 }
 0x2c4   : > { %v1606_v46 = vadd.f32 %v1605_v37, %v1517_v49  ;;  %v1525_v37 = vadd.f32 %v1524_v57, %v4595_v42  ;;  %v1530_v57 = vadd.f32 %v1529_v29, %v4611_v15 }
 0x2c6   : > { %v1681_v40 = vmax.f32 %v1606_v46, 0.0  ;;  %v1534_v59 = vpop.f32.mrf.mxu1 }
 0x2c8   : > { %v1733_v7 = vpack.c.bf16 %v1681_v40, %v1679_v14  ;;  %2962 = vmatmul.msk.bf16.gmra.mxu2 %vm897_vm0, %v5110_v12 }
 0x2ca   : > { %1934 = vmatmul.bf16.gmra.mxu3 %v4427_v47  ;;  %2008 = vmatmul.bf16.gmra.mxu0 %v1733_v7  ;;  %v1349_v47 = vadd.f32 %v4563_v26, %v4422_v25 }
 0x2cb   : > { %v1608_v38 = vpop.f32.mrf.mxu2 }
 0x2cc   : > { %v1609_v1 = vadd.f32 %v1608_v38, %v1520_v44  ;;  %v1438_v17 = vadd.f32 %v4604_v33, %v1349_v47  ;;  %v4740_v33 = vpop.f32.mrf.mxu0 }
 0x2cd   : > { %v1895_v13 = vpop.f32.mrf.mxu3 }
 0x2ce   : > { %v1683_v5 = vmax.f32 %v1609_v1, 0.0  ;;  %v1527_v46 = vadd.f32 %v1526_v39, %v1438_v17  ;;  %v1536_v16 = vpop.f32.mrf.mxu1 }
 0x2d3   : > { %v1610_v56 = vpop.f32.mrf.mxu2 }
 0x2d4   : > { %v1611_v32 = vadd.f32 %v1610_v56, %v1522_v35 }
 0x2d5   : > { %v1897_v43 = vpop.f32.mrf.mxu3 }
 0x2d6   : > { %v1685_v49 = vmax.f32 %v1611_v32, 0.0  ;;  %v1539_v39 = vpop.f32.mrf.mxu1 }
 0x2d8   : > { %v1735_v61 = vpack.c.bf16 %v1685_v49, %v1683_v5  ;;  %2963 = vmatmul.msk.bf16.gmra.mxu2 %vm897_vm0, %v5111_v24  ;;  %v1359_v24 = vadd.f32 %v4608_v2, %v4422_v25 }
 0x2da   : > { %1939 = vmatmul.bf16.gmra.mxu3 %v4456_v51  ;;  %2013 = vmatmul.bf16.gmra.mxu0 %v1735_v61  ;;  %v1354_v51 = vadd.f32 %v4583_v10, %v4422_v25  ;;  %v4748_v61 = vld [vmem:[%s5002_s4] ss:$0 sm:$0xff] }
 0x2db   : > { %v1613_v9 = vpop.f32.mrf.mxu2  ;;  %v1898_v17 = vadd.f32 %v4748_v61, %v1897_v43 }
 0x2dc   : > { %v1614_v14 = vadd.f32 %v1613_v9, %v1525_v37  ;;  %v1443_v42 = vadd.f32 %v4615_v23, %v1354_v51  ;;  %v1448_v9 = vadd.f32 %v4629_v41, %v1359_v24 }
 0x2dd   : > { %v1900_v36 = vpop.f32.mrf.mxu3 }
 0x2de   : > { %v1687_v21 = vmax.f32 %v1614_v14, 0.0  ;;  %v1532_v35 = vadd.f32 %v1531_v18, %v1443_v42  ;;  %v1541_v15 = vpop.f32.mrf.mxu1  ;;  %v1896_v18 = vadd.f32 %v4748_v61, %v1895_v13  ;;  %v1535_v14 = vadd.f32 %v1534_v59, %v4622_v4 }
 0x2df   : > { %v1901_v59 = vadd.f32 %v4748_v61, %v1900_v36 }
 0x2e3   : > { %v1615_v40 = vpop.f32.mrf.mxu2 }
 0x2e4   : > { %v1616_v7 = vadd.f32 %v1615_v40, %v1527_v46 }
 0x2e5   : > { %v1902_v12 = vpop.f32.mrf.mxu3 }
 0x2e6   : > { %v1689_v38 = vmax.f32 %v1616_v7, 0.0  ;;  %v1537_v7 = vadd.f32 %v1536_v16, %v1448_v9 }
 0x2e8   : > { %v1737_v3 = vpack.c.bf16 %v1689_v38, %v1687_v21 }
 0x2ea   : > { %1944 = vmatmul.bf16.gmra.mxu3 %v4477_v50  ;;  %2018 = vmatmul.bf16.gmra.mxu0 %v1737_v3  ;;  %v1544_v3 = vpop.f32.mrf.mxu1 }
 0x2eb   : > { %v1618_v26 = vpop.f32.mrf.mxu2 }
 0x2ec   : > { %v1619_v1 = vadd.f32 %v1618_v26, %v1530_v57 }
 0x2ed   : > { %v4737_v44 = vpop.f32.mrf.mxu3 }
 0x2ee   : > { %v1691_v10 = vmax.f32 %v1619_v1, 0.0 }
 0x2f3   : > { %v1620_v56 = vpop.f32.mrf.mxu2 }
 0x2f4   : > { %v1621_v32 = vadd.f32 %v1620_v56, %v1532_v35  ;;  %v1364_v35 = vadd.f32 %v4620_v55, %v4422_v25  ;;  %v1546_v56 = vpop.f32.mrf.mxu1 }
 0x2f5   : > { %v4743_v5 = vpop.f32.mrf.mxu3 }
 0x2f6   : > { %v1693_v49 = vmax.f32 %v1621_v32, 0.0  ;;  %v1453_v1 = vadd.f32 %v4640_v19, %v1364_v35  ;;  %v1903_v32 = vadd.f32 %v4748_v61, %v1902_v12 }
 0x2f7   : > { %v1984_v50 = vpop.f32.mrf.mxu0 }
 0x2f8   : > { %v1739_v23 = vpack.c.bf16 %v1693_v49, %v1691_v10  ;;  %v1985_v37 = vadd.f32 %v1984_v50, %v1896_v18  ;;  %v1540_v50 = vadd.f32 %v1539_v39, %v4634_v63  ;;  %v1542_v24 = vadd.f32 %v1541_v15, %v1453_v1 }
 0x2f9   : > { %v1906_v39 = vadd.f32 %v4748_v61, %v4737_v44  ;;  %v1374_v1 = vadd.f32 %v4655_v8, %v4422_v25 }
 0x2fa   : > { %1949 = vmatmul.bf16.gmra.mxu3 %v4502_v34  ;;  %2023 = vmatmul.bf16.gmra.mxu0 %v1739_v23  ;;  %v2064_v2 = vmax.f32 %v1985_v37, 0.0 }
 0x2fb   : > { %v1623_v29 = vpop.f32.mrf.mxu2 }
 0x2fc   : > { %v1624_v21 = vadd.f32 %v1623_v29, %v1535_v14  ;;  %v1549_v14 = vpop.f32.mrf.mxu1 }
 0x2fd   : > { %v4754_v47 = vpop.f32.mrf.mxu3 }
 0x2fe   : > { %v1695_v42 = vmax.f32 %v1624_v21, 0.0 }
 0x2ff   : > { %v1986_v46 = vpop.f32.mrf.mxu0 }
 0x300   : > { %v1987_v40 = vadd.f32 %v1986_v46, %v1898_v17 }
 0x302   : > { %v2065_v38 = vmax.f32 %v1987_v40, 0.0  ;;  %v1369_v40 = vadd.f32 %v4637_v52, %v4422_v25 }
 0x303   : > { %v1625_v34 = vpop.f32.mrf.mxu2 }
 0x304   : > { %v2096_v51 = vpack.c.bf16 %v2065_v38, %v2064_v2  ;;  %v1626_v26 = vadd.f32 %v1625_v34, %v1537_v7  ;;  %v1458_v7 = vadd.f32 %v4657_v6, %v1369_v40  ;;  %v1908_v2 = vadd.f32 %v4748_v61, %v4743_v5 }
 0x305   : > { %v4759_v13 = vpop.f32.mrf.mxu3  ;;  %v1545_v34 = vadd.f32 %v1544_v3, %v4648_v20 }
 0x306   : > { %v1697_v57 = vmax.f32 %v1626_v26, 0.0  ;;  %2188 = vmatmul.bf16.vlgmr.msra.gmra.mxu1 %v2096_v51  ;;  %v1547_v52 = vadd.f32 %v1546_v56, %v1458_v7  ;;  %v1551_v26 = vpop.f32.mrf.mxu1  ;;  %v1911_v56 = vadd.f32 %v4748_v61, %v4754_v47 }
 0x307   : > { %v1989_v41 = vpop.f32.mrf.mxu0 }
 0x308   : > { %v1741_v43 = vpack.c.bf16 %v1697_v57, %v1695_v42  ;;  %v1990_v10 = vadd.f32 %v1989_v41, %v1901_v59 }
 0x30a   : > { %1954 = vmatmul.bf16.gmra.mxu3 %v4524_v27  ;;  %2028 = vmatmul.bf16.gmra.mxu0 %v1741_v43  ;;  %v2066_v55 = vmax.f32 %v1990_v10, 0.0  ;;  %v1463_v10 = vadd.f32 %v4669_v58, %v1374_v1 }
 0x30b   : > { %v1628_v4 = vpop.f32.mrf.mxu2 }
 0x30c   : > { %v1629_v29 = vadd.f32 %v1628_v4, %v1540_v50 }
 0x30d   : > { %v4765_v16 = vpop.f32.mrf.mxu3 }
 0x30e   : > { %v1699_v37 = vmax.f32 %v1629_v29, 0.0  ;;  %v1554_v3 = vpop.f32.mrf.mxu1 }
 0x30f   : > { %v1991_v49 = vpop.f32.mrf.mxu0 }
 0x310   : > { %v1992_v23 = vadd.f32 %v1991_v49, %v1903_v32  ;;  %v1913_v49 = vadd.f32 %v4748_v61, %v4759_v13  ;;  %v1379_v13 = vadd.f32 %v4674_v53, %v4422_v25 }
 0x312   : > { %v2067_v27 = vmax.f32 %v1992_v23, 0.0  ;;  %v1468_v40 = vadd.f32 %v4683_v30, %v1379_v13 }
 0x313   : > { %v1630_v18 = vpop.f32.mrf.mxu2 }
 0x314   : > { %v1631_v9 = vadd.f32 %v1630_v18, %v1542_v24  ;;  %v2097_v17 = vpack.c.bf16 %v2067_v27, %v2066_v55  ;;  %v1550_v24 = vadd.f32 %v1549_v14, %v4665_v11  ;;  %v1552_v55 = vadd.f32 %v1551_v26, %v1463_v10 }
 0x315   : > { %v4770_v36 = vpop.f32.mrf.mxu3  ;;  %v1916_v14 = vadd.f32 %v4748_v61, %v4765_v16 }
 0x316   : > { %v1701_v46 = vmax.f32 %v1631_v9, 0.0  ;;  %2193 = vmatmul.bf16.gmra.mxu1 %v2097_v17  ;;  %v1556_v47 = vpop.f32.mrf.mxu1 }
 0x317   : > { %v1994_v19 = vpop.f32.mrf.mxu0  ;;  %v1557_v53 = vadd.f32 %v1556_v47, %v1468_v40 }
 0x318   : > { %v1743_v12 = vpack.c.bf16 %v1701_v46, %v1699_v37  ;;  %v1995_v21 = vadd.f32 %v1994_v19, %v1906_v39 }
 0x31a   : > { %1959 = vmatmul.bf16.gmra.mxu3 %v4548_v31  ;;  %2033 = vmatmul.bf16.gmra.mxu0 %v1743_v12  ;;  %v2068_v31 = vmax.f32 %v1995_v21, 0.0 }
 0x31b   : > { %v1633_v63 = vpop.f32.mrf.mxu2 }
 0x31c   : > { %v1634_v42 = vadd.f32 %v1633_v63, %v1545_v34  ;;  %v1918_v63 = vadd.f32 %v4748_v61, %v4770_v36 }
 0x31d   : > { %v4777_v15 = vpop.f32.mrf.mxu3 }
 0x31e   : > { %v1703_v4 = vmax.f32 %v1634_v42, 0.0  ;;  %v1559_v21 = vpop.f32.mrf.mxu1 }
 0x31f   : > { %v1996_v38 = vpop.f32.mrf.mxu0 }
 0x320   : > { %v1997_v51 = vadd.f32 %v1996_v38, %v1908_v2  ;;  %v1555_v2 = vadd.f32 %v1554_v3, %v4679_v48 }
 0x322   : > { %v2069_v57 = vmax.f32 %v1997_v51, 0.0 }
 0x323   : > { %v1635_v41 = vpop.f32.mrf.mxu2 }
 0x324   : > { %v1636_v43 = vadd.f32 %v1635_v41, %v1547_v52  ;;  %v2098_v44 = vpack.c.bf16 %v2069_v57, %v2068_v31  ;;  %v1384_v41 = vadd.f32 %v4695_v54, %v4422_v25 }
 0x325   : > { %v4783_v35 = vpop.f32.mrf.mxu3 }
 0x326   : > { %v1705_v6 = vmax.f32 %v1636_v43, 0.0  ;;  %2198 = vmatmul.bf16.gmra.mxu1 %v2098_v44  ;;  %v1561_v48 = vpop.f32.mrf.mxu1 }
 0x327   : > { %v1999_v59 = vpop.f32.mrf.mxu0 }
 0x328   : > { %v1745_v5 = vpack.c.bf16 %v1705_v6, %v1703_v4  ;;  %v2000_v50 = vadd.f32 %v1999_v59, %v1911_v56  ;;  %v1921_v4 = vadd.f32 %v4748_v61, %v4777_v15  ;;  %v1473_v6 = vadd.f32 %v4701_v0, %v1384_v41 }
 0x329   : > { %v1923_v59 = vadd.f32 %v4748_v61, %v4783_v35  ;;  %v1389_v35 = vadd.f32 %v4714_v22, %v4422_v25 }
 0x32a   : > { %1964 = vmatmul.bf16.gmra.mxu3 %v4572_v60  ;;  %2038 = vmatmul.bf16.gmra.mxu0 %v1745_v5  ;;  %v2070_v60 = vmax.f32 %v2000_v50, 0.0  ;;  %v1562_v56 = vadd.f32 %v1561_v48, %v1473_v6 }
 0x32b   : > { %v1638_v20 = vpop.f32.mrf.mxu2 }
 0x32c   : > { %v1639_v29 = vadd.f32 %v1638_v20, %v1550_v24  ;;  %v1560_v20 = vadd.f32 %v1559_v21, %v4699_v62 }
 0x32d   : > { %v4790_v32 = vpop.f32.mrf.mxu3 }
 0x32e   : > { %v1707_v37 = vmax.f32 %v1639_v29, 0.0 }
 0x32f   : > { %v2001_v23 = vpop.f32.mrf.mxu0 }
 0x330   : > { %v2002_v8 = vadd.f32 %v2001_v23, %v1913_v49  ;;  %v1564_v23 = vpop.f32.mrf.mxu1 }
 0x332   : > { %v2071_v27 = vmax.f32 %v2002_v8, 0.0 }
 0x333   : > { %v1640_v18 = vpop.f32.mrf.mxu2 }
 0x334   : > { %v1641_v9 = vadd.f32 %v1640_v18, %v1552_v55  ;;  %v2099_v17 = vpack.c.bf16 %v2071_v27, %v2070_v60  ;;  %v1926_v27 = vadd.f32 %v4748_v61, %v4790_v32  ;;  %v1478_v18 = vadd.f32 %v4740_v33, %v1389_v35 }
 0x335   : > { %v1927_v58 = vpop.f32.mrf.mxu3 }
 0x336   : > { %v1709_v46 = vmax.f32 %v1641_v9, 0.0  ;;  %2203 = vmatmul.bf16.gmra.mxu1 %v2099_v17  ;;  %v1928_v17 = vadd.f32 %v4748_v61, %v1927_v58 }
 0x337   : > { %v2004_v19 = vpop.f32.mrf.mxu0 }
 0x338   : > { %v1747_v12 = vpack.c.bf16 %v1709_v46, %v1707_v37  ;;  %v2005_v39 = vadd.f32 %v2004_v19, %v1916_v14  ;;  %v1566_v9 = vpop.f32.mrf.mxu1  ;;  %v1565_v19 = vadd.f32 %v1564_v23, %v4712_v28 }
 0x339   : > { %v1567_v13 = vadd.f32 %v1566_v9, %v1478_v18 }
 0x33a   : > { %1969 = vmatmul.bf16.gmra.mxu3 %v4592_v45  ;;  %2043 = vmatmul.bf16.gmra.mxu0 %v1747_v12  ;;  %v2072_v45 = vmax.f32 %v2005_v39, 0.0 }
 0x33b   : > { %v1643_v11 = vpop.f32.mrf.mxu2 }
 0x33c   : > { %v1644_v51 = vadd.f32 %v1643_v11, %v1555_v2 }
 0x33d   : > { %v4805_v34 = vpop.f32.mrf.mxu3 }
 0x33e   : > { %v1711_v42 = vmax.f32 %v1644_v51, 0.0  ;;  %v1931_v58 = vadd.f32 %v4748_v61, %v4805_v34 }
 0x33f   : > { %v2006_v7 = vpop.f32.mrf.mxu0 }
 0x340   : > { %v2007_v38 = vadd.f32 %v2006_v7, %v1918_v63 }
 0x342   : > { %v2073_v52 = vmax.f32 %v2007_v38, 0.0 }
 0x343   : > { %v1645_v26 = vpop.f32.mrf.mxu2 }
 0x344   : > { %v2100_v31 = vpack.c.bf16 %v2073_v52, %v2072_v45  ;;  %v1646_v16 = vadd.f32 %v1645_v26, %v1557_v53 }
 0x345   : > { %v1932_v43 = vpop.f32.mrf.mxu3 }
 0x346   : > { %v1713_v30 = vmax.f32 %v1646_v16, 0.0  ;;  %2208 = vmatmul.bf16.gmra.mxu1 %v2100_v31  ;;  %v1933_v28 = vadd.f32 %v4748_v61, %v1932_v43 }
 0x347   : > { %v2009_v57 = vpop.f32.mrf.mxu0 }
 0x348   : > { %v1749_v36 = vpack.c.bf16 %v1713_v30, %v1711_v42  ;;  %v2010_v5 = vadd.f32 %v2009_v57, %v1921_v4  ;;  %v4830_v4 = vld [vmem:[%s5004_s6] ss:$0 sm:$0xff] }
 0x34a   : > { %2048 = vmatmul.bf16.gmra.mxu0 %v1749_v36  ;;  %v2074_v10 = vmax.f32 %v2010_v5, 0.0 }
 0x34b   : > { %v1648_v44 = vpop.f32.mrf.mxu2 }
 0x34c   : > { %v1649_v54 = vadd.f32 %v1648_v44, %v1560_v20 }
 0x34d   : > { %v1935_v55 = vpop.f32.mrf.mxu3 }
 0x34e   : > { %v1715_v15 = vmax.f32 %v1649_v54, 0.0  ;;  %v1936_v16 = vadd.f32 %v4748_v61, %v1935_v55 }
 0x34f   : > { %v2011_v1 = vpop.f32.mrf.mxu0 }
 0x350   : > { %v2012_v3 = vadd.f32 %v2011_v1, %v1923_v59 }
 0x352   : > { %v2075_v49 = vmax.f32 %v2012_v3, 0.0 }
 0x353   : > { %v1650_v50 = vpop.f32.mrf.mxu2 }
 0x354   : > { %v2101_v24 = vpack.c.bf16 %v2075_v49, %v2074_v10  ;;  %v1651_v8 = vadd.f32 %v1650_v50, %v1562_v56 }
 0x355   : > { %v1937_v37 = vpop.f32.mrf.mxu3 }
 0x356   : > { %v1717_v60 = vmax.f32 %v1651_v8, 0.0  ;;  %2213 = vmatmul.bf16.gmra.mxu1 %v2101_v24  ;;  %v1938_v30 = vadd.f32 %v4748_v61, %v1937_v37 }
 0x357   : > { %v2014_v0 = vpop.f32.mrf.mxu0 }
 0x358   : > { %v1751_v29 = vpack.c.bf16 %v1717_v60, %v1715_v15  ;;  %v2015_v47 = vadd.f32 %v2014_v0, %v1926_v27 }
 0x35a   : > { %2053 = vmatmul.bf16.gmra.mxu0 %v1751_v29  ;;  %v2076_v11 = vmax.f32 %v2015_v47, 0.0 }
 0x35b   : > { %v1653_v62 = vpop.f32.mrf.mxu2 }
 0x35c   : > { %v1654_v14 = vadd.f32 %v1653_v62, %v1565_v19 }
 0x35d   : > { %v1940_v2 = vpop.f32.mrf.mxu3 }
 0x35e   : > { %v1719_v39 = vmax.f32 %v1654_v14, 0.0  ;;  %v1941_v20 = vadd.f32 %v4748_v61, %v1940_v2 }
 0x35f   : > { %v2016_v46 = vpop.f32.mrf.mxu0 }
 0x360   : > { %v2017_v12 = vadd.f32 %v2016_v46, %v1928_v17 }
 0x362   : > { %v2077_v25 = vmax.f32 %v2017_v12, 0.0 }
 0x363   : > { %v1655_v22 = vpop.f32.mrf.mxu2 }
 0x364   : > { %v2102_v40 = vpack.c.bf16 %v2077_v25, %v2076_v11  ;;  %v1656_v63 = vadd.f32 %v1655_v22, %v1567_v13 }
 0x365   : > { %v1942_v52 = vpop.f32.mrf.mxu3 }
 0x366   : > { %v1721_v32 = vmax.f32 %v1656_v63, 0.0  ;;  %2218 = vmatmul.bf16.gmra.mxu1 %v2102_v40  ;;  %v1943_v56 = vadd.f32 %v4748_v61, %v1942_v52 }
 0x367   : > { %v2019_v33 = vpop.f32.mrf.mxu0 }
 0x368   : > { %v1753_v7 = vpack.c.bf16 %v1721_v32, %v1719_v39  ;;  %v2020_v21 = vadd.f32 %v2019_v33, %v1931_v58 }
 0x36a   : > { %2058 = vmatmul.bf16.gmra.mxu0 %v1753_v7  ;;  %v2078_v45 = vmax.f32 %v2020_v21, 0.0 }
 0x36d   : > { %v1945_v42 = vpop.f32.mrf.mxu3 }
 0x36e   : > { %v1946_v18 = vadd.f32 %v4748_v61, %v1945_v42 }
 0x36f   : > { %v2021_v38 = vpop.f32.mrf.mxu0 }
 0x370   : > { %v2022_v53 = vadd.f32 %v2021_v38, %v1933_v28 }
 0x372   : > { %v2079_v51 = vmax.f32 %v2022_v53, 0.0 }
 0x374   : > { %v2103_v26 = vpack.c.bf16 %v2079_v51, %v2078_v45 }
 0x375   : > { %v1947_v6 = vpop.f32.mrf.mxu3 }
 0x376   : > { %2223 = vmatmul.bf16.gmra.mxu1 %v2103_v26  ;;  %v1948_v17 = vadd.f32 %v4748_v61, %v1947_v6 }
 0x377   : > { %v2024_v31 = vpop.f32.mrf.mxu0 }
 0x378   : > { %v2025_v57 = vadd.f32 %v2024_v31, %v1936_v16 }
 0x37a   : > { %v2080_v34 = vmax.f32 %v2025_v57, 0.0 }
 0x37d   : > { %v1950_v8 = vpop.f32.mrf.mxu3 }
 0x37e   : > { %v1951_v33 = vadd.f32 %v4748_v61, %v1950_v8 }
 0x37f   : > { %v2026_v36 = vpop.f32.mrf.mxu0 }
 0x380   : > { %v2027_v41 = vadd.f32 %v2026_v36, %v1938_v30 }
 0x382   : > { %v2081_v48 = vmax.f32 %v2027_v41, 0.0 }
 0x383   : > { %v2189_v43 = vpop.f32.mrf.mxu1 }
 0x384   : > { %v2104_v44 = vpack.c.bf16 %v2081_v48, %v2080_v34  ;;  %v2190_v5 = vadd.f32 %v4830_v4, %v2189_v43 }
 0x385   : > { %v1952_v62 = vpop.f32.mrf.mxu3 }
 0x386   : > { %2228 = vmatmul.bf16.gmra.mxu1 %v2104_v44  ;;  %v2269_v10 = vmax.f32 %v2190_v5, 0.0  ;;  %v1953_v2 = vadd.f32 %v4748_v61, %v1952_v62 }
 0x387   : > { %v2029_v59 = vpop.f32.mrf.mxu0 }
 0x388   : > { %v2030_v54 = vadd.f32 %v2029_v59, %v1941_v20 }
 0x38a   : > { %v2082_v55 = vmax.f32 %v2030_v54, 0.0 }
 0x38b   : > { %v2191_v1 = vpop.f32.mrf.mxu1 }
 0x38c   : > { %v2192_v3 = vadd.f32 %v4830_v4, %v2191_v1 }
 0x38d   : > { %v1955_v40 = vpop.f32.mrf.mxu3 }
 0x38e   : > { %v2270_v49 = vmax.f32 %v2192_v3, 0.0  ;;  %v1956_v41 = vadd.f32 %v4748_v61, %v1955_v40 }
 0x38f   : > { %v2031_v50 = vpop.f32.mrf.mxu0 }
 0x390   : > { %v2032_v23 = vadd.f32 %v2031_v50, %v1943_v56  ;;  %v4836_v24 = vpack.c.bf16 %v2270_v49, %v2269_v10 }
 0x392   : > { %v2083_v15 = vmax.f32 %v2032_v23, 0.0 }
 0x393   : > { %v2194_v60 = vpop.f32.mrf.mxu1 }
 0x394   : > { %v2105_v0 = vpack.c.bf16 %v2083_v15, %v2082_v55  ;;  %v2195_v35 = vadd.f32 %v4830_v4, %v2194_v60 }
 0x395   : > { %v1957_v38 = vpop.f32.mrf.mxu3 }
 0x396   : > { %2233 = vmatmul.bf16.gmra.mxu1 %v2105_v0  ;;  %v2271_v47 = vmax.f32 %v2195_v35, 0.0  ;;  %v1958_v48 = vadd.f32 %v4748_v61, %v1957_v38 }
 0x397   : > { %v2034_v29 = vpop.f32.mrf.mxu0 }
 0x398   : > { %v2035_v37 = vadd.f32 %v2034_v29, %v1946_v18 }
 0x39a   : > { %v2084_v11 = vmax.f32 %v2035_v37, 0.0 }
 0x39b   : > { %v2196_v27 = vpop.f32.mrf.mxu1 }
 0x39c   : > { %v2197_v9 = vadd.f32 %v4830_v4, %v2196_v27 }
 0x39d   : > { %v1960_v30 = vpop.f32.mrf.mxu3 }
 0x39e   : > { %v2272_v46 = vmax.f32 %v2197_v9, 0.0  ;;  %v1961_v8 = vadd.f32 %v4748_v61, %v1960_v30 }
 0x39f   : > { %v2036_v19 = vpop.f32.mrf.mxu0 }
 0x3a0   : > { %v2037_v12 = vadd.f32 %v2036_v19, %v1948_v17  ;;  %v4842_v13 = vpack.c.bf16 %v2272_v46, %v2271_v47 }
 0x3a2   : > { %v2085_v14 = vmax.f32 %v2037_v12, 0.0 }
 0x3a3   : > { %v2199_v25 = vpop.f32.mrf.mxu1 }
 0x3a4   : > { %v2106_v22 = vpack.c.bf16 %v2085_v14, %v2084_v11  ;;  %v2200_v39 = vadd.f32 %v4830_v4, %v2199_v25 }
 0x3a5   : > { %v1962_v56 = vpop.f32.mrf.mxu3 }
 0x3a6   : > { %2238 = vmatmul.bf16.gmra.mxu1 %v2106_v22  ;;  %v2273_v58 = vmax.f32 %v2200_v39, 0.0  ;;  %v1963_v60 = vadd.f32 %v4748_v61, %v1962_v56 }
 0x3a7   : > { %v2039_v63 = vpop.f32.mrf.mxu0 }
 0x3a8   : > { %v2040_v28 = vadd.f32 %v2039_v63, %v1951_v33 }
 0x3aa   : > { %v2086_v52 = vmax.f32 %v2040_v28, 0.0 }
 0x3ab   : > { %v2201_v32 = vpop.f32.mrf.mxu1 }
 0x3ac   : > { %v2202_v7 = vadd.f32 %v4830_v4, %v2201_v32 }
 0x3ad   : > { %v1965_v15 = vpop.f32.mrf.mxu3 }
 0x3ae   : > { %v2274_v21 = vmax.f32 %v2202_v7, 0.0  ;;  %v1966_v14 = vadd.f32 %v4748_v61, %v1965_v15 }
 0x3af   : > { %v2041_v53 = vpop.f32.mrf.mxu0 }
 0x3b0   : > { %v2042_v45 = vadd.f32 %v2041_v53, %v1953_v2  ;;  %v4848_v51 = vpack.c.bf16 %v2274_v21, %v2273_v58 }
 0x3b2   : > { %v2087_v26 = vmax.f32 %v2042_v45, 0.0 }
 0x3b3   : > { %v2204_v31 = vpop.f32.mrf.mxu1 }
 0x3b4   : > { %v2107_v16 = vpack.c.bf16 %v2087_v26, %v2086_v52  ;;  %v2205_v57 = vadd.f32 %v4830_v4, %v2204_v31 }
 0x3b5   : > { %v1967_v46 = vpop.f32.mrf.mxu3 }
 0x3b6   : > { %2243 = vmatmul.bf16.gmra.mxu1 %v2107_v16  ;;  %v2275_v43 = vmax.f32 %v2205_v57, 0.0  ;;  %v1968_v22 = vadd.f32 %v4748_v61, %v1967_v46 }
 0x3b7   : > { %v2044_v42 = vpop.f32.mrf.mxu0 }
 0x3b8   : > { %v2045_v44 = vadd.f32 %v2044_v42, %v1956_v41 }
 0x3ba   : > { %v2088_v20 = vmax.f32 %v2045_v44, 0.0 }
 0x3bb   : > { %v2206_v36 = vpop.f32.mrf.mxu1 }
 0x3bc   : > { %v2207_v34 = vadd.f32 %v4830_v4, %v2206_v36 }
 0x3bd   : > { %v1970_v2 = vpop.f32.mrf.mxu3 }
 0x3be   : > { %v2276_v6 = vmax.f32 %v2207_v34, 0.0  ;;  %v1971_v31 = vadd.f32 %v4748_v61, %v1970_v2 }
 0x3bf   : > { %v2046_v59 = vpop.f32.mrf.mxu0 }
 0x3c0   : > { %v2047_v5 = vadd.f32 %v2046_v59, %v1958_v48  ;;  %v4854_v1 = vpack.c.bf16 %v2276_v6, %v2275_v43 }
 0x3c2   : > { %v2089_v3 = vmax.f32 %v2047_v5, 0.0 }
 0x3c3   : > { %v2209_v10 = vpop.f32.mrf.mxu1 }
 0x3c4   : > { %v2108_v54 = vpack.c.bf16 %v2089_v3, %v2088_v20  ;;  %v2210_v50 = vadd.f32 %v4830_v4, %v2209_v10 }
 0x3c5   : > { %v1972_v52 = vpop.f32.mrf.mxu3 }
 0x3c6   : > { %2248 = vmatmul.bf16.gmra.mxu1 %v2108_v54  ;;  %v2277_v0 = vmax.f32 %v2210_v50, 0.0  ;;  %v1973_v42 = vadd.f32 %v4748_v61, %v1972_v52 }
 0x3c7   : > { %v2049_v49 = vpop.f32.mrf.mxu0 }
 0x3c8   : > { %v2050_v29 = vadd.f32 %v2049_v49, %v1961_v8 }
 0x3ca   : > { %v2090_v9 = vmax.f32 %v2050_v29, 0.0 }
 0x3cb   : > { %v2211_v23 = vpop.f32.mrf.mxu1 }
 0x3cc   : > { %v2212_v55 = vadd.f32 %v4830_v4, %v2211_v23 }
 0x3ce   : > { %v2278_v35 = vmax.f32 %v2212_v55, 0.0 }
 0x3cf   : > { %v2051_v62 = vpop.f32.mrf.mxu0 }
 0x3d0   : > { %v4860_v27 = vpack.c.bf16 %v2278_v35, %v2277_v0  ;;  %v2052_v18 = vadd.f32 %v2051_v62, %v1963_v60 }
 0x3d2   : > { %v2091_v17 = vmax.f32 %v2052_v18, 0.0 }
 0x3d3   : > { %v2214_v47 = vpop.f32.mrf.mxu1 }
 0x3d4   : > { %v2109_v37 = vpack.c.bf16 %v2091_v17, %v2090_v9  ;;  %v2215_v12 = vadd.f32 %v4830_v4, %v2214_v47  ;;  %v3314_v47 = vmov 0  }
 0x3d5   : > { %3213 = vset.pattern.permute.xlu1 %v3314_v47  ;;  %3214 = vset.pattern.permute.xlu2 %v3314_v47 }
 0x3d6   : > { %2253 = vmatmul.bf16.gmra.mxu1 %v2109_v37  ;;  %v2279_v40 = vmax.f32 %v2215_v12, 0.0  ;;  %v2349_v37 = vld [vmem:[%s5005_s7] sm:$0xff] }
 0x3d7   : > { %v2054_v19 = vpop.f32.mrf.mxu0  ;;  %2399 = vperm.xlu1 %3213, %v2349_v37  }
 0x3d8   : > { %v2055_v63 = vadd.f32 %v2054_v19, %v1966_v14 }
 0x3da   : > { %v2092_v58 = vmax.f32 %v2055_v63, 0.0 }
 0x3db   : > { %v2216_v11 = vpop.f32.mrf.mxu1 }
 0x3dc   : > { %v2217_v25 = vadd.f32 %v4830_v4, %v2216_v11 }
 0x3de   : > { %v2280_v39 = vmax.f32 %v2217_v25, 0.0 }
 0x3df   : > { %v2056_v32 = vpop.f32.mrf.mxu0 }
 0x3e0   : > { %v4866_v33 = vpack.c.bf16 %v2280_v39, %v2279_v40  ;;  %v2057_v7 = vadd.f32 %v2056_v32, %v1968_v22  ;;  %v2353_v39 = vld [vmem:[%s5005_s7 + $0x20] sm:$0xff] }
 0x3e2   : > { %v2093_v28 = vmax.f32 %v2057_v7, 0.0 }
 0x3e3   : > { %v2219_v21 = vpop.f32.mrf.mxu1 }
 0x3e4   : > { %v2110_v38 = vpack.c.bf16 %v2093_v28, %v2092_v58  ;;  %v2220_v45 = vadd.f32 %v4830_v4, %v2219_v21 }
 0x3e6   : > { %2258 = vmatmul.bf16.gmra.mxu1 %v2110_v38  ;;  %v2281_v30 = vmax.f32 %v2220_v45, 0.0  ;;  %v2357_v45 = vld [vmem:[%s5005_s7 + $0x40] sm:$0xff] }
 0x3e7   : > { %v2059_v53 = vpop.f32.mrf.mxu0 }
 0x3e8   : > { %v2060_v57 = vadd.f32 %v2059_v53, %v1971_v31  ;;  %v2351_v53 = vld [vmem:[%s5005_s7 + $0x10] sm:$0xff] }
 0x3e9   : > { %2409 = vperm.xlu2 %3214, %v2351_v53  }
 0x3ea   : > { %v2094_v43 = vmax.f32 %v2060_v57, 0.0 }
 0x3eb   : > { %v2221_v26 = vpop.f32.mrf.mxu1 }
 0x3ec   : > { %v2222_v16 = vadd.f32 %v4830_v4, %v2221_v26 }
 0x3ee   : > { %v2282_v36 = vmax.f32 %v2222_v16, 0.0  ;;  %v2352_v16 = vld [vmem:[%s5005_s7 + $0x18] sm:$0xff] }
 0x3ef   : > { %v2061_v41 = vpop.f32.mrf.mxu0 }
 0x3f0   : > { %v4872_v34 = vpack.c.bf16 %v2282_v36, %v2281_v30  ;;  %v2062_v48 = vadd.f32 %v2061_v41, %v1973_v42  ;;  %v2359_v42 = vld [vmem:[%s5005_s7 + $0x50] sm:$0xff] }
 0x3f1   : > { %2414 = vperm.xlu2 %3214, %v2352_v16  }
 0x3f2   : > { %v2095_v44 = vmax.f32 %v2062_v48, 0.0 }
 0x3f3   : > { %v2224_v6 = vpop.f32.mrf.mxu1 }
 0x3f4   : > { %v2111_v59 = vpack.c.bf16 %v2095_v44, %v2094_v43  ;;  %v2225_v5 = vadd.f32 %v4830_v4, %v2224_v6  ;;  %v2354_v43 = vld [vmem:[%s5005_s7 + $0x28] sm:$0xff] }
 0x3f6   : > { %2263 = vmatmul.bf16.gmra.mxu1 %v2111_v59  ;;  %v2283_v56 = vmax.f32 %v2225_v5, 0.0  ;;  %v2363_v59 = vld [vmem:[%s5005_s7 + $0x70] sm:$0xff]  ;;  %v2356_v5 = vld [vmem:[%s5005_s7 + $0x38] sm:$0xff] }
 0x3f9   : > { %2424 = vperm.xlu2 %3214, %v2354_v43  }
 0x3fb   : > { %v2226_v20 = vpop.f32.mrf.mxu1 }
 0x3fc   : > { %v2227_v3 = vadd.f32 %v4830_v4, %v2226_v20 }
 0x3fe   : > { %v2284_v10 = vmax.f32 %v2227_v3, 0.0 }
 0x400   : > { %v4876_v61 = vpack.c.bf16 %v2284_v10, %v2283_v56  ;;  %v2551_v56 = vld [vmem:[#allocation2] sm:$0x1] }
 0x401   : > { %2434 = vperm.xlu2 %3214, %v2356_v5  }
 0x403   : > { %v2229_v54 = vpop.f32.mrf.mxu1 }
 0x404   : > { %v2230_v49 = vadd.f32 %v4830_v4, %v2229_v54 }
 0x406   : > { %v2285_v8 = vmax.f32 %v2230_v49, 0.0 }
 0x40b   : > { %v2231_v50 = vpop.f32.mrf.mxu1 }
 0x40c   : > { %v2232_v23 = vadd.f32 %v4830_v4, %v2231_v50 }
 0x40e   : > { %v2286_v55 = vmax.f32 %v2232_v23, 0.0 }
 0x410   : > { %v2309_v15 = vpack.c.bf16 %v2286_v55, %v2285_v8  ;;  %v2360_v8 = vld [vmem:[%s5005_s7 + $0x58] sm:$0xff] }
 0x412   : > { %3215 = vxpose.binary.xlu0.c.b16.start [1/16] %v2309_v15, %v4836_v24, 128 }
 0x413   : > { %v2234_v60 = vpop.f32.mrf.mxu1 }
 0x414   : > { %v2235_v0 = vadd.f32 %v4830_v4, %v2234_v60 }
 0x416   : > { %v2287_v62 = vmax.f32 %v2235_v0, 0.0  ;;  %v2362_v0 = vld [vmem:[%s5005_s7 + $0x68] sm:$0xff] }
 0x41b   : > { %v2236_v29 = vpop.f32.mrf.mxu1 }
 0x41c   : > { %v2237_v35 = vadd.f32 %v4830_v4, %v2236_v29 }
 0x41e   : > { %v2288_v18 = vmax.f32 %v2237_v35, 0.0 }
 0x420   : > { %v2310_v9 = vpack.c.bf16 %v2288_v18, %v2287_v62 }
 0x422   : > { %3216 = vxpose.binary.xlu0.c.b16.cont [2/16] %v2310_v9, %v4842_v13, 128  ;;  %v2350_v13 = vld [vmem:[%s5005_s7 + $0x8] sm:$0xff] }
 0x423   : > { %v2239_v17 = vpop.f32.mrf.mxu1  ;;  %2404 = vperm.xlu1 %3213, %v2350_v13  }
 0x424   : > { %v2240_v24 = vadd.f32 %v4830_v4, %v2239_v17 }
 0x426   : > { %v2289_v12 = vmax.f32 %v2240_v24, 0.0 }
 0x42b   : > { %v2241_v46 = vpop.f32.mrf.mxu1  ;;  %2419 = vperm.xlu1 %3213, %v2353_v39  }
 0x42c   : > { %v2242_v19 = vadd.f32 %v4830_v4, %v2241_v46 }
 0x42e   : > { %v2290_v11 = vmax.f32 %v2242_v19, 0.0 }
 0x430   : > { %v2311_v14 = vpack.c.bf16 %v2290_v11, %v2289_v12 }
 0x432   : > { %3217 = vxpose.binary.xlu0.c.b16.cont [3/16] %v2311_v14, %v4848_v51, 128  ;;  %v2355_v51 = vld [vmem:[%s5005_s7 + $0x30] sm:$0xff] }
 0x433   : > { %v2244_v25 = vpop.f32.mrf.mxu1  ;;  %2429 = vperm.xlu1 %3213, %v2355_v51  }
 0x434   : > { %v2245_v22 = vadd.f32 %v4830_v4, %v2244_v25 }
 0x436   : > { %v2291_v32 = vmax.f32 %v2245_v22, 0.0 }
 0x43b   : > { %v2246_v40 = vpop.f32.mrf.mxu1  ;;  %2439 = vperm.xlu1 %3213, %v2357_v45  }
 0x43c   : > { %v2247_v63 = vadd.f32 %v4830_v4, %v2246_v40 }
 0x43e   : > { %v2292_v7 = vmax.f32 %v2247_v63, 0.0 }
 0x440   : > { %v2312_v2 = vpack.c.bf16 %v2292_v7, %v2291_v32 }
 0x442   : > { %3218 = vxpose.binary.xlu0.c.b16.cont [4/16] %v2312_v2, %v4854_v1, 128 }
 0x443   : > { %v2249_v58 = vpop.f32.mrf.mxu1  ;;  %2449 = vperm.xlu1 %3213, %v2359_v42   ;;  %v2410_v37 = vpop.permute.xlu2 %2409 }
 0x444   : > { %v2250_v28 = vadd.f32 %v4830_v4, %v2249_v58 }
 0x446   : > { %v2293_v1 = vmax.f32 %v2250_v28, 0.0 }
 0x449   : > { %v2400_v9 = vpop.permute.xlu1 %2399 }
 0x44b   : > { %v2251_v21 = vpop.f32.mrf.mxu1  ;;  %v2415_v25 = vpop.permute.xlu2 %2414 }
 0x44c   : > { %v2252_v38 = vadd.f32 %v4830_v4, %v2251_v21 }
 0x44e   : > { %v2294_v52 = vmax.f32 %v2252_v38, 0.0 }
 0x450   : > { %v2313_v26 = vpack.c.bf16 %v2294_v52, %v2293_v1 }
 0x452   : > { %3219 = vxpose.binary.xlu0.c.b16.cont [5/16] %v2313_v26, %v4860_v27, 128  ;;  %v2361_v27 = vld [vmem:[%s5005_s7 + $0x60] sm:$0xff] }
 0x453   : > { %v2254_v31 = vpop.f32.mrf.mxu1  ;;  %2459 = vperm.xlu1 %3213, %v2361_v27  }
 0x454   : > { %v2255_v30 = vadd.f32 %v4830_v4, %v2254_v31 }
 0x456   : > { %v2295_v41 = vmax.f32 %v2255_v30, 0.0 }
 0x45b   : > { %v2256_v57 = vpop.f32.mrf.mxu1  ;;  %2469 = vperm.xlu1 %3213, %v2363_v59  }
 0x45c   : > { %v2257_v36 = vadd.f32 %v4830_v4, %v2256_v57  ;;  %v2425_v57 = vpop.permute.xlu2 %2424 }
 0x45e   : > { %v2296_v48 = vmax.f32 %v2257_v36, 0.0 }
 0x460   : > { %v2314_v44 = vpack.c.bf16 %v2296_v48, %v2295_v41 }
 0x462   : > { %3220 = vxpose.binary.xlu0.c.b16.cont [6/16] %v2314_v44, %v4866_v33, 128  ;;  %v2358_v33 = vld [vmem:[%s5005_s7 + $0x48] sm:$0xff] }
 0x463   : > { %v2259_v6 = vpop.f32.mrf.mxu1  ;;  %2554 = vperm.xlu1 %3213, %v2551_v56   ;;  %2444 = vperm.xlu2 %3214, %v2358_v33  }
 0x464   : > { %v2260_v20 = vadd.f32 %v4830_v4, %v2259_v6 }
 0x466   : > { %v2297_v54 = vmax.f32 %v2260_v20, 0.0  ;;  %v2435_v20 = vpop.permute.xlu2 %2434 }
 0x46b   : > { %v2261_v3 = vpop.f32.mrf.mxu1  ;;  %2454 = vperm.xlu2 %3214, %v2360_v8  }
 0x46c   : > { %v2262_v10 = vadd.f32 %v4830_v4, %v2261_v3 }
 0x46e   : > { %v2298_v49 = vmax.f32 %v2262_v10, 0.0 }
 0x470   : > { %v2315_v50 = vpack.c.bf16 %v2298_v49, %v2297_v54 }
 0x472   : > { %3221 = vxpose.binary.xlu0.c.b16.cont [7/16] %v2315_v50, %v4872_v34, 128  ;;  %v2364_v34 = vld [vmem:[%s5005_s7 + $0x78] sm:$0xff] }
 0x473   : > { %v2264_v23 = vpop.f32.mrf.mxu1  ;;  %2464 = vperm.xlu2 %3214, %v2362_v0  }
 0x474   : > { %v2265_v55 = vadd.f32 %v4830_v4, %v2264_v23 }
 0x476   : > { %v2299_v29 = vmax.f32 %v2265_v55, 0.0 }
 0x47b   : > { %v2266_v15 = vpop.f32.mrf.mxu1  ;;  %2474 = vperm.xlu2 %3214, %v2364_v34  }
 0x47c   : > { %v2267_v60 = vadd.f32 %v4830_v4, %v2266_v15 }
 0x47e   : > { %v2300_v35 = vmax.f32 %v2267_v60, 0.0 }
 0x480   : > { %v2316_v62 = vpack.c.bf16 %v2300_v35, %v2299_v29 }
 0x482   : > { %3222 = vxpose.binary.xlu0.c.b16.end [8/16] %v2316_v62, %v4876_v61, 128 }
 0x495   : > { %v2405_v46 = vpop.permute.xlu1 %2404 }
 0x49d   : > { %v2420_v42 = vpop.permute.xlu1 %2419 }
 0x4a5   : > { %v2430_v5 = vpop.permute.xlu1 %2429 }
 0x4ad   : > { %v2440_v56 = vpop.permute.xlu1 %2439 }
 0x4bd   : > { %v2445_v33 = vpop.permute.xlu2 %2444 }
 0x4be   : > { %v3223_v18 = vpop.trf.xlu0 }
 0x4bf   : > { %v2365_v4 = vunpack.c.l.bf16 %v3223_v18  ;;  %v2367_v24 = vunpack.c.h.bf16 %v3223_v18 }
 0x4c1   : > { %v2477_v19 = vmul.f32 %v2400_v9, %v2365_v4  ;;  %v2479_v13 = vmul.f32 %v2405_v46, %v2367_v24 }
 0x4c3   : > { %v2509_v22 = vadd.f32 %v2479_v13, %v2477_v19 }
 0x4c5   : > { %v2455_v18 = vpop.permute.xlu2 %2454 }
 0x4c6   : > { %v3224_v17 = vpop.trf.xlu0 }
 0x4c7   : > { %v2366_v61 = vunpack.c.l.bf16 %v3224_v17  ;;  %v2368_v40 = vunpack.c.h.bf16 %v3224_v17 }
 0x4c9   : > { %v2478_v7 = vmul.f32 %v2400_v9, %v2366_v61  ;;  %v2480_v2 = vmul.f32 %v2405_v46, %v2368_v40 }
 0x4cb   : > { %v2530_v38 = vadd.f32 %v2480_v2, %v2478_v7 }
 0x4ce   : > { %v3225_v12 = vpop.trf.xlu0 }
 0x4cf   : > { %v2369_v11 = vunpack.c.l.bf16 %v3225_v12  ;;  %v2371_v14 = vunpack.c.h.bf16 %v3225_v12 }
 0x4d1   : > { %v2481_v63 = vmul.f32 %v2410_v37, %v2369_v11  ;;  %v2483_v39 = vmul.f32 %v2415_v25, %v2371_v14 }
 0x4d3   : > { %v2510_v32 = vadd.f32 %v2509_v22, %v2481_v63 }
 0x4d5   : > { %v2511_v58 = vadd.f32 %v2510_v32, %v2483_v39 }
 0x4d6   : > { %v3226_v51 = vpop.trf.xlu0 }
 0x4d7   : > { %v2370_v28 = vunpack.c.l.bf16 %v3226_v51  ;;  %v2372_v21 = vunpack.c.h.bf16 %v3226_v51 }
 0x4d9   : > { %v2482_v53 = vmul.f32 %v2410_v37, %v2370_v28  ;;  %v2484_v45 = vmul.f32 %v2415_v25, %v2372_v21  ;;  %v2465_v21 = vpop.permute.xlu2 %2464 }
 0x4db   : > { %v2531_v1 = vadd.f32 %v2530_v38, %v2482_v53 }
 0x4dd   : > { %v2532_v52 = vadd.f32 %v2531_v1, %v2484_v45 }
 0x4de   : > { %v3227_v26 = vpop.trf.xlu0 }
 0x4df   : > { %v2373_v31 = vunpack.c.l.bf16 %v3227_v26  ;;  %v2375_v16 = vunpack.c.h.bf16 %v3227_v26 }
 0x4e1   : > { %v2485_v30 = vmul.f32 %v2420_v42, %v2373_v31  ;;  %v2487_v36 = vmul.f32 %v2425_v57, %v2375_v16 }
 0x4e3   : > { %v2512_v27 = vadd.f32 %v2511_v58, %v2485_v30 }
 0x4e5   : > { %v2513_v41 = vadd.f32 %v2512_v27, %v2487_v36 }
 0x4e6   : > { %v3228_v48 = vpop.trf.xlu0 }
 0x4e7   : > { %v2374_v54 = vunpack.c.l.bf16 %v3228_v48  ;;  %v2376_v15 = vunpack.c.h.bf16 %v3228_v48 }
 0x4e9   : > { %3239 = vset.pattern.permute.xlu0 %v3314_v47  ;;  %v2486_v23 = vmul.f32 %v2420_v42, %v2374_v54  ;;  %v2450_v47 = vpop.permute.xlu1 %2449  ;;  %v2488_v34 = vmul.f32 %v2425_v57, %v2376_v15 }
 0x4eb   : > { %v2533_v29 = vadd.f32 %v2532_v52, %v2486_v23 }
 0x4ed   : > { %v2534_v19 = vadd.f32 %v2533_v29, %v2488_v34 }
 0x4ee   : > { %v3229_v43 = vpop.trf.xlu0 }
 0x4ef   : > { %v2377_v10 = vunpack.c.l.bf16 %v3229_v43  ;;  %v2379_v8 = vunpack.c.h.bf16 %v3229_v43 }
 0x4f1   : > { %v2489_v50 = vmul.f32 %v2430_v5, %v2377_v10  ;;  %v2491_v35 = vmul.f32 %v2435_v20, %v2379_v8  ;;  %v2460_v32 = vpop.permute.xlu1 %2459 }
 0x4f3   : > { %v2514_v60 = vadd.f32 %v2513_v41, %v2489_v50 }
 0x4f5   : > { %v2515_v17 = vadd.f32 %v2514_v60, %v2491_v35 }
 0x4f6   : > { %v3230_v44 = vpop.trf.xlu0 }
 0x4f7   : > { %v2378_v0 = vunpack.c.l.bf16 %v3230_v44  ;;  %v2380_v46 = vunpack.c.h.bf16 %v3230_v44 }
 0x4f9   : > { %v2490_v37 = vmul.f32 %v2430_v5, %v2378_v0  ;;  %v2492_v22 = vmul.f32 %v2435_v20, %v2380_v46  ;;  %v2470_v44 = vpop.permute.xlu1 %2469 }
 0x4fb   : > { %v2535_v11 = vadd.f32 %v2534_v19, %v2490_v37 }
 0x4fd   : > { %v2536_v2 = vadd.f32 %v2535_v11, %v2492_v22 }
 0x4fe   : > { %v3231_v6 = vpop.trf.xlu0 }
 0x4ff   : > { %v2381_v55 = vunpack.c.l.bf16 %v3231_v6  ;;  %v2383_v4 = vunpack.c.h.bf16 %v3231_v6 }
 0x501   : > { %v2493_v62 = vmul.f32 %v2440_v56, %v2381_v55  ;;  %v2495_v14 = vmul.f32 %v2445_v33, %v2383_v4 }
 0x503   : > { %v2516_v13 = vadd.f32 %v2515_v17, %v2493_v62  ;;  %v2555_v17 = vpop.permute.xlu1 %2554 }
 0x505   : > { %v2517_v61 = vadd.f32 %v2516_v13, %v2495_v14 }
 0x506   : > { %v3232_v59 = vpop.trf.xlu0 }
 0x507   : > { %v2382_v12 = vunpack.c.l.bf16 %v3232_v59  ;;  %v2384_v58 = vunpack.c.h.bf16 %v3232_v59 }
 0x509   : > { %v2494_v40 = vmul.f32 %v2440_v56, %v2382_v12  ;;  %v2496_v1 = vmul.f32 %v2445_v33, %v2384_v58 }
 0x50b   : > { %v2537_v38 = vadd.f32 %v2536_v2, %v2494_v40 }
 0x50d   : > { %v2538_v16 = vadd.f32 %v2537_v38, %v2496_v1 }
 0x50e   : > { %v3233_v3 = vpop.trf.xlu0 }
 0x50f   : > { %v2385_v24 = vunpack.c.l.bf16 %v3233_v3  ;;  %v2387_v63 = vunpack.c.h.bf16 %v3233_v3  ;;  %v2475_v3 = vpop.permute.xlu2 %2474 }
 0x511   : > { %v2497_v25 = vmul.f32 %v2450_v47, %v2385_v24  ;;  %v2499_v53 = vmul.f32 %v2455_v18, %v2387_v63  ;;  %v2557_v24 = vperm.slane %v2555_v17, 0 }
 0x513   : > { %v2518_v51 = vadd.f32 %v2517_v61, %v2497_v25 }
 0x515   : > { %v2519_v52 = vadd.f32 %v2518_v51, %v2499_v53 }
 0x516   : > { %v3234_v49 = vpop.trf.xlu0 }
 0x517   : > { %v2386_v28 = vunpack.c.l.bf16 %v3234_v49  ;;  %v2388_v42 = vunpack.c.h.bf16 %v3234_v49 }
 0x519   : > { %v2498_v26 = vmul.f32 %v2450_v47, %v2386_v28  ;;  %v2500_v6 = vmul.f32 %v2455_v18, %v2388_v42 }
 0x51b   : > { %v2539_v27 = vadd.f32 %v2538_v16, %v2498_v26 }
 0x51d   : > { %v2540_v56 = vadd.f32 %v2539_v27, %v2500_v6 }
 0x51e   : > { %v3235_v9 = vpop.trf.xlu0 }
 0x51f   : > { %v2389_v39 = vunpack.c.l.bf16 %v3235_v9  ;;  %v2391_v31 = vunpack.c.h.bf16 %v3235_v9 }
 0x521   : > { %v2501_v45 = vmul.f32 %v2460_v32, %v2389_v39  ;;  %v2503_v41 = vmul.f32 %v2465_v21, %v2391_v31 }
 0x523   : > { %v2520_v30 = vadd.f32 %v2519_v52, %v2501_v45 }
 0x525   : > { %v2521_v59 = vadd.f32 %v2520_v30, %v2503_v41 }
 0x526   : > { %v3236_v7 = vpop.trf.xlu0 }
 0x527   : > { %v2390_v57 = vunpack.c.l.bf16 %v3236_v7  ;;  %v2392_v10 = vunpack.c.h.bf16 %v3236_v7 }
 0x529   : > { %v2502_v5 = vmul.f32 %v2460_v32, %v2390_v57  ;;  %v2504_v8 = vmul.f32 %v2465_v21, %v2392_v10  ;;  %v2604_v57 = vlaneseq }
 0x52b   : > { %v2541_v50 = vadd.f32 %v2540_v56, %v2502_v5  ;;  %vm2606_vm10 = vcmp.lt.s32.totalorder %v2604_v57, 256 }
 0x52d   : > { %v2542_v0 = vadd.f32 %v2541_v50, %v2504_v8 }
 0x52e   : > { %v3237_v36 = vpop.trf.xlu0 }
 0x52f   : > { %v2393_v48 = vunpack.c.l.bf16 %v3237_v36  ;;  %v2395_v43 = vunpack.c.h.bf16 %v3237_v36 }
 0x531   : > { %v2505_v20 = vmul.f32 %v2470_v44, %v2393_v48  ;;  %v2507_v33 = vmul.f32 %v2475_v3, %v2395_v43 }
 0x533   : > { %v2522_v54 = vadd.f32 %v2521_v59, %v2505_v20 }
 0x535   : > { %v2523_v23 = vadd.f32 %v2522_v54, %v2507_v33 }
 0x536   : > { %v3238_v49 = vpop.trf.xlu0 }
 0x537   : > { %v2524_v55 = vrot.slane %v2523_v23, 4  ;;  %v2394_v15 = vunpack.c.l.bf16 %v3238_v49  ;;  %v2396_v60 = vunpack.c.h.bf16 %v3238_v49 }
 0x539   : > { %v2525_v47 = vadd.f32 %v2524_v55, %v2523_v23  ;;  %v2506_v29 = vmul.f32 %v2470_v44, %v2394_v15  ;;  %v2508_v62 = vmul.f32 %v2475_v3, %v2396_v60 }
 0x53b   : > { %v2526_v35 = vrot.slane %v2525_v47, 2  ;;  %v2543_v34 = vadd.f32 %v2542_v0, %v2506_v29 }
 0x53d   : > { %v2527_v18 = vadd.f32 %v2526_v35, %v2525_v47  ;;  %v2544_v9 = vadd.f32 %v2543_v34, %v2508_v62 }
 0x53f   : > { %v2528_v37 = vrot.slane %v2527_v18, 1  ;;  %v2545_v4 = vrot.slane %v2544_v9, 4 }
 0x541   : > { %v2529_v46 = vadd.f32 %v2528_v37, %v2527_v18  ;;  %v2546_v19 = vadd.f32 %v2545_v4, %v2544_v9 }
 0x543   : > { %v2558_v13 = vadd.f32 %v2557_v24, %v2529_v46  ;;  %v2547_v12 = vrot.slane %v2546_v19, 2 }
 0x545   : > { %v3060_v11 = vmul.f32 -1.442695, %v2558_v13  ;;  %v2548_v14 = vadd.f32 %v2547_v12, %v2546_v19 }
 0x547   : > { %3242 = vpow2.f32 %v3060_v11  ;;  %v2549_v25 = vrot.slane %v2548_v14, 1 }
 0x549   : > { %v2550_v22 = vadd.f32 %v2549_v25, %v2548_v14 }
 0x54b   : > { %v2559_v61 = vadd.f32 %v2557_v24, %v2550_v22 }
 0x54d   : > { %v3243_v40 = vpop.eup %3242  ;;  %v3061_v63 = vmul.f32 -1.442695, %v2559_v61 }
 0x54e   : > { %v2566_v39 = vadd.f32 1.0, %v3243_v40 }
 0x54f   : > { %3244 = vpow2.f32 %v3061_v63 }
 0x550   : > { %3246 = vrcp.f32 %v2566_v39  ;;  %vm2573_vm3 = vweird.f32 %v2566_v39  ;;  %v2579_v31 = vand.u32 2147483648, %v2566_v39  ;;  %v2577_v42 = vand.u32 2147483647, %v2566_v39 }
 0x552   : > { %v2580_v48 = vor.u32 1.1754944e-38, %v2579_v31  ;;  %vm2578_vm9 = vcmp.eq.f32.partialorder %v2577_v42, 8.507059e+37 }
 0x555   : > { %v3245_v32 = vpop.eup %3244 }
 0x556   : > { %v3247_v7 = vpop.eup %3246  ;;  %v2567_v2 = vadd.f32 1.0, %v3245_v32 }
 0x557   : > { %v2569_v58 = vmul.f32 %v3247_v7, %v2566_v39  ;;  %vm2574_vm1 = vweird.f32 %v3247_v7 }
 0x558   : > { %3248 = vrcp.f32 %v2567_v2  ;;  %v2594_v45 = vand.u32 2147483648, %v2567_v2  ;;  %v2592_v26 = vand.u32 2147483647, %v2567_v2  ;;  %vm4962_vm4 = vmor %vm2573_vm3, %vm2574_vm1  ;;  %vm2588_vm5 = vweird.f32 %v2567_v2 }
 0x559   : > { %v2570_v51 = vsub.f32 1.0, %v2569_v58 }
 0x55a   : > { %v2595_v36 = vor.u32 1.1754944e-38, %v2594_v45  ;;  %vm2593_vm7 = vcmp.eq.f32.partialorder %v2592_v26, 8.507059e+37 }
 0x55b   : > { %v2571_v21 = vmul.f32 %v3247_v7, %v2570_v51 }
 0x55d   : > { %v2572_v1 = vadd.f32 %v3247_v7, %v2571_v21 }
 0x55e   : > { %v3249_v28 = vpop.eup %3248 }
 0x55f   : > { %v2584_v38 = vmul.f32 %v3249_v28, %v2567_v2  ;;  %vm2589_vm2 = vweird.f32 %v3249_v28  ;;  %v2576_v27 = vsel %vm4962_vm4, %v3247_v7, %v2572_v1 }
 0x560   : > { %vm2590_vm6 = vmor %vm2588_vm5, %vm2589_vm2  ;;  %v2581_v6 = vsel %vm2578_vm9, %v2580_v48, %v2576_v27 }
 0x561   : > { %v2585_v53 = vsub.f32 1.0, %v2584_v38 }
 0x563   : > { %v2586_v52 = vmul.f32 %v3249_v28, %v2585_v53 }
 0x565   : > { %v2587_v30 = vadd.f32 %v3249_v28, %v2586_v52 }
 0x567   : > { %v2591_v41 = vsel %vm2590_vm6, %v3249_v28, %v2587_v30 }
 0x568   : > { %v2596_v43 = vsel %vm2593_vm7, %v2595_v36, %v2591_v41 }
 0x569   : > { %v2600_v44 = vrot.slane %v2596_v43, 7 }
 0x56b   : > { %v2602_v59 = vsel %vm2601_vm8, %v2581_v6, %v2600_v44 }
 0x56c   : > { %2608 = vst.msk [vmem:[%s330_s8] sm:$0x3] %vm2606_vm10, %v2602_v59 }
 0x56d   : > { %3277 = shalt.err (!%p3274_p3)
}
 0x56e   : > { %3173 = dma.vmem_to_hbm [thread:$0]  (%p3406_p5), %s2623_s26, 32, %s2625_s27, %s2610_s28  }
 0x56f PF: > { %p3179_p4 = scmp.ge.s32.totalorder %s3312_s14, 2  ;;  %s2636_s15 = sand.u32 1, %s3300_s11  }
 0x570   : > { %s2637_s17 = scalar_lea.sflag [#allocation4], %s2636_s15 }
 0x571   : > { %p3176_p7 = pnand %p3179_p4, %p3410_p6 }
 0x573   : > { %p3177_p8 = pneg %p3176_p7 }
 0x575   : > { %3295 = dma.done.wait (%p3177_p8), %s2637_s17, 32  }
 0x576   : > { %3297 = vsyncadd (%p3177_p8), %s2637_s17, 4294967264  ;;  %p21_p9 = scmp.ge.s32.totalorder %s3393_s16, 4   ;;  %s5114_s11 = smov %s3304_s12 }
 0x577   : > { %s5115_s12 = smov %s3308_s13  ;;  %s5116_s13 = smov %s3404_s19 }
 0x578   : > { %s5117_s14 = smov %s3393_s16  ;;  %23 = sbr.rel (!%p21_p9) target bundleno = 6 (0x6), region = 91 }
 0x57d   :  { %2643 = vsyncpa [#allocation4], 1 }
 0x57e   :  { %2645 = vsyncpa [#allocation4 + $0x1], 1 }

</bundles_post_ra>
